<compile_context>
chip_gen: v6e
topology: v6e:2x2x1
jax: 0.10.0
libtpu: 0.0.40
codegen_flags: <defaults>
</compile_context>

<pallas_src>
import jax
import jax.numpy as jnp
from jax import lax
from jax.experimental import pallas as pl
from jax.experimental.pallas import tpu as pltpu


def _round_up(x, m):
    return (x + m - 1) // m * m


# ----------------------------- Pallas kernel ------------------------------

def _make_rnn_kernel(T_blk, H_pad, n_blk):
    H3 = 3 * H_pad

    def gru_gates(gi, gh, h):
        """PyTorch-convention GRU gate math in f32. gi/gh: (B, 3*H_pad)."""
        r = jax.nn.sigmoid(gi[:, 0:H_pad] + gh[:, 0:H_pad])
        z = jax.nn.sigmoid(gi[:, H_pad:2 * H_pad] + gh[:, H_pad:2 * H_pad])
        n = jnp.tanh(gi[:, 2 * H_pad:H3] + r * gh[:, 2 * H_pad:H3])
        return (1.0 - z) * n + z * h

    def kernel(len_ref, emb_f_ref, emb_b_ref,
               w_ih_f_ref, w_ih_b_ref, w_hh_ref,
               b_ih_f_ref, b_ih_b_ref, b_hh_ref,
               fc_w_ref, fc_b_ref,
               out_ref, h_ref):
        g = pl.program_id(1)                       # time-block index ("arbitrary")

        @pl.when(g == 0)
        def _init():
            h_ref[...] = jnp.zeros_like(h_ref)

        B_blk = emb_f_ref.shape[1]
        lengths = len_ref[...]                     # (B_blk, 1) int32, descending

        # ---- hoisted input projections: outside the serial dependency chain ---
        emb_f = emb_f_ref[...].reshape(T_blk * B_blk, H_pad)          # bf16
        emb_b = emb_b_ref[...].reshape(T_blk * B_blk, H_pad)
        gi_f_all = jnp.dot(emb_f, w_ih_f_ref[...],
                           preferred_element_type=jnp.float32) + b_ih_f_ref[...]
        gi_b_all = jnp.dot(emb_b, w_ih_b_ref[...],
                           preferred_element_type=jnp.float32) + b_ih_b_ref[...]

        w_hh = w_hh_ref[...]                       # (2H_pad, 6H_pad) bf16, block-diag
        b_hh = b_hh_ref[...]                       # (1, 6H_pad) f32

        h_f = h_ref[:, 0:H_pad]                    # carried across grid steps
        h_b = h_ref[:, H_pad:2 * H_pad]

        base_f = g * T_blk                         # global forward time of step 0
        base_b = (n_blk - 1 - g) * T_blk           # global time base of bwd block

        # Fully unrolled recurrence over the (small, static) time block.
        for s in range(T_blk):
            t_f = base_f + s
            t_b = base_b + (T_blk - 1 - s)

            # ONE fused recurrent matmul for both directions per step.
            h_cat = jnp.concatenate([h_f, h_b], axis=1).astype(jnp.bfloat16)
            gh = jnp.dot(h_cat, w_hh, preferred_element_type=jnp.float32) + b_hh

            gi_f = gi_f_all[s * B_blk:(s + 1) * B_blk, :]
            gi_b = gi_b_all[(T_blk - 1 - s) * B_blk:(T_blk - s) * B_blk, :]

            hf_new = gru_gates(gi_f, gh[:, 0:H3], h_f)
            hb_new = gru_gates(gi_b, gh[:, H3:2 * H3], h_b)

            # pack_padded_sequence masking (lengths sorted descending).
            h_f = jnp.where(t_f < lengths, hf_new, h_f)
            h_b = jnp.where(t_b < lengths, hb_new, h_b)

        h_ref[:, 0:H_pad] = h_f
        h_ref[:, H_pad:2 * H_pad] = h_b

        @pl.when(g == n_blk - 1)
        def _finalize():
            # fc_w pre-reordered so [h_f | h_b] @ fc_w == cat([h_b, h_f]) @ W^T.
            h_fin = jnp.concatenate([h_f, h_b], axis=1).astype(jnp.bfloat16)
            out_ref[...] = (jnp.dot(h_fin, fc_w_ref[...],
                                    preferred_element_type=jnp.float32)
                            + fc_b_ref[...])

    return kernel


# ------------------------------ JAX wrapper -------------------------------

def _pad_gates_wT(w, H, H_pad):
    """PyTorch (3H, H) gate-stacked weight -> transposed, per-gate lane-padded
    (H_pad, 3*H_pad) so every r/z/n slice is 128-lane aligned."""
    cols = []
    for k in range(3):
        wg_t = w[k * H:(k + 1) * H, :].T                     # (in=H, out=H)
        cols.append(jnp.pad(wg_t, ((0, H_pad - H), (0, H_pad - H))))
    return jnp.concatenate(cols, axis=1)


def _pad_gates_b(b, H, H_pad):
    segs = [jnp.pad(b[k * H:(k + 1) * H], (0, H_pad - H)) for k in range(3)]
    return jnp.concatenate(segs).reshape(1, 3 * H_pad)


def rnn_classifier_forward(tokens, seq_lengths, params, *, t_blk=4):
    """tokens: (B, T) int32, seq_lengths: (B,) int32 sorted descending."""
    B, T = tokens.shape
    H = params["embedding"].shape[1]
    O = params["fc_w"].shape[0]

    H_pad = _round_up(H, 128)              # lane-pad hidden dim
    O_pad = _round_up(O, 128)              # lane-dense output store
    B_pad = _round_up(B, 8)                # sublane-pad batch
    T_blk = min(t_blk, T)
    T_pad = _round_up(T, T_blk)
    n_blk = T_pad // T_blk
    B_blk = B_pad                          # single batch block at toy size; the
                                           # "parallel" grid axis shards larger B
                                           # across TCs on multi-core parts (v7x)

    # --- plain-JAX glue: pad batch/time, embedding gather, weight packing ---
    tokens_p = jnp.zeros((B_pad, T_pad), jnp.int32).at[:B, :T].set(tokens)
    lengths_p = jnp.zeros((B_pad, 1), jnp.int32).at[:B, 0].set(
        seq_lengths.astype(jnp.int32))

    # TODO(synk): embedding gather kept in the wrapper; at production sizes move
    # it in-kernel via scalar-prefetched token ids + row DMA (or store bf16).
    emb = jnp.take(params["embedding"], tokens_p.T, axis=0)           # (T_pad, B_pad, H)
    emb = jnp.pad(emb, ((0, 0), (0, 0), (0, H_pad - H))).astype(jnp.bfloat16)

    w_ih_f = _pad_gates_wT(params["w_ih_f"], H, H_pad).astype(jnp.bfloat16)
    w_ih_b = _pad_gates_wT(params["w_ih_b"], H, H_pad).astype(jnp.bfloat16)
    w_hh_f = _pad_gates_wT(params["w_hh_f"], H, H_pad)
    w_hh_b = _pad_gates_wT(params["w_hh_b"], H, H_pad)
    zeros = jnp.zeros((H_pad, 3 * H_pad), jnp.float32)
    w_hh_blk = jnp.concatenate(
        [jnp.concatenate([w_hh_f, zeros], axis=1),
         jnp.concatenate([zeros, w_hh_b], axis=1)], axis=0).astype(jnp.bfloat16)

    b_ih_f = _pad_gates_b(params["b_ih_f"], H, H_pad)
    b_ih_b = _pad_gates_b(params["b_ih_b"], H, H_pad)
    b_hh = jnp.concatenate([_pad_gates_b(params["b_hh_f"], H, H_pad),
                            _pad_gates_b(params["b_hh_b"], H, H_pad)], axis=1)

    # PyTorch: out = cat([h_b, h_f], 1) @ fc_w.T + fc_b.  Kernel carries
    # [h_f | h_b], so reorder + pad fc_w.T (no in-kernel concat at the FC).
    fc_wT = params["fc_w"].T                                          # (2H, O)
    fc_hf = jnp.pad(fc_wT[H:2 * H], ((0, H_pad - H), (0, O_pad - O)))
    fc_hb = jnp.pad(fc_wT[0:H], ((0, H_pad - H), (0, O_pad - O)))
    fc_w_p = jnp.concatenate([fc_hf, fc_hb], axis=0).astype(jnp.bfloat16)
    fc_b_p = jnp.pad(params["fc_b"], (0, O_pad - O)).reshape(1, O_pad)

    kernel = _make_rnn_kernel(T_blk, H_pad, n_blk)
    const = lambda b, g: (0, 0)

    grid_spec = pltpu.PrefetchScalarGridSpec(
        num_scalar_prefetch=0,
        grid=(B_pad // B_blk, n_blk),
        in_specs=[
            pl.BlockSpec((B_blk, 1), lambda b, g: (b, 0)),                    # lengths
            pl.BlockSpec((T_blk, B_blk, H_pad), lambda b, g: (g, b, 0)),      # emb, fwd stream
            pl.BlockSpec((T_blk, B_blk, H_pad),
                         lambda b, g: (n_blk - 1 - g, b, 0)),                 # emb, bwd stream
            pl.BlockSpec((H_pad, 3 * H_pad), const),                          # w_ih_f
            pl.BlockSpec((H_pad, 3 * H_pad), const),                          # w_ih_b
            pl.BlockSpec((2 * H_pad, 6 * H_pad), const),                      # w_hh block-diag
            pl.BlockSpec((1, 3 * H_pad), const),                              # b_ih_f
            pl.BlockSpec((1, 3 * H_pad), const),                              # b_ih_b
            pl.BlockSpec((1, 6 * H_pad), const),                              # b_hh
            pl.BlockSpec((2 * H_pad, O_pad), const),                          # fc_w
            pl.BlockSpec((1, O_pad), const),                                  # fc_b
        ],
        out_specs=pl.BlockSpec((B_blk, O_pad), lambda b, g: (b, 0)),
        scratch_shapes=[pltpu.VMEM((B_blk, 2 * H_pad), jnp.float32)],
    )

    out = pl.pallas_call(
        kernel,
        out_shape=jax.ShapeDtypeStruct((B_pad, O_pad), jnp.float32),
        grid_spec=grid_spec,
        compiler_params=pltpu.CompilerParams(
            dimension_semantics=("parallel", "arbitrary")),
    )(lengths_p, emb, emb, w_ih_f, w_ih_b, w_hh_blk,
      b_ih_f, b_ih_b, b_hh, fc_w_p, fc_b_p)

    return out[:B, :O]


# ----------------------- pure-JAX reference (check) ------------------------

def rnn_classifier_reference(tokens, seq_lengths, params):
    B, T = tokens.shape
    H = params["embedding"].shape[1]
    emb = jnp.take(params["embedding"], tokens.T, axis=0).astype(jnp.float32)
    lengths = seq_lengths.astype(jnp.int32).reshape(B, 1)

    def step(x, h, w_ih, w_hh, b_ih, b_hh):
        gi = x @ w_ih.T + b_ih
        gh = h @ w_hh.T + b_hh
        i_r, i_z, i_n = jnp.split(gi, 3, axis=1)
        h_r, h_z, h_n = jnp.split(gh, 3, axis=1)
        r = jax.nn.sigmoid(i_r + h_r)
        z = jax.nn.sigmoid(i_z + h_z)
        n = jnp.tanh(i_n + r * h_n)
        return (1.0 - z) * n + z * h

    h0 = jnp.zeros((B, H), jnp.float32)

    def body(i, carry):
        h_f, h_b = carry
        t_b = T - 1 - i
        hf_new = step(emb[i], h_f, params["w_ih_f"], params["w_hh_f"],
                      params["b_ih_f"], params["b_hh_f"])
        hb_new = step(emb[t_b], h_b, params["w_ih_b"], params["w_hh_b"],
                      params["b_ih_b"], params["b_hh_b"])
        h_f = jnp.where(i < lengths, hf_new, h_f)
        h_b = jnp.where(t_b < lengths, hb_new, h_b)
        return h_f, h_b

    h_f, h_b = lax.fori_loop(0, T, body, (h0, h0))
    hidden_cat = jnp.concatenate([h_b, h_f], axis=1)
    return hidden_cat @ params["fc_w"].T + params["fc_b"]


# --------------------------------- main ------------------------------------

def init_params(key, vocab, hidden, output):
    ks = jax.random.split(key, 11)
    bound = 1.0 / jnp.sqrt(hidden)
    u = lambda k, shape: jax.random.uniform(k, shape, jnp.float32, -bound, bound)
    fc_bound = 1.0 / jnp.sqrt(2 * hidden)
    return {
        "embedding": jax.random.normal(ks[0], (vocab, hidden), jnp.float32),
        "w_ih_f": u(ks[1], (3 * hidden, hidden)),
        "w_hh_f": u(ks[2], (3 * hidden, hidden)),
        "b_ih_f": u(ks[3], (3 * hidden,)),
        "b_hh_f": u(ks[4], (3 * hidden,)),
        "w_ih_b": u(ks[5], (3 * hidden, hidden)),
        "w_hh_b": u(ks[6], (3 * hidden, hidden)),
        "b_ih_b": u(ks[7], (3 * hidden,)),
        "b_hh_b": u(ks[8], (3 * hidden,)),
        "fc_w": jax.random.uniform(ks[9], (output, 2 * hidden), jnp.float32,
                                   -fc_bound, fc_bound),
        "fc_b": jax.random.uniform(ks[10], (output,), jnp.float32,
                                   -fc_bound, fc_bound),
    }


if __name__ == "__main__":
    VOCAB, HIDDEN, OUTPUT = 20, 32, 4      # input_size, hidden_size, output_size
    B, T = 4, 8                            # batch, max sequence length

    key = jax.random.PRNGKey(0)
    kp, kt = jax.random.split(key)
    params = init_params(kp, VOCAB, HIDDEN, OUTPUT)

    # pack_padded_sequence requires descending lengths.
    seq_lengths = jnp.array([8, 6, 5, 3], dtype=jnp.int32)
    tokens = jax.random.randint(kt, (B, T), 0, VOCAB, dtype=jnp.int32)
    pad_mask = jnp.arange(T)[None, :] < seq_lengths[:, None]
    tokens = jnp.where(pad_mask, tokens, 0).astype(jnp.int32)

    out = rnn_classifier_forward(tokens, seq_lengths, params, t_blk=4)
    out = jax.block_until_ready(out)

    ref = rnn_classifier_reference(tokens, seq_lengths, params)
    assert out.shape == (B, OUTPUT)
    # bf16 MXU operands with f32 accumulation => slightly looser tolerance
    # than the pure-f32 PyTorch-faithful reference.
    assert jnp.allclose(out, ref, atol=5e-2, rtol=5e-2), \
        f"max abs err {jnp.max(jnp.abs(out - ref))}"
    print("KERNEL_OK")
</pallas_src>

<mosaic_0001>
module attributes {stable_mosaic.version = 11 : i64} {
  func.func @kernel(%arg0: i32, %arg1: i32, %arg2: memref<8x1xi32, #tpu.memory_space<vmem>>, %arg3: memref<4x8x128xbf16, #tpu.memory_space<vmem>>, %arg4: memref<4x8x128xbf16, #tpu.memory_space<vmem>>, %arg5: memref<128x384xbf16, #tpu.memory_space<vmem>>, %arg6: memref<128x384xbf16, #tpu.memory_space<vmem>>, %arg7: memref<256x768xbf16, #tpu.memory_space<vmem>>, %arg8: memref<1x384xf32, #tpu.memory_space<vmem>>, %arg9: memref<1x384xf32, #tpu.memory_space<vmem>>, %arg10: memref<1x768xf32, #tpu.memory_space<vmem>>, %arg11: memref<256x128xbf16, #tpu.memory_space<vmem>>, %arg12: memref<1x128xf32, #tpu.memory_space<vmem>>, %arg13: memref<8x128xf32, #tpu.memory_space<vmem>>, %arg14: memref<8x256xf32, #tpu.memory_space<vmem>>) attributes {dimension_semantics = [#tpu.dimension_semantics<parallel>, #tpu.dimension_semantics<arbitrary>], iteration_bounds = array<i64: 1, 2>, scalar_prefetch = 0 : i64, scratch_operands = 1 : i64, tpu.core_type = #tpu.core_type<tc>, window_params = [{transform_indices = @transform_0, window_bounds = array<i64: 8, 1>}, {transform_indices = @transform_1, window_bounds = array<i64: 4, 8, 128>}, {transform_indices = @transform_2, window_bounds = array<i64: 4, 8, 128>}, {pipeline_mode = #tpu.pipeline_mode<synchronous>, transform_indices = @transform_3, window_bounds = array<i64: 128, 384>}, {pipeline_mode = #tpu.pipeline_mode<synchronous>, transform_indices = @transform_4, window_bounds = array<i64: 128, 384>}, {pipeline_mode = #tpu.pipeline_mode<synchronous>, transform_indices = @transform_5, window_bounds = array<i64: 256, 768>}, {pipeline_mode = #tpu.pipeline_mode<synchronous>, transform_indices = @transform_6, window_bounds = array<i64: 1, 384>}, {pipeline_mode = #tpu.pipeline_mode<synchronous>, transform_indices = @transform_7, window_bounds = array<i64: 1, 384>}, {pipeline_mode = #tpu.pipeline_mode<synchronous>, transform_indices = @transform_8, window_bounds = array<i64: 1, 768>}, {pipeline_mode = #tpu.pipeline_mode<synchronous>, transform_indices = @transform_9, window_bounds = array<i64: 256, 128>}, {pipeline_mode = #tpu.pipeline_mode<synchronous>, transform_indices = @transform_10, window_bounds = array<i64: 1, 128>}, {transform_indices = @transform_11, window_bounds = array<i64: 8, 128>}]} {
    %c0_i32 = arith.constant 0 : i32
    %0 = arith.cmpi eq, %arg1, %c0_i32 : i32
    %1 = arith.extui %0 : i1 to i32
    %c0_i32_0 = arith.constant 0 : i32
    %2 = arith.cmpi ne, %1, %c0_i32_0 : i32
    scf.if %2 {
      %cst_65 = arith.constant 0.000000e+00 : f32
      %322 = vector.broadcast %cst_65 : f32 to vector<8x256xf32>
      %c0_66 = arith.constant 0 : index
      %c0_67 = arith.constant 0 : index
      %323 = vector.load %arg14[%c0_66, %c0_67] : memref<8x256xf32, #tpu.memory_space<vmem>>, vector<8x256xf32>
      tpu.vector_store %arg14[%c0_66, %c0_67], %322 {strides = array<i32>} : memref<8x256xf32, #tpu.memory_space<vmem>>, vector<8x256xf32>,
    } else {
    }
    %c0 = arith.constant 0 : index
    %c0_1 = arith.constant 0 : index
    %3 = vector.load %arg2[%c0, %c0_1] : memref<8x1xi32, #tpu.memory_space<vmem>>, vector<8x1xi32>
    %c0_2 = arith.constant 0 : index
    %c0_3 = arith.constant 0 : index
    %c0_4 = arith.constant 0 : index
    %4 = vector.load %arg3[%c0_2, %c0_3, %c0_4] : memref<4x8x128xbf16, #tpu.memory_space<vmem>>, vector<4x8x128xbf16>
    %5 = vector.shape_cast %4 : vector<4x8x128xbf16> to vector<32x128xbf16>
    %c0_5 = arith.constant 0 : index
    %c0_6 = arith.constant 0 : index
    %c0_7 = arith.constant 0 : index
    %6 = vector.load %arg4[%c0_5, %c0_6, %c0_7] : memref<4x8x128xbf16, #tpu.memory_space<vmem>>, vector<4x8x128xbf16>
    %7 = vector.shape_cast %6 : vector<4x8x128xbf16> to vector<32x128xbf16>
    %c0_8 = arith.constant 0 : index
    %c0_9 = arith.constant 0 : index
    %8 = vector.load %arg5[%c0_8, %c0_9] : memref<128x384xbf16, #tpu.memory_space<vmem>>, vector<128x384xbf16>
    %cst = arith.constant dense<0.000000e+00> : vector<32x384xf32>
    %9 = tpu.matmul %5, %8, %cst {dimension_numbers = #tpu.dot_dimension_numbers<[1], [0], [0], [1], [0, 0, 1, 1], [], []>} : vector<32x128xbf16>, vector<128x384xbf16>, vector<32x384xf32> -> vector<32x384xf32>
    %c0_10 = arith.constant 0 : index
    %c0_11 = arith.constant 0 : index
    %10 = vector.load %arg8[%c0_10, %c0_11] : memref<1x384xf32, #tpu.memory_space<vmem>>, vector<1x384xf32>
    %11 = vector.broadcast %10 : vector<1x384xf32> to vector<32x384xf32>
    %12 = arith.addf %9, %11 : vector<32x384xf32>
    %c0_12 = arith.constant 0 : index
    %c0_13 = arith.constant 0 : index
    %13 = vector.load %arg6[%c0_12, %c0_13] : memref<128x384xbf16, #tpu.memory_space<vmem>>, vector<128x384xbf16>
    %cst_14 = arith.constant dense<0.000000e+00> : vector<32x384xf32>
    %14 = tpu.matmul %7, %13, %cst_14 {dimension_numbers = #tpu.dot_dimension_numbers<[1], [0], [0], [1], [0, 0, 1, 1], [], []>} : vector<32x128xbf16>, vector<128x384xbf16>, vector<32x384xf32> -> vector<32x384xf32>
    %c0_15 = arith.constant 0 : index
    %c0_16 = arith.constant 0 : index
    %15 = vector.load %arg9[%c0_15, %c0_16] : memref<1x384xf32, #tpu.memory_space<vmem>>, vector<1x384xf32>
    %16 = vector.broadcast %15 : vector<1x384xf32> to vector<32x384xf32>
    %17 = arith.addf %14, %16 : vector<32x384xf32>
    %c0_17 = arith.constant 0 : index
    %c0_18 = arith.constant 0 : index
    %18 = vector.load %arg7[%c0_17, %c0_18] : memref<256x768xbf16, #tpu.memory_space<vmem>>, vector<256x768xbf16>
    %c0_19 = arith.constant 0 : index
    %c0_20 = arith.constant 0 : index
    %19 = vector.load %arg10[%c0_19, %c0_20] : memref<1x768xf32, #tpu.memory_space<vmem>>, vector<1x768xf32>
    %c0_21 = arith.constant 0 : index
    %c0_22 = arith.constant 0 : index
    %20 = vector.load %arg14[%c0_21, %c0_22] : memref<8x256xf32, #tpu.memory_space<vmem>>, vector<8x128xf32>
    %c0_23 = arith.constant 0 : index
    %c128 = arith.constant 128 : index
    %21 = vector.load %arg14[%c0_23, %c128] : memref<8x256xf32, #tpu.memory_space<vmem>>, vector<8x128xf32>
    %c4_i32 = arith.constant 4 : i32
    %22 = arith.muli %arg1, %c4_i32 : i32
    %c1_i32 = arith.constant 1 : i32
    %23 = arith.subi %c1_i32, %arg1 : i32
    %c4_i32_24 = arith.constant 4 : i32
    %24 = arith.muli %23, %c4_i32_24 : i32
    %c0_i32_25 = arith.constant 0 : i32
    %25 = arith.addi %22, %c0_i32_25 : i32
    %c3_i32 = arith.constant 3 : i32
    %26 = arith.addi %24, %c3_i32 : i32
    %27 = tpu.concatenate %20, %21 in 1 : vector<8x128xf32>, vector<8x128xf32> -> vector<8x256xf32>
    %28 = arith.truncf %27 : vector<8x256xf32> to vector<8x256xbf16>
    %cst_26 = arith.constant dense<0.000000e+00> : vector<8x768xf32>
    %29 = tpu.matmul %28, %18, %cst_26 {dimension_numbers = #tpu.dot_dimension_numbers<[1], [0], [0], [1], [0, 0, 1, 1], [], []>} : vector<8x256xbf16>, vector<256x768xbf16>, vector<8x768xf32> -> vector<8x768xf32>
    %30 = vector.broadcast %19 : vector<1x768xf32> to vector<8x768xf32>
    %31 = arith.addf %29, %30 : vector<8x768xf32>
    %32 = vector.extract_strided_slice %12 {offsets = [0, 0], sizes = [8, 384], strides = [1, 1]} : vector<32x384xf32> to vector<8x384xf32>
    %33 = vector.extract_strided_slice %17 {offsets = [24, 0], sizes = [8, 384], strides = [1, 1]} : vector<32x384xf32> to vector<8x384xf32>
    %34 = vector.extract_strided_slice %31 {offsets = [0, 0], sizes = [8, 384], strides = [1, 1]} : vector<8x768xf32> to vector<8x384xf32>
    %35 = vector.extract_strided_slice %32 {offsets = [0, 0], sizes = [8, 128], strides = [1, 1]} : vector<8x384xf32> to vector<8x128xf32>
    %36 = vector.extract_strided_slice %34 {offsets = [0, 0], sizes = [8, 128], strides = [1, 1]} : vector<8x384xf32> to vector<8x128xf32>
    %37 = arith.addf %35, %36 : vector<8x128xf32>
    %38 = arith.negf %37 : vector<8x128xf32>
    %39 = math.exp %38 : vector<8x128xf32>
    %cst_27 = arith.constant 1.000000e+00 : f32
    %40 = vector.broadcast %cst_27 : f32 to vector<8x128xf32>
    %41 = arith.addf %40, %39 : vector<8x128xf32>
    %42 = arith.divf %40, %41 : vector<8x128xf32>
    %43 = vector.extract_strided_slice %32 {offsets = [0, 128], sizes = [8, 128], strides = [1, 1]} : vector<8x384xf32> to vector<8x128xf32>
    %44 = vector.extract_strided_slice %34 {offsets = [0, 128], sizes = [8, 128], strides = [1, 1]} : vector<8x384xf32> to vector<8x128xf32>
    %45 = arith.addf %43, %44 : vector<8x128xf32>
    %46 = arith.negf %45 : vector<8x128xf32>
    %47 = math.exp %46 : vector<8x128xf32>
    %cst_28 = arith.constant 1.000000e+00 : f32
    %48 = vector.broadcast %cst_28 : f32 to vector<8x128xf32>
    %49 = arith.addf %48, %47 : vector<8x128xf32>
    %50 = arith.divf %48, %49 : vector<8x128xf32>
    %51 = vector.extract_strided_slice %32 {offsets = [0, 256], sizes = [8, 128], strides = [1, 1]} : vector<8x384xf32> to vector<8x128xf32>
    %52 = vector.extract_strided_slice %34 {offsets = [0, 256], sizes = [8, 128], strides = [1, 1]} : vector<8x384xf32> to vector<8x128xf32>
    %53 = arith.mulf %42, %52 : vector<8x128xf32>
    %54 = arith.addf %51, %53 : vector<8x128xf32>
    %55 = math.tanh %54 : vector<8x128xf32>
    %cst_29 = arith.constant 1.000000e+00 : f32
    %56 = vector.broadcast %cst_29 : f32 to vector<8x128xf32>
    %57 = arith.subf %56, %50 : vector<8x128xf32>
    %58 = arith.mulf %57, %55 : vector<8x128xf32>
    %59 = arith.mulf %50, %20 : vector<8x128xf32>
    %60 = arith.addf %58, %59 : vector<8x128xf32>
    %61 = vector.extract_strided_slice %31 {offsets = [0, 384], sizes = [8, 384], strides = [1, 1]} : vector<8x768xf32> to vector<8x384xf32>
    %62 = vector.extract_strided_slice %33 {offsets = [0, 0], sizes = [8, 128], strides = [1, 1]} : vector<8x384xf32> to vector<8x128xf32>
    %63 = vector.extract_strided_slice %61 {offsets = [0, 0], sizes = [8, 128], strides = [1, 1]} : vector<8x384xf32> to vector<8x128xf32>
    %64 = arith.addf %62, %63 : vector<8x128xf32>
    %65 = arith.negf %64 : vector<8x128xf32>
    %66 = math.exp %65 : vector<8x128xf32>
    %cst_30 = arith.constant 1.000000e+00 : f32
    %67 = vector.broadcast %cst_30 : f32 to vector<8x128xf32>
    %68 = arith.addf %67, %66 : vector<8x128xf32>
    %69 = arith.divf %67, %68 : vector<8x128xf32>
    %70 = vector.extract_strided_slice %33 {offsets = [0, 128], sizes = [8, 128], strides = [1, 1]} : vector<8x384xf32> to vector<8x128xf32>
    %71 = vector.extract_strided_slice %61 {offsets = [0, 128], sizes = [8, 128], strides = [1, 1]} : vector<8x384xf32> to vector<8x128xf32>
    %72 = arith.addf %70, %71 : vector<8x128xf32>
    %73 = arith.negf %72 : vector<8x128xf32>
    %74 = math.exp %73 : vector<8x128xf32>
    %cst_31 = arith.constant 1.000000e+00 : f32
    %75 = vector.broadcast %cst_31 : f32 to vector<8x128xf32>
    %76 = arith.addf %75, %74 : vector<8x128xf32>
    %77 = arith.divf %75, %76 : vector<8x128xf32>
    %78 = vector.extract_strided_slice %33 {offsets = [0, 256], sizes = [8, 128], strides = [1, 1]} : vector<8x384xf32> to vector<8x128xf32>
    %79 = vector.extract_strided_slice %61 {offsets = [0, 256], sizes = [8, 128], strides = [1, 1]} : vector<8x384xf32> to vector<8x128xf32>
    %80 = arith.mulf %69, %79 : vector<8x128xf32>
    %81 = arith.addf %78, %80 : vector<8x128xf32>
    %82 = math.tanh %81 : vector<8x128xf32>
    %cst_32 = arith.constant 1.000000e+00 : f32
    %83 = vector.broadcast %cst_32 : f32 to vector<8x128xf32>
    %84 = arith.subf %83, %77 : vector<8x128xf32>
    %85 = arith.mulf %84, %82 : vector<8x128xf32>
    %86 = arith.mulf %77, %21 : vector<8x128xf32>
    %87 = arith.addf %85, %86 : vector<8x128xf32>
    %88 = vector.broadcast %25 : i32 to vector<8x1xi32>
    %89 = arith.cmpi slt, %88, %3 : vector<8x1xi32>
    %90 = vector.shape_cast %89 : vector<8x1xi1> to vector<8x1xi1>
    %91 = vector.broadcast %90 : vector<8x1xi1> to vector<8x128xi1>
    %92 = arith.select %91, %60, %20 : vector<8x128xi1>, vector<8x128xf32>
    %93 = vector.broadcast %26 : i32 to vector<8x1xi32>
    %94 = arith.cmpi slt, %93, %3 : vector<8x1xi32>
    %95 = vector.shape_cast %94 : vector<8x1xi1> to vector<8x1xi1>
    %96 = vector.broadcast %95 : vector<8x1xi1> to vector<8x128xi1>
    %97 = arith.select %96, %87, %21 : vector<8x128xi1>, vector<8x128xf32>
    %c1_i32_33 = arith.constant 1 : i32
    %98 = arith.addi %22, %c1_i32_33 : i32
    %c2_i32 = arith.constant 2 : i32
    %99 = arith.addi %24, %c2_i32 : i32
    %100 = tpu.concatenate %92, %97 in 1 : vector<8x128xf32>, vector<8x128xf32> -> vector<8x256xf32>
    %101 = arith.truncf %100 : vector<8x256xf32> to vector<8x256xbf16>
    %cst_34 = arith.constant dense<0.000000e+00> : vector<8x768xf32>
    %102 = tpu.matmul %101, %18, %cst_34 {dimension_numbers = #tpu.dot_dimension_numbers<[1], [0], [0], [1], [0, 0, 1, 1], [], []>} : vector<8x256xbf16>, vector<256x768xbf16>, vector<8x768xf32> -> vector<8x768xf32>
    %103 = vector.broadcast %19 : vector<1x768xf32> to vector<8x768xf32>
    %104 = arith.addf %102, %103 : vector<8x768xf32>
    %105 = vector.extract_strided_slice %12 {offsets = [8, 0], sizes = [8, 384], strides = [1, 1]} : vector<32x384xf32> to vector<8x384xf32>
    %106 = vector.extract_strided_slice %17 {offsets = [16, 0], sizes = [8, 384], strides = [1, 1]} : vector<32x384xf32> to vector<8x384xf32>
    %107 = vector.extract_strided_slice %104 {offsets = [0, 0], sizes = [8, 384], strides = [1, 1]} : vector<8x768xf32> to vector<8x384xf32>
    %108 = vector.extract_strided_slice %105 {offsets = [0, 0], sizes = [8, 128], strides = [1, 1]} : vector<8x384xf32> to vector<8x128xf32>
    %109 = vector.extract_strided_slice %107 {offsets = [0, 0], sizes = [8, 128], strides = [1, 1]} : vector<8x384xf32> to vector<8x128xf32>
    %110 = arith.addf %108, %109 : vector<8x128xf32>
    %111 = arith.negf %110 : vector<8x128xf32>
    %112 = math.exp %111 : vector<8x128xf32>
    %cst_35 = arith.constant 1.000000e+00 : f32
    %113 = vector.broadcast %cst_35 : f32 to vector<8x128xf32>
    %114 = arith.addf %113, %112 : vector<8x128xf32>
    %115 = arith.divf %113, %114 : vector<8x128xf32>
    %116 = vector.extract_strided_slice %105 {offsets = [0, 128], sizes = [8, 128], strides = [1, 1]} : vector<8x384xf32> to vector<8x128xf32>
    %117 = vector.extract_strided_slice %107 {offsets = [0, 128], sizes = [8, 128], strides = [1, 1]} : vector<8x384xf32> to vector<8x128xf32>
    %118 = arith.addf %116, %117 : vector<8x128xf32>
    %119 = arith.negf %118 : vector<8x128xf32>
    %120 = math.exp %119 : vector<8x128xf32>
    %cst_36 = arith.constant 1.000000e+00 : f32
    %121 = vector.broadcast %cst_36 : f32 to vector<8x128xf32>
    %122 = arith.addf %121, %120 : vector<8x128xf32>
    %123 = arith.divf %121, %122 : vector<8x128xf32>
    %124 = vector.extract_strided_slice %105 {offsets = [0, 256], sizes = [8, 128], strides = [1, 1]} : vector<8x384xf32> to vector<8x128xf32>
    %125 = vector.extract_strided_slice %107 {offsets = [0, 256], sizes = [8, 128], strides = [1, 1]} : vector<8x384xf32> to vector<8x128xf32>
    %126 = arith.mulf %115, %125 : vector<8x128xf32>
    %127 = arith.addf %124, %126 : vector<8x128xf32>
    %128 = math.tanh %127 : vector<8x128xf32>
    %cst_37 = arith.constant 1.000000e+00 : f32
    %129 = vector.broadcast %cst_37 : f32 to vector<8x128xf32>
    %130 = arith.subf %129, %123 : vector<8x128xf32>
    %131 = arith.mulf %130, %128 : vector<8x128xf32>
    %132 = arith.mulf %123, %92 : vector<8x128xf32>
    %133 = arith.addf %131, %132 : vector<8x128xf32>
    %134 = vector.extract_strided_slice %104 {offsets = [0, 384], sizes = [8, 384], strides = [1, 1]} : vector<8x768xf32> to vector<8x384xf32>
    %135 = vector.extract_strided_slice %106 {offsets = [0, 0], sizes = [8, 128], strides = [1, 1]} : vector<8x384xf32> to vector<8x128xf32>
    %136 = vector.extract_strided_slice %134 {offsets = [0, 0], sizes = [8, 128], strides = [1, 1]} : vector<8x384xf32> to vector<8x128xf32>
    %137 = arith.addf %135, %136 : vector<8x128xf32>
    %138 = arith.negf %137 : vector<8x128xf32>
    %139 = math.exp %138 : vector<8x128xf32>
    %cst_38 = arith.constant 1.000000e+00 : f32
    %140 = vector.broadcast %cst_38 : f32 to vector<8x128xf32>
    %141 = arith.addf %140, %139 : vector<8x128xf32>
    %142 = arith.divf %140, %141 : vector<8x128xf32>
    %143 = vector.extract_strided_slice %106 {offsets = [0, 128], sizes = [8, 128], strides = [1, 1]} : vector<8x384xf32> to vector<8x128xf32>
    %144 = vector.extract_strided_slice %134 {offsets = [0, 128], sizes = [8, 128], strides = [1, 1]} : vector<8x384xf32> to vector<8x128xf32>
    %145 = arith.addf %143, %144 : vector<8x128xf32>
    %146 = arith.negf %145 : vector<8x128xf32>
    %147 = math.exp %146 : vector<8x128xf32>
    %cst_39 = arith.constant 1.000000e+00 : f32
    %148 = vector.broadcast %cst_39 : f32 to vector<8x128xf32>
    %149 = arith.addf %148, %147 : vector<8x128xf32>
    %150 = arith.divf %148, %149 : vector<8x128xf32>
    %151 = vector.extract_strided_slice %106 {offsets = [0, 256], sizes = [8, 128], strides = [1, 1]} : vector<8x384xf32> to vector<8x128xf32>
    %152 = vector.extract_strided_slice %134 {offsets = [0, 256], sizes = [8, 128], strides = [1, 1]} : vector<8x384xf32> to vector<8x128xf32>
    %153 = arith.mulf %142, %152 : vector<8x128xf32>
    %154 = arith.addf %151, %153 : vector<8x128xf32>
    %155 = math.tanh %154 : vector<8x128xf32>
    %cst_40 = arith.constant 1.000000e+00 : f32
    %156 = vector.broadcast %cst_40 : f32 to vector<8x128xf32>
    %157 = arith.subf %156, %150 : vector<8x128xf32>
    %158 = arith.mulf %157, %155 : vector<8x128xf32>
    %159 = arith.mulf %150, %97 : vector<8x128xf32>
    %160 = arith.addf %158, %159 : vector<8x128xf32>
    %161 = vector.broadcast %98 : i32 to vector<8x1xi32>
    %162 = arith.cmpi slt, %161, %3 : vector<8x1xi32>
    %163 = vector.shape_cast %162 : vector<8x1xi1> to vector<8x1xi1>
    %164 = vector.broadcast %163 : vector<8x1xi1> to vector<8x128xi1>
    %165 = arith.select %164, %133, %92 : vector<8x128xi1>, vector<8x128xf32>
    %166 = vector.broadcast %99 : i32 to vector<8x1xi32>
    %167 = arith.cmpi slt, %166, %3 : vector<8x1xi32>
    %168 = vector.shape_cast %167 : vector<8x1xi1> to vector<8x1xi1>
    %169 = vector.broadcast %168 : vector<8x1xi1> to vector<8x128xi1>
    %170 = arith.select %169, %160, %97 : vector<8x128xi1>, vector<8x128xf32>
    %c2_i32_41 = arith.constant 2 : i32
    %171 = arith.addi %22, %c2_i32_41 : i32
    %c1_i32_42 = arith.constant 1 : i32
    %172 = arith.addi %24, %c1_i32_42 : i32
    %173 = tpu.concatenate %165, %170 in 1 : vector<8x128xf32>, vector<8x128xf32> -> vector<8x256xf32>
    %174 = arith.truncf %173 : vector<8x256xf32> to vector<8x256xbf16>
    %cst_43 = arith.constant dense<0.000000e+00> : vector<8x768xf32>
    %175 = tpu.matmul %174, %18, %cst_43 {dimension_numbers = #tpu.dot_dimension_numbers<[1], [0], [0], [1], [0, 0, 1, 1], [], []>} : vector<8x256xbf16>, vector<256x768xbf16>, vector<8x768xf32> -> vector<8x768xf32>
    %176 = vector.broadcast %19 : vector<1x768xf32> to vector<8x768xf32>
    %177 = arith.addf %175, %176 : vector<8x768xf32>
    %178 = vector.extract_strided_slice %12 {offsets = [16, 0], sizes = [8, 384], strides = [1, 1]} : vector<32x384xf32> to vector<8x384xf32>
    %179 = vector.extract_strided_slice %17 {offsets = [8, 0], sizes = [8, 384], strides = [1, 1]} : vector<32x384xf32> to vector<8x384xf32>
    %180 = vector.extract_strided_slice %177 {offsets = [0, 0], sizes = [8, 384], strides = [1, 1]} : vector<8x768xf32> to vector<8x384xf32>
    %181 = vector.extract_strided_slice %178 {offsets = [0, 0], sizes = [8, 128], strides = [1, 1]} : vector<8x384xf32> to vector<8x128xf32>
    %182 = vector.extract_strided_slice %180 {offsets = [0, 0], sizes = [8, 128], strides = [1, 1]} : vector<8x384xf32> to vector<8x128xf32>
    %183 = arith.addf %181, %182 : vector<8x128xf32>
    %184 = arith.negf %183 : vector<8x128xf32>
    %185 = math.exp %184 : vector<8x128xf32>
    %cst_44 = arith.constant 1.000000e+00 : f32
    %186 = vector.broadcast %cst_44 : f32 to vector<8x128xf32>
    %187 = arith.addf %186, %185 : vector<8x128xf32>
    %188 = arith.divf %186, %187 : vector<8x128xf32>
    %189 = vector.extract_strided_slice %178 {offsets = [0, 128], sizes = [8, 128], strides = [1, 1]} : vector<8x384xf32> to vector<8x128xf32>
    %190 = vector.extract_strided_slice %180 {offsets = [0, 128], sizes = [8, 128], strides = [1, 1]} : vector<8x384xf32> to vector<8x128xf32>
    %191 = arith.addf %189, %190 : vector<8x128xf32>
    %192 = arith.negf %191 : vector<8x128xf32>
    %193 = math.exp %192 : vector<8x128xf32>
    %cst_45 = arith.constant 1.000000e+00 : f32
    %194 = vector.broadcast %cst_45 : f32 to vector<8x128xf32>
    %195 = arith.addf %194, %193 : vector<8x128xf32>
    %196 = arith.divf %194, %195 : vector<8x128xf32>
    %197 = vector.extract_strided_slice %178 {offsets = [0, 256], sizes = [8, 128], strides = [1, 1]} : vector<8x384xf32> to vector<8x128xf32>
    %198 = vector.extract_strided_slice %180 {offsets = [0, 256], sizes = [8, 128], strides = [1, 1]} : vector<8x384xf32> to vector<8x128xf32>
    %199 = arith.mulf %188, %198 : vector<8x128xf32>
    %200 = arith.addf %197, %199 : vector<8x128xf32>
    %201 = math.tanh %200 : vector<8x128xf32>
    %cst_46 = arith.constant 1.000000e+00 : f32
    %202 = vector.broadcast %cst_46 : f32 to vector<8x128xf32>
    %203 = arith.subf %202, %196 : vector<8x128xf32>
    %204 = arith.mulf %203, %201 : vector<8x128xf32>
    %205 = arith.mulf %196, %165 : vector<8x128xf32>
    %206 = arith.addf %204, %205 : vector<8x128xf32>
    %207 = vector.extract_strided_slice %177 {offsets = [0, 384], sizes = [8, 384], strides = [1, 1]} : vector<8x768xf32> to vector<8x384xf32>
    %208 = vector.extract_strided_slice %179 {offsets = [0, 0], sizes = [8, 128], strides = [1, 1]} : vector<8x384xf32> to vector<8x128xf32>
    %209 = vector.extract_strided_slice %207 {offsets = [0, 0], sizes = [8, 128], strides = [1, 1]} : vector<8x384xf32> to vector<8x128xf32>
    %210 = arith.addf %208, %209 : vector<8x128xf32>
    %211 = arith.negf %210 : vector<8x128xf32>
    %212 = math.exp %211 : vector<8x128xf32>
    %cst_47 = arith.constant 1.000000e+00 : f32
    %213 = vector.broadcast %cst_47 : f32 to vector<8x128xf32>
    %214 = arith.addf %213, %212 : vector<8x128xf32>
    %215 = arith.divf %213, %214 : vector<8x128xf32>
    %216 = vector.extract_strided_slice %179 {offsets = [0, 128], sizes = [8, 128], strides = [1, 1]} : vector<8x384xf32> to vector<8x128xf32>
    %217 = vector.extract_strided_slice %207 {offsets = [0, 128], sizes = [8, 128], strides = [1, 1]} : vector<8x384xf32> to vector<8x128xf32>
    %218 = arith.addf %216, %217 : vector<8x128xf32>
    %219 = arith.negf %218 : vector<8x128xf32>
    %220 = math.exp %219 : vector<8x128xf32>
    %cst_48 = arith.constant 1.000000e+00 : f32
    %221 = vector.broadcast %cst_48 : f32 to vector<8x128xf32>
    %222 = arith.addf %221, %220 : vector<8x128xf32>
    %223 = arith.divf %221, %222 : vector<8x128xf32>
    %224 = vector.extract_strided_slice %179 {offsets = [0, 256], sizes = [8, 128], strides = [1, 1]} : vector<8x384xf32> to vector<8x128xf32>
    %225 = vector.extract_strided_slice %207 {offsets = [0, 256], sizes = [8, 128], strides = [1, 1]} : vector<8x384xf32> to vector<8x128xf32>
    %226 = arith.mulf %215, %225 : vector<8x128xf32>
    %227 = arith.addf %224, %226 : vector<8x128xf32>
    %228 = math.tanh %227 : vector<8x128xf32>
    %cst_49 = arith.constant 1.000000e+00 : f32
    %229 = vector.broadcast %cst_49 : f32 to vector<8x128xf32>
    %230 = arith.subf %229, %223 : vector<8x128xf32>
    %231 = arith.mulf %230, %228 : vector<8x128xf32>
    %232 = arith.mulf %223, %170 : vector<8x128xf32>
    %233 = arith.addf %231, %232 : vector<8x128xf32>
    %234 = vector.broadcast %171 : i32 to vector<8x1xi32>
    %235 = arith.cmpi slt, %234, %3 : vector<8x1xi32>
    %236 = vector.shape_cast %235 : vector<8x1xi1> to vector<8x1xi1>
    %237 = vector.broadcast %236 : vector<8x1xi1> to vector<8x128xi1>
    %238 = arith.select %237, %206, %165 : vector<8x128xi1>, vector<8x128xf32>
    %239 = vector.broadcast %172 : i32 to vector<8x1xi32>
    %240 = arith.cmpi slt, %239, %3 : vector<8x1xi32>
    %241 = vector.shape_cast %240 : vector<8x1xi1> to vector<8x1xi1>
    %242 = vector.broadcast %241 : vector<8x1xi1> to vector<8x128xi1>
    %243 = arith.select %242, %233, %170 : vector<8x128xi1>, vector<8x128xf32>
    %c3_i32_50 = arith.constant 3 : i32
    %244 = arith.addi %22, %c3_i32_50 : i32
    %c0_i32_51 = arith.constant 0 : i32
    %245 = arith.addi %24, %c0_i32_51 : i32
    %246 = tpu.concatenate %238, %243 in 1 : vector<8x128xf32>, vector<8x128xf32> -> vector<8x256xf32>
    %247 = arith.truncf %246 : vector<8x256xf32> to vector<8x256xbf16>
    %cst_52 = arith.constant dense<0.000000e+00> : vector<8x768xf32>
    %248 = tpu.matmul %247, %18, %cst_52 {dimension_numbers = #tpu.dot_dimension_numbers<[1], [0], [0], [1], [0, 0, 1, 1], [], []>} : vector<8x256xbf16>, vector<256x768xbf16>, vector<8x768xf32> -> vector<8x768xf32>
    %249 = vector.broadcast %19 : vector<1x768xf32> to vector<8x768xf32>
    %250 = arith.addf %248, %249 : vector<8x768xf32>
    %251 = vector.extract_strided_slice %12 {offsets = [24, 0], sizes = [8, 384], strides = [1, 1]} : vector<32x384xf32> to vector<8x384xf32>
    %252 = vector.extract_strided_slice %17 {offsets = [0, 0], sizes = [8, 384], strides = [1, 1]} : vector<32x384xf32> to vector<8x384xf32>
    %253 = vector.extract_strided_slice %250 {offsets = [0, 0], sizes = [8, 384], strides = [1, 1]} : vector<8x768xf32> to vector<8x384xf32>
    %254 = vector.extract_strided_slice %251 {offsets = [0, 0], sizes = [8, 128], strides = [1, 1]} : vector<8x384xf32> to vector<8x128xf32>
    %255 = vector.extract_strided_slice %253 {offsets = [0, 0], sizes = [8, 128], strides = [1, 1]} : vector<8x384xf32> to vector<8x128xf32>
    %256 = arith.addf %254, %255 : vector<8x128xf32>
    %257 = arith.negf %256 : vector<8x128xf32>
    %258 = math.exp %257 : vector<8x128xf32>
    %cst_53 = arith.constant 1.000000e+00 : f32
    %259 = vector.broadcast %cst_53 : f32 to vector<8x128xf32>
    %260 = arith.addf %259, %258 : vector<8x128xf32>
    %261 = arith.divf %259, %260 : vector<8x128xf32>
    %262 = vector.extract_strided_slice %251 {offsets = [0, 128], sizes = [8, 128], strides = [1, 1]} : vector<8x384xf32> to vector<8x128xf32>
    %263 = vector.extract_strided_slice %253 {offsets = [0, 128], sizes = [8, 128], strides = [1, 1]} : vector<8x384xf32> to vector<8x128xf32>
    %264 = arith.addf %262, %263 : vector<8x128xf32>
    %265 = arith.negf %264 : vector<8x128xf32>
    %266 = math.exp %265 : vector<8x128xf32>
    %cst_54 = arith.constant 1.000000e+00 : f32
    %267 = vector.broadcast %cst_54 : f32 to vector<8x128xf32>
    %268 = arith.addf %267, %266 : vector<8x128xf32>
    %269 = arith.divf %267, %268 : vector<8x128xf32>
    %270 = vector.extract_strided_slice %251 {offsets = [0, 256], sizes = [8, 128], strides = [1, 1]} : vector<8x384xf32> to vector<8x128xf32>
    %271 = vector.extract_strided_slice %253 {offsets = [0, 256], sizes = [8, 128], strides = [1, 1]} : vector<8x384xf32> to vector<8x128xf32>
    %272 = arith.mulf %261, %271 : vector<8x128xf32>
    %273 = arith.addf %270, %272 : vector<8x128xf32>
    %274 = math.tanh %273 : vector<8x128xf32>
    %cst_55 = arith.constant 1.000000e+00 : f32
    %275 = vector.broadcast %cst_55 : f32 to vector<8x128xf32>
    %276 = arith.subf %275, %269 : vector<8x128xf32>
    %277 = arith.mulf %276, %274 : vector<8x128xf32>
    %278 = arith.mulf %269, %238 : vector<8x128xf32>
    %279 = arith.addf %277, %278 : vector<8x128xf32>
    %280 = vector.extract_strided_slice %250 {offsets = [0, 384], sizes = [8, 384], strides = [1, 1]} : vector<8x768xf32> to vector<8x384xf32>
    %281 = vector.extract_strided_slice %252 {offsets = [0, 0], sizes = [8, 128], strides = [1, 1]} : vector<8x384xf32> to vector<8x128xf32>
    %282 = vector.extract_strided_slice %280 {offsets = [0, 0], sizes = [8, 128], strides = [1, 1]} : vector<8x384xf32> to vector<8x128xf32>
    %283 = arith.addf %281, %282 : vector<8x128xf32>
    %284 = arith.negf %283 : vector<8x128xf32>
    %285 = math.exp %284 : vector<8x128xf32>
    %cst_56 = arith.constant 1.000000e+00 : f32
    %286 = vector.broadcast %cst_56 : f32 to vector<8x128xf32>
    %287 = arith.addf %286, %285 : vector<8x128xf32>
    %288 = arith.divf %286, %287 : vector<8x128xf32>
    %289 = vector.extract_strided_slice %252 {offsets = [0, 128], sizes = [8, 128], strides = [1, 1]} : vector<8x384xf32> to vector<8x128xf32>
    %290 = vector.extract_strided_slice %280 {offsets = [0, 128], sizes = [8, 128], strides = [1, 1]} : vector<8x384xf32> to vector<8x128xf32>
    %291 = arith.addf %289, %290 : vector<8x128xf32>
    %292 = arith.negf %291 : vector<8x128xf32>
    %293 = math.exp %292 : vector<8x128xf32>
    %cst_57 = arith.constant 1.000000e+00 : f32
    %294 = vector.broadcast %cst_57 : f32 to vector<8x128xf32>
    %295 = arith.addf %294, %293 : vector<8x128xf32>
    %296 = arith.divf %294, %295 : vector<8x128xf32>
    %297 = vector.extract_strided_slice %252 {offsets = [0, 256], sizes = [8, 128], strides = [1, 1]} : vector<8x384xf32> to vector<8x128xf32>
    %298 = vector.extract_strided_slice %280 {offsets = [0, 256], sizes = [8, 128], strides = [1, 1]} : vector<8x384xf32> to vector<8x128xf32>
    %299 = arith.mulf %288, %298 : vector<8x128xf32>
    %300 = arith.addf %297, %299 : vector<8x128xf32>
    %301 = math.tanh %300 : vector<8x128xf32>
    %cst_58 = arith.constant 1.000000e+00 : f32
    %302 = vector.broadcast %cst_58 : f32 to vector<8x128xf32>
    %303 = arith.subf %302, %296 : vector<8x128xf32>
    %304 = arith.mulf %303, %301 : vector<8x128xf32>
    %305 = arith.mulf %296, %243 : vector<8x128xf32>
    %306 = arith.addf %304, %305 : vector<8x128xf32>
    %307 = vector.broadcast %244 : i32 to vector<8x1xi32>
    %308 = arith.cmpi slt, %307, %3 : vector<8x1xi32>
    %309 = vector.shape_cast %308 : vector<8x1xi1> to vector<8x1xi1>
    %310 = vector.broadcast %309 : vector<8x1xi1> to vector<8x128xi1>
    %311 = arith.select %310, %279, %238 : vector<8x128xi1>, vector<8x128xf32>
    %312 = vector.broadcast %245 : i32 to vector<8x1xi32>
    %313 = arith.cmpi slt, %312, %3 : vector<8x1xi32>
    %314 = vector.shape_cast %313 : vector<8x1xi1> to vector<8x1xi1>
    %315 = vector.broadcast %314 : vector<8x1xi1> to vector<8x128xi1>
    %316 = arith.select %315, %306, %243 : vector<8x128xi1>, vector<8x128xf32>
    %c0_59 = arith.constant 0 : index
    %c0_60 = arith.constant 0 : index
    %317 = vector.load %arg14[%c0_59, %c0_60] : memref<8x256xf32, #tpu.memory_space<vmem>>, vector<8x128xf32>
    tpu.vector_store %arg14[%c0_59, %c0_60], %311 {strides = array<i32>} : memref<8x256xf32, #tpu.memory_space<vmem>>, vector<8x128xf32>,
    %c0_61 = arith.constant 0 : index
    %c128_62 = arith.constant 128 : index
    %318 = vector.load %arg14[%c0_61, %c128_62] : memref<8x256xf32, #tpu.memory_space<vmem>>, vector<8x128xf32>
    tpu.vector_store %arg14[%c0_61, %c128_62], %316 {strides = array<i32>} : memref<8x256xf32, #tpu.memory_space<vmem>>, vector<8x128xf32>,
    %c1_i32_63 = arith.constant 1 : i32
    %319 = arith.cmpi eq, %arg1, %c1_i32_63 : i32
    %320 = arith.extui %319 : i1 to i32
    %c0_i32_64 = arith.constant 0 : i32
    %321 = arith.cmpi ne, %320, %c0_i32_64 : i32
    scf.if %321 {
      %322 = tpu.concatenate %311, %316 in 1 : vector<8x128xf32>, vector<8x128xf32> -> vector<8x256xf32>
      %323 = arith.truncf %322 : vector<8x256xf32> to vector<8x256xbf16>
      %c0_65 = arith.constant 0 : index
      %c0_66 = arith.constant 0 : index
      %324 = vector.load %arg11[%c0_65, %c0_66] : memref<256x128xbf16, #tpu.memory_space<vmem>>, vector<256x128xbf16>
      %cst_67 = arith.constant dense<0.000000e+00> : vector<8x128xf32>
      %325 = tpu.matmul %323, %324, %cst_67 {dimension_numbers = #tpu.dot_dimension_numbers<[1], [0], [0], [1], [0, 0, 1, 1], [], []>} : vector<8x256xbf16>, vector<256x128xbf16>, vector<8x128xf32> -> vector<8x128xf32>
      %c0_68 = arith.constant 0 : index
      %c0_69 = arith.constant 0 : index
      %326 = vector.load %arg12[%c0_68, %c0_69] : memref<1x128xf32, #tpu.memory_space<vmem>>, vector<1x128xf32>
      %327 = vector.broadcast %326 : vector<1x128xf32> to vector<8x128xf32>
      %328 = arith.addf %325, %327 : vector<8x128xf32>
      %c0_70 = arith.constant 0 : index
      %c0_71 = arith.constant 0 : index
      %329 = vector.load %arg13[%c0_70, %c0_71] : memref<8x128xf32, #tpu.memory_space<vmem>>, vector<8x128xf32>
      tpu.vector_store %arg13[%c0_70, %c0_71], %328 {strides = array<i32>} : memref<8x128xf32, #tpu.memory_space<vmem>>, vector<8x128xf32>,
    } else {
    }
    return
  }
  func.func @transform_0(%arg0: i32, %arg1: i32) -> (i32, i32) {
    %c0_i32 = arith.constant 0 : i32
    %c0_i32_0 = arith.constant 0 : i32
    return %arg0, %c0_i32 : i32, i32
  }
  func.func @transform_1(%arg0: i32, %arg1: i32) -> (i32, i32, i32) {
    %c0_i32 = arith.constant 0 : i32
    %c0_i32_0 = arith.constant 0 : i32
    return %arg1, %arg0, %c0_i32 : i32, i32, i32
  }
  func.func @transform_2(%arg0: i32, %arg1: i32) -> (i32, i32, i32) {
    %c1_i32 = arith.constant 1 : i32
    %0 = arith.subi %c1_i32, %arg1 : i32
    %c0_i32 = arith.constant 0 : i32
    %c0_i32_0 = arith.constant 0 : i32
    return %0, %arg0, %c0_i32 : i32, i32, i32
  }
  func.func @transform_3(%arg0: i32, %arg1: i32) -> (i32, i32) {
    %c0_i32 = arith.constant 0 : i32
    %c0_i32_0 = arith.constant 0 : i32
    %c0_i32_1 = arith.constant 0 : i32
    return %c0_i32, %c0_i32_0 : i32, i32
  }
  func.func @transform_4(%arg0: i32, %arg1: i32) -> (i32, i32) {
    %c0_i32 = arith.constant 0 : i32
    %c0_i32_0 = arith.constant 0 : i32
    %c0_i32_1 = arith.constant 0 : i32
    return %c0_i32, %c0_i32_0 : i32, i32
  }
  func.func @transform_5(%arg0: i32, %arg1: i32) -> (i32, i32) {
    %c0_i32 = arith.constant 0 : i32
    %c0_i32_0 = arith.constant 0 : i32
    %c0_i32_1 = arith.constant 0 : i32
    return %c0_i32, %c0_i32_0 : i32, i32
  }
  func.func @transform_6(%arg0: i32, %arg1: i32) -> (i32, i32) {
    %c0_i32 = arith.constant 0 : i32
    %c0_i32_0 = arith.constant 0 : i32
    %c0_i32_1 = arith.constant 0 : i32
    return %c0_i32, %c0_i32_0 : i32, i32
  }
  func.func @transform_7(%arg0: i32, %arg1: i32) -> (i32, i32) {
    %c0_i32 = arith.constant 0 : i32
    %c0_i32_0 = arith.constant 0 : i32
    %c0_i32_1 = arith.constant 0 : i32
    return %c0_i32, %c0_i32_0 : i32, i32
  }
  func.func @transform_8(%arg0: i32, %arg1: i32) -> (i32, i32) {
    %c0_i32 = arith.constant 0 : i32
    %c0_i32_0 = arith.constant 0 : i32
    %c0_i32_1 = arith.constant 0 : i32
    return %c0_i32, %c0_i32_0 : i32, i32
  }
  func.func @transform_9(%arg0: i32, %arg1: i32) -> (i32, i32) {
    %c0_i32 = arith.constant 0 : i32
    %c0_i32_0 = arith.constant 0 : i32
    %c0_i32_1 = arith.constant 0 : i32
    return %c0_i32, %c0_i32_0 : i32, i32
  }
  func.func @transform_10(%arg0: i32, %arg1: i32) -> (i32, i32) {
    %c0_i32 = arith.constant 0 : i32
    %c0_i32_0 = arith.constant 0 : i32
    %c0_i32_1 = arith.constant 0 : i32
    return %c0_i32, %c0_i32_0 : i32, i32
  }
  func.func @transform_11(%arg0: i32, %arg1: i32) -> (i32, i32) {
    %c0_i32 = arith.constant 0 : i32
    %c0_i32_0 = arith.constant 0 : i32
    return %arg0, %c0_i32 : i32, i32
  }
}

</mosaic_0001>

<bundles_post_ra>
// kernel: tpu_custom_call.1
= control target key start
LH: loop header
LB: loop body
LE: loop exit
PB: predicated region body
PF: predicated region fallthrough
CT: control target
= control target key end

     0   :  { %s5094_s0 = inlined_call_operand.vmem [shape: s32[8,1], index: 0, kind: input, shape index: {}]   ;;  %s5095_s1 = inlined_call_operand.hbm [shape: bf16[8,8,128], index: 1, kind: input, shape index: {}]   ;;  %s5096_s2 = inlined_call_operand.hbm [shape: bf16[8,8,128], index: 2, kind: input, shape index: {}]   ;;  %s5097_s3 = inlined_call_operand.hbm [shape: bf16[128,384], index: 3, kind: input, shape index: {}]   ;;  %s5098_s4 = inlined_call_operand.hbm [shape: bf16[128,384], index: 4, kind: input, shape index: {}]   ;;  %s5099_s5 = inlined_call_operand.hbm [shape: bf16[256,768], index: 5, kind: input, shape index: {}]   ;;  %s5100_s6 = inlined_call_operand.vmem [shape: f32[1,384], index: 6, kind: input, shape index: {}]   ;;  %s5101_s7 = inlined_call_operand.vmem [shape: f32[1,384], index: 7, kind: input, shape index: {}]   ;;  %s5102_s8 = inlined_call_operand.vmem [shape: f32[1,768], index: 8, kind: input, shape index: {}]   ;;  %s5103_s9 = inlined_call_operand.hbm [shape: bf16[256,128], index: 9, kind: input, shape index: {}]   ;;  %s5104_s10 = inlined_call_operand.vmem [shape: f32[1,128], index: 10, kind: input, shape index: {}]   ;;  %s5105_s11 = inlined_call_operand.hbm [shape: f32[8,128], index: 11, kind: output, shape index: {}]  }
   0x1   :  { %5207 = sst [smem:[#allocation94_spill]] %s5095_s1 }
   0x2   :  { %5208 = sst [smem:[#allocation95_spill]] %s5097_s3 }
   0x3   :  { %5209 = sst [smem:[#allocation96_spill]] %s5098_s4 }
   0x4   :  { %5210 = sst [smem:[#allocation97_spill]] %s5099_s5 }
   0x5   :  { %5211 = sst [smem:[#allocation98_spill]] %s5102_s8 }
   0x6   :  { %5212 = sst [smem:[#allocation99_spill]] %s5103_s9 }
   0x7   :  { %5213 = sst [smem:[#allocation100_spill]] %s5104_s10 }
   0x8   :  { %5214 = sst [smem:[#allocation101_spill]] %s5105_s11 }
   0x9   :  { %16 = vsyncpa [#allocation4], 0 }
   0xa   :  { %18 = vsyncpa [#allocation4 + $0x1], 0 }
   0xb   :  { %19 = vsyncpa [#allocation7], 0 }
   0xc   :  { %21 = vsyncpa [#allocation7 + $0x1], 0 }
   0xd   :  { %22 = vsyncpa [#allocation10], 0 }
   0xe   :  { %23 = vsyncpa [#allocation13], 0 }
   0xf   :  { %24 = vsyncpa [#allocation5], 0  ;;  %s4015_s17 = smov 0   ;;  %s4017_s18 = smov 0  }
  0x10   :  { %s4019_s19 = smov 0   ;;  %s4021_s20 = smov 0  }
  0x11   :  { %s4023_s21 = smov 0   ;;  %s4025_s22 = smov 0  }
  0x12   :  { %s4027_s23 = smov 0   ;;  %s4029_s24 = smov 0  }
  0x13   :  { %s4031_s25 = smov 0  }
  0x14 LB: > { %5215 = sst [smem:[#allocation21_spill]] %s3926_s22  ;;  %s4059_s26 = sadd.s32 4294967295, %s3938_s25   ;;  %s3938_s25 = sphi %s4031_s25, %s30_s25   ;;  %s3934_s24 = sphi %s4029_s24, %s5424_s24   ;;  %s3930_s23 = sphi %s4027_s23, %s5418_s23   ;;  %s3926_s22 = sphi %s4025_s22, %s5417_s22   ;;  %s3922_s21 = sphi %s4023_s21, %s5423_s21   ;;  %s3918_s20 = sphi %s4021_s20, %s5422_s20   ;;  %s3914_s19 = sphi %s4019_s19, %s5421_s19   ;;  %s3910_s18 = sphi %s4017_s18, %s5420_s18   ;;  %s3906_s17 = sphi %s4015_s17, %s5419_s17  }
  0x15   : > { %5216 = sst [smem:[#allocation22_spill]] %s3934_s24  ;;  %p120_p0 = scmp.ne.s32.totalorder %s3910_s18, %s3906_s17 }
  0x16   : > { %p5106_p1 = scmp.eq.s32.totalorder %s4059_s26, 0  ;;  %p2821_p2 = scmp.ge.s32.totalorder %s3938_s25, 1 }
  0x17   : > { %p325_p3 = scmp.lt.s32.totalorder %s3938_s25, 3  ;;  %s3940_s29 = smov [#allocation8]  }
  0x18   : > { %p4067_p4 = por %p120_p0, %p5106_p1  ;;  %s344_s30 = sshll.u32 %s3940_s29, 4  ;;  %s345_s30 = int_to_ptr.vmem [resolvable:$true] %s344_s30 }
  0x19   : > { %p4071_p5 = pnand %p2821_p2, %p325_p3  ;;  %s3941_s13 = smov [#allocation9]  }
  0x1a   : > { %s5217_s27 = scalar_select %p4067_p4, 1, 0 }
  0x1b   : > { %p3138_p6 = pneg %p4071_p5  ;;  %s357_s14 = sshll.u32 %s3941_s13, 4  ;;  %s358_s14 = int_to_ptr.vmem [resolvable:$true] %s357_s14 }
  0x1c   : > { %s3942_s15 = smov [#allocation11]   ;;  %s3671_s17 = scalar_lea.vmem %s345_s30, 3072 }
  0x1d   : > { %p4079_p7 = pnand %p3138_p6, %p5106_p1  ;;  %s370_s16 = sshll.u32 %s3942_s15, 4  ;;  %s371_s16 = int_to_ptr.vmem [resolvable:$true] %s370_s16 }
  0x1e   : > { %p3672_p9 = scmp.ne.s32.totalorder %s345_s30, %s3671_s17  ;;  %p3679_p12 = scmp.lt.s32.totalorder %s345_s30, %s345_s30 }
  0x1f   : > { %p3662_p8 = pneg %p4079_p7  ;;  %p3680_p13 = scmp.lt.s32.totalorder %s3671_s17, %s3671_s17 }
  0x21   : > { %p3674_p10 = pnand %p3672_p9, %p3662_p8  ;;  %p3681_p0 = por %p3680_p13, %p3679_p12 }
  0x23   : > { %p3675_p11 = pneg %p3674_p10 }
  0x25   : > { %p3682_p2 = pnand %p3681_p0, %p3675_p11 }
  0x27   : > { %3685 = shalt.err (!%p3682_p2)
}
  0x28   : > { %s3943_s29 = smov 192   ;;  %s3944_s13 = smov 12  }
  0x29   : > { %s5220_s3 = sld [smem:[#allocation95_spill]]  ;;  %s3697_s10 = scalar_lea.vmem %s358_s14, 3072 }
  0x2a   : > { %p3698_p3 = scmp.ne.s32.totalorder %s358_s14, %s3697_s10  ;;  %p3705_p10 = scmp.lt.s32.totalorder %s358_s14, %s358_s14 }
  0x2b   : > { %p3706_p1 = scmp.lt.s32.totalorder %s3697_s10, %s3697_s10 }
  0x2c   : > { %p3700_p6 = pnand %p3698_p3, %p3662_p8 }
  0x2d   : > { %p3707_p12 = por %p3706_p1, %p3705_p10 }
  0x2e   : > { %p3701_p9 = pneg %p3700_p6 }
  0x2f   : > { %3141 = dma.hbm_to_vmem [thread:$0]  (!%p4079_p7), %s5220_s3, 3072, %s345_s30, [#allocation7], %s3943_s29, %s3943_s29, %s3944_s13  }
  0x30   : > { %p3708_p11 = pnand %p3707_p12, %p3701_p9 }
  0x32   : > { %3711 = shalt.err (!%p3708_p11)
}
  0x33   : > { %s5221_s4 = sld [smem:[#allocation96_spill]]  ;;  %s3723_s11 = scalar_lea.vmem %s371_s16, 12288 }
  0x34   : > { %p3724_p13 = scmp.ne.s32.totalorder %s371_s16, %s3723_s11  ;;  %p3731_p3 = scmp.lt.s32.totalorder %s371_s16, %s371_s16 }
  0x35   : > { %p3732_p6 = scmp.lt.s32.totalorder %s3723_s11, %s3723_s11 }
  0x36   : > { %p3726_p0 = pnand %p3724_p13, %p3662_p8 }
  0x37   : > { %p3733_p4 = por %p3732_p6, %p3731_p3 }
  0x38   : > { %p3727_p2 = pneg %p3726_p0 }
  0x39   : > { %3144 = dma.hbm_to_vmem [thread:$0]  (!%p4079_p7), %s5221_s4, 3072, %s358_s14, [#allocation10], %s3943_s29, %s3943_s29, %s3944_s13  }
  0x3a   : > { %p3734_p1 = pnand %p3733_p4, %p3727_p2 }
  0x3c   : > { %3737 = shalt.err (!%p3734_p1)
}
  0x3d   : > { %s3945_s10 = smov 384   ;;  %s3946_s30 = smov 24  }
  0x3e   : > { %s5222_s5 = sld [smem:[#allocation97_spill]]  ;;  %s3947_s14 = smov [#allocation12]  }
  0x3f   : > { %s392_s29 = sshll.u32 %s3947_s14, 4  ;;  %s393_s29 = int_to_ptr.vmem [resolvable:$true] %s392_s29 }
  0x40   : > { %s3749_s13 = scalar_lea.vmem %s393_s29, 2048  ;;  %p3757_p4 = scmp.lt.s32.totalorder %s393_s29, %s393_s29 }
  0x41   : > { %p3750_p9 = scmp.ne.s32.totalorder %s393_s29, %s3749_s13  ;;  %p3758_p11 = scmp.lt.s32.totalorder %s3749_s13, %s3749_s13 }
  0x43   : > { %p3752_p10 = pnand %p3750_p9, %p3662_p8  ;;  %p3759_p13 = por %p3758_p11, %p3757_p4 }
  0x44   : > { %3147 = dma.hbm_to_vmem [thread:$0]  (!%p4079_p7), %s5222_s5, 12288, %s371_s16, [#allocation10], %s3945_s10, %s3945_s10, %s3946_s30  }
  0x45   : > { %p3753_p12 = pneg %p3752_p10 }
  0x47   : > { %p3760_p0 = pnand %p3759_p13, %p3753_p12 }
  0x49   : > { %3763 = shalt.err (!%p3760_p0)
}
  0x4a   : > { %s5108_s17 = smov 64   ;;  %s5110_s16 = smov 4  }
  0x4b   : > { %s5223_s9 = sld [smem:[#allocation99_spill]]  ;;  %s39_s30 = sadd.s32 1, %s3934_s24 }
  0x4c   : > { %s77_s8 = sadd.s32 1, %s3926_s22  ;;  %p40_p8 = scmp.ge.s32.totalorder %s39_s30, 2 }
  0x4d   : > { %p84_p2 = scmp.ne.s32.totalorder %s3926_s22, %s3922_s21  ;;  %p85_p3 = scmp.eq.s32.totalorder %s3938_s25, 0 }
  0x4e   : > { %p90_p6 = scmp.ne.s32.totalorder %s3922_s21, %s3918_s20  ;;  %s5426_s30 = smov (%p40_p8, %s39_s30), 0 }
  0x4f   : > { %p4131_p1 = por %p85_p3, %p84_p2  ;;  %p5225_p9 = scmp.eq.s32.totalorder %s4059_s26, 0 }
  0x50   : > { %s72_s14 = ssub.s32 %s3934_s24, %s5426_s30  ;;  %p3162_p10 = scmp.lt.s32.totalorder %s3938_s25, 2 }
  0x51   : > { %3150 = dma.hbm_to_vmem [thread:$0]  (!%p4079_p7), %s5223_s9, 2048, %s393_s29, [#allocation13], %s5108_s17, %s5108_s17, %s5110_s16  }
  0x52   : > { %p4137_p7 = por %p5225_p9, %p90_p6  ;;  %p75_p12 = scmp.eq.s32.totalorder %s72_s14, 0 }
  0x53   : > { %s409_s29 = sand.u32 1, %s3926_s22   ;;  %s3030_s11 = sshll.u32 %s3934_s24, 8 }
  0x54   : > { %s2828_s20 = sshll.u32 %s409_s29, 4  ;;  %s5228_s1 = sld [smem:[#allocation94_spill]] }
  0x55   : > { %s4146_s13 = scalar_select %p75_p12, %s3926_s22, %s77_s8  }
  0x56   : > { %s413_s3 = scalar_lea.vmem [#allocation3], %s2828_s20  ;;  %p4156_p4 = pnand %p3162_p10, %p4131_p1 }
  0x57   : > { %5227 = sst [smem:[#allocation23_spill]] %s4146_s13  ;;  %s421_s4 = sshll.u32 %s413_s3, 4  ;;  %s422_s4 = int_to_ptr.vmem [resolvable:$true] %s421_s4 }
  0x58   : > { %s100_s14 = ssub.s32 1, %s3934_s24  ;;  %s410_s9 = scalar_lea.sflag [#allocation4], %s409_s29 }
  0x59   : > { %p3766_p11 = pneg %p4156_p4  ;;  %s3777_s8 = scalar_lea.vmem %s422_s4, 256 }
  0x5a   : > { %s420_s16 = scalar_lea.hbm %s5228_s1, %s3030_s11  ;;  %p3778_p13 = scmp.ne.s32.totalorder %s422_s4, %s3777_s8 }
  0x5b   : > { %s3950_s17 = smov [#allocation3]  }
  0x5c   : > { %p3780_p0 = pnand %p3778_p13, %p3766_p11  ;;  %s3782_s11 = sshll.u32 %s3950_s17, 4  ;;  %s3783_s11 = int_to_ptr.vmem [resolvable:$false] %s3782_s11 }
  0x5d   : > { %s3784_s3 = scalar_lea.vmem %s3783_s11, 512  ;;  %p3785_p2 = scmp.lt.s32.totalorder %s422_s4, %s3783_s11 }
  0x5e   : > { %p3781_p8 = pneg %p3780_p0  ;;  %p3786_p6 = scmp.lt.s32.totalorder %s3784_s3, %s3777_s8 }
  0x60   : > { %p3787_p9 = por %p3786_p6, %p3785_p2 }
  0x62   : > { %p3788_p1 = pnand %p3787_p9, %p3781_p8 }
  0x64   : > { %3791 = shalt.err (!%p3788_p1)
}
  0x65   : > { %s5230_s12 = smov 4   ;;  %s5231_s20 = smov 64  }
  0x66   : > { %3154 = dma.hbm_to_vmem [thread:$0]  (!%p4156_p4), %s420_s16, 256, %s422_s4, %s410_s9, %s5231_s20, %s5231_s20, %s5230_s12  }
  0x67   : > { %s101_s29 = ssub.s32 1, %s5426_s30  ;;  %s107_s10 = sadd.s32 1, %s3914_s19 }
  0x68   : > { %s102_s8 = ssub.s32 %s100_s14, %s101_s29  ;;  %p114_p12 = scmp.ne.s32.totalorder %s3914_s19, %s3910_s18 }
  0x69   : > { %p105_p11 = scmp.eq.s32.totalorder %s102_s8, 0  ;;  %s431_s17 = sand.u32 1, %s3938_s25  }
  0x6a   : > { %p116_p13 = por %p114_p12, %p85_p3  ;;  %s433_s11 = sand.u32 1, %s3914_s19  }
  0x6b   : > { %s4176_s5 = scalar_select %p105_p11, %s3914_s19, %s107_s10  }
  0x6c   : > { %s3031_s3 = sshll.u32 %s100_s14, 8  ;;  %s2831_s1 = sshll.u32 %s433_s11, 4 }
  0x6d   : > { %s443_s22 = scalar_lea.hbm %s5096_s2, %s3031_s3  ;;  %p4184_p0 = pnand %p3162_p10, %p116_p13 }
  0x6e   : > { %s435_s9 = scalar_lea.vmem [#allocation6], %s2831_s1  ;;  %s432_s29 = scalar_lea.sflag [#allocation7], %s431_s17 }
  0x6f   : > { %s444_s16 = sshll.u32 %s435_s9, 4  ;;  %p3794_p3 = pneg %p4184_p0  ;;  %s445_s16 = int_to_ptr.vmem [resolvable:$true] %s444_s16 }
  0x70   : > { %s3805_s10 = scalar_lea.vmem %s445_s16, 256  ;;  %s3951_s14 = smov [#allocation6]  }
  0x71   : > { %p3806_p4 = scmp.ne.s32.totalorder %s445_s16, %s3805_s10  ;;  %s3810_s8 = sshll.u32 %s3951_s14, 4  ;;  %s3811_s8 = int_to_ptr.vmem [resolvable:$false] %s3810_s8 }
  0x72   : > { %s3812_s24 = scalar_lea.vmem %s3811_s8, 512  ;;  %p3813_p6 = scmp.lt.s32.totalorder %s445_s16, %s3811_s8 }
  0x73   : > { %p3808_p8 = pnand %p3806_p4, %p3794_p3  ;;  %p3814_p10 = scmp.lt.s32.totalorder %s3812_s24, %s3805_s10 }
  0x75   : > { %p3809_p2 = pneg %p3808_p8  ;;  %p3815_p9 = por %p3814_p10, %p3813_p6 }
  0x77   : > { %p3816_p1 = pnand %p3815_p9, %p3809_p2 }
  0x79   : > { %3819 = shalt.err (!%p3816_p1)
}
  0x7a   : > { %3157 = dma.hbm_to_vmem [thread:$0]  (!%p4184_p0), %s443_s22, 256, %s445_s16, %s432_s29, %s5231_s20, %s5231_s20, %s5230_s12  }
  0x7b   : > { %456 = sbr.rel (%p4071_p5) target bundleno = 1750 (0x6d6), region = 64 }
  0x80   : > { %s458_s1 = sand.u32 1, %s3922_s21  }
  0x81   : > { %s4198_s13 = sshll.u32 %s458_s1, 4  ;;  %s459_s17 = scalar_lea.sflag [#allocation4], %s458_s1 }
  0x82   : > { %s462_s11 = scalar_lea.vmem [#allocation3], %s4198_s13 }
  0x83   : > { %3881 = dma.done.wait (%p4137_p7), %s459_s17, 256  }
  0x84   : > { %3883 = vsyncadd (%p4137_p7), %s459_s17, 4294967040  ;;  %s467_s22 = sand.u32 1, %s4059_s26   ;;  %s469_s12 = sand.u32 1, %s3910_s18  }
  0x85   : > { %s4207_s28 = sshll.u32 %s469_s12, 4  ;;  %s468_s20 = scalar_lea.sflag [#allocation7], %s467_s22 }
  0x86   : > { %s471_s3 = scalar_lea.vmem [#allocation6], %s4207_s28  ;;  %p5233_p5 = scmp.ne.s32.totalorder %s5217_s27, 0 }
  0x88   : > { %3885 = dma.done.wait (%p5233_p5), %s468_s20, 256  }
  0x89   : > { %3887 = vsyncadd (%p5233_p5), %s468_s20, 4294967040  ;;  %p5234_p12 = scmp.eq.s32.totalorder %s4059_s26, 0 }
  0x8b   : > { %3889 = dma.done.wait (%p5234_p12), [#allocation7], 3072   ;;  %p5235_p7 = pmov %p5234_p12 }
  0x8d   : > { %3891 = vsyncadd (%p5235_p7), [#allocation7], 4294964224  ;;  %p5236_p11 = pmov %p5235_p7 }
  0x8e   : > { %p5237_p13 = pmov %p5235_p7 }
  0x8f   : > { %3893 = dma.done.wait (%p5236_p11), [#allocation10], 15360  }
  0x90   : > { %3895 = vsyncadd (%p5237_p13), [#allocation10], 4294951936  ;;  %p5238_p0 = pmov %p5235_p7 }
  0x92   : > { %3897 = dma.done.wait (%p5238_p0), [#allocation13], 2048   ;;  %p5239_p3 = pmov %p5238_p0 }
  0x93   : > { %p2841_p4 = scmp.ne.s32.totalorder %s3930_s23, 0 }
  0x94   : > { %3899 = vsyncadd (%p5239_p3), [#allocation13], 4294965248 }
  0x95   : > { %541 = sbr.rel (%p2841_p4) target bundleno = 156 (0x9c), region = 92 }
  0x9a   : > { %v3952_v0 = vmov 0.0  }
  0x9b   : > { %542 = vst [vmem:[#allocation2] sm:$0xff] %v3952_v0  ;;  %543 = vst [vmem:[#allocation2 + $0x8] sm:$0xff] %v3952_v0 }
  0x9c PF: > { %v3256_v1 = vld [vmem:[#allocation8 + $0xac] ss:$12 sps:$4 sm:$0xff]   ;;  %v3258_v2 = vld [vmem:[#allocation8 + $0xb0] ss:$12 sps:$4 sm:$0xff]   ;;  %v5130_v3 = vmov 0   ;;  %s1235_s27 = ssub.s32 1, %s3930_s23 }
  0x9d   : > { %774 = vmatprep.mubr.bf16.mxu0 %v5130_v3  ;;  %3254 = vset.pattern.permute.xlu0 %v5130_v3  ;;  %v3259_v4 = vld [vmem:[#allocation8 + $0xa8] ss:$12 sps:$4 sm:$0xff]   ;;  %v3262_v6 = vld [vmem:[#allocation8 + $0x98] ss:$12 sps:$4 sm:$0xff]   ;;  %v3263_v7 = vld [vmem:[#allocation8 + $0x90] ss:$12 sps:$4 sm:$0xff]  }
  0x9e   : > { %742 = vmatprep.subr.bf16.mxu0 %v3256_v1  ;;  %3255 = vset.pattern.permute.xlu1 %v5130_v3  ;;  %v3260_v5 = vld [vmem:[#allocation8 + $0x94] ss:$12 sps:$4 sm:$0xff]   ;;  %v3264_v8 = vld [vmem:[#allocation8 + $0x7c] ss:$12 sps:$4 sm:$0xff]   ;;  %v3267_v10 = vld [vmem:[#allocation8 + $0x78] ss:$12 sps:$4 sm:$0xff]  }
  0x9f   : > { %3074 = vmatprep.subr.bf16.mxu1 %v3258_v2  ;;  %743 = vmatpush1.bf16.msra.mxu0 %v3259_v4  ;;  %v3266_v9 = vld [vmem:[#allocation8 + $0x80] ss:$12 sps:$4 sm:$0xff]   ;;  %v3268_v11 = vld [vmem:[#allocation8 + $0x64] ss:$12 sps:$4 sm:$0xff]   ;;  %v3270_v12 = vld [vmem:[#allocation8 + $0x68] ss:$12 sps:$4 sm:$0xff]  }
  0xa0   : > { %3075 = vmatpush3.bf16.msra.mxu1 %v3258_v2  ;;  %744 = vmatprep.subr.bf16.mxu0 %v3260_v5  ;;  %v3271_v13 = vld [vmem:[#allocation8 + $0x60] ss:$12 sps:$4 sm:$0xff]   ;;  %v3274_v15 = vld [vmem:[#allocation8 + $0x50] ss:$12 sps:$4 sm:$0xff]   ;;  %v3275_v16 = vld [vmem:[#allocation8 + $0x48] ss:$12 sps:$4 sm:$0xff]  }
  0xa1   : > { %3076 = vmatprep.subr.bf16.mxu1 %v3262_v6  ;;  %v3272_v14 = vld [vmem:[#allocation8 + $0x4c] ss:$12 sps:$4 sm:$0xff]   ;;  %v3276_v17 = vld [vmem:[#allocation8 + $0x34] ss:$12 sps:$4 sm:$0xff]   ;;  %v3279_v20 = vld [vmem:[#allocation8 + $0x30] ss:$12 sps:$4 sm:$0xff]  }
  0xa2   : > { %v3278_v18 = vld [vmem:[#allocation8 + $0x38] ss:$12 sps:$4 sm:$0xff]   ;;  %v3280_v21 = vld [vmem:[#allocation8 + $0x1c] ss:$12 sps:$4 sm:$0xff]   ;;  %v3282_v22 = vld [vmem:[#allocation8 + $0x20] ss:$12 sps:$4 sm:$0xff]  }
  0xa3   : > { %745 = vmatpush1.bf16.msra.mxu0 %v3263_v7  ;;  %v3288_v19 = vld [vmem:[%s462_s11] sm:$0xff]   ;;  %v3291_v27 = vld [vmem:[#allocation9 + $0xac] ss:$12 sps:$4 sm:$0xff]   ;;  %v3300_v34 = vld [vmem:[#allocation9 + $0x7c] ss:$12 sps:$4 sm:$0xff]   ;;  %s4409_s15 = sshll.u32 %s3930_s23, 2 }
  0xa4   : > { %3077 = vmatpush3.bf16.msra.mxu1 %v3262_v6  ;;  %746 = vmatprep.subr.bf16.mxu0 %v3264_v8  ;;  %v3283_v23 = vld [vmem:[#allocation8 + $0x18] ss:$12 sps:$4 sm:$0xff]   ;;  %v3286_v25 = vld [vmem:[#allocation8 + $0x8] ss:$12 sps:$4 sm:$0xff]   ;;  %v3287_v26 = vld [vmem:[#allocation8] ss:$12 sps:$4 sm:$0xff]  }
  0xa5   : > { %3078 = vmatprep.subr.bf16.mxu1 %v3266_v9  ;;  %3090 = vmatprep.mubr.bf16.mxu1 %v3288_v19  ;;  %v3284_v24 = vld [vmem:[#allocation8 + $0x4] ss:$12 sps:$4 sm:$0xff]   ;;  %v3293_v29 = vld [vmem:[%s462_s11 + $0x8] sm:$0xff]   ;;  %v3296_v31 = vld [vmem:[#allocation9 + $0x94] ss:$12 sps:$4 sm:$0xff]   ;;  %s4416_s16 = sshll.u32 %s1235_s27, 2 }
  0xa6   : > { %v3292_v28 = vld [vmem:[#allocation9 + $0xb0] ss:$12 sps:$4 sm:$0xff]   ;;  %v3289_v30 = vld [vmem:[#allocation9 + $0xa8] ss:$12 sps:$4 sm:$0xff]   ;;  %v3297_v32 = vld [vmem:[#allocation9 + $0x98] ss:$12 sps:$4 sm:$0xff]  }
  0xa7   : > { %747 = vmatpush1.bf16.msra.mxu0 %v3267_v10  ;;  %v3294_v33 = vld [vmem:[#allocation9 + $0x90] ss:$12 sps:$4 sm:$0xff]   ;;  %v3301_v35 = vld [vmem:[#allocation9 + $0x80] ss:$12 sps:$4 sm:$0xff]   ;;  %v3298_v36 = vld [vmem:[#allocation9 + $0x78] ss:$12 sps:$4 sm:$0xff]  }
  0xa8   : > { %3079 = vmatpush3.bf16.msra.mxu1 %v3266_v9  ;;  %748 = vmatprep.subr.bf16.mxu0 %v3268_v11  ;;  %v3304_v37 = vld [vmem:[#allocation9 + $0x64] ss:$12 sps:$4 sm:$0xff]   ;;  %v3305_v39 = vld [vmem:[#allocation9 + $0x68] ss:$12 sps:$4 sm:$0xff]   ;;  %v3302_v40 = vld [vmem:[#allocation9 + $0x60] ss:$12 sps:$4 sm:$0xff]  }
  0xa9   : > { %3080 = vmatprep.subr.bf16.mxu1 %v3270_v12  ;;  %v3322_v38 = vld [vmem:[%s471_s3] sm:$0xff]   ;;  %v3308_v41 = vld [vmem:[#allocation9 + $0x4c] ss:$12 sps:$4 sm:$0xff]   ;;  %v3316_v47 = vld [vmem:[#allocation9 + $0x1c] ss:$12 sps:$4 sm:$0xff]   ;;  %s1237_s29 = sadd.s32 3, %s4416_s16 }
  0xaa   : > { %v3309_v42 = vld [vmem:[#allocation9 + $0x50] ss:$12 sps:$4 sm:$0xff]   ;;  %v3306_v43 = vld [vmem:[#allocation9 + $0x48] ss:$12 sps:$4 sm:$0xff]   ;;  %v3313_v45 = vld [vmem:[#allocation9 + $0x38] ss:$12 sps:$4 sm:$0xff]  }
  0xab   : > { %749 = vmatpush1.bf16.msra.mxu0 %v3271_v13  ;;  %v3312_v44 = vld [vmem:[#allocation9 + $0x34] ss:$12 sps:$4 sm:$0xff]   ;;  %v3310_v46 = vld [vmem:[#allocation9 + $0x30] ss:$12 sps:$4 sm:$0xff]   ;;  %v3314_v49 = vld [vmem:[#allocation9 + $0x18] ss:$12 sps:$4 sm:$0xff]  }
  0xac   : > { %3081 = vmatpush3.bf16.msra.mxu1 %v3270_v12  ;;  %750 = vmatprep.subr.bf16.mxu0 %v3272_v14  ;;  %v3317_v48 = vld [vmem:[#allocation9 + $0x20] ss:$12 sps:$4 sm:$0xff]   ;;  %v3320_v50 = vld [vmem:[#allocation9 + $0x4] ss:$12 sps:$4 sm:$0xff]   ;;  %v3321_v51 = vld [vmem:[#allocation9 + $0x8] ss:$12 sps:$4 sm:$0xff]  }
  0xad   : > { %3082 = vmatprep.subr.bf16.mxu1 %v3274_v15  ;;  %v3318_v52 = vld [vmem:[#allocation9] ss:$12 sps:$4 sm:$0xff]   ;;  %v4240_v54 = vld [vmem:[#allocation11 + $0x15c] ss:$24 sps:$4 sm:$0xff]   ;;  %v4244_v56 = vld [vmem:[#allocation11 + $0x150] ss:$24 sps:$4 sm:$0xff]  }
  0xae   : > { %v4238_v53 = vld [vmem:[#allocation11 + $0x154] ss:$24 sps:$4 sm:$0xff]   ;;  %v4246_v57 = vld [vmem:[#allocation11 + $0x158] ss:$24 sps:$4 sm:$0xff]   ;;  %v4248_v58 = vld [vmem:[#allocation11 + $0x124] ss:$24 sps:$4 sm:$0xff]  }
  0xaf   : > { %751 = vmatpush1.bf16.msra.mxu0 %v3275_v16  ;;  %5240 = vst [vmem:[#allocation24_spill] sm:$0xff] %v4238_v53  ;;  %v3327_v55 = vld [vmem:[%s471_s3 + $0x8] sm:$0xff]   ;;  %s2118_s10 = sadd.s32 1, %s4416_s16  ;;  %s2302_s14 = sadd.s32 3, %s4409_s15 }
  0xb0   : > { %3083 = vmatpush3.bf16.msra.mxu1 %v3274_v15  ;;  %752 = vmatprep.subr.bf16.mxu0 %v3276_v17  ;;  %v4252_v59 = vld [vmem:[#allocation11 + $0x12c] ss:$24 sps:$4 sm:$0xff]   ;;  %v4254_v60 = vld [vmem:[#allocation11 + $0x120] ss:$24 sps:$4 sm:$0xff]   ;;  %v4264_v63 = vld [vmem:[#allocation11 + $0xfc] ss:$24 sps:$4 sm:$0xff]  }
  0xb1   : > { %3084 = vmatprep.subr.bf16.mxu1 %v3278_v18  ;;  %v4256_v61 = vld [vmem:[#allocation11 + $0x128] ss:$24 sps:$4 sm:$0xff]   ;;  %v4260_v62 = vld [vmem:[#allocation11 + $0xf4] ss:$24 sps:$4 sm:$0xff]   ;;  %v4271_v1 = vld [vmem:[#allocation11 + $0xf8] ss:$24 sps:$4 sm:$0xff]  }
  0xb2   : > { %5241 = vst [vmem:[#allocation25_spill] sm:$0xff] %v4260_v62  ;;  %v4267_v0 = vld [vmem:[#allocation11 + $0xf0] ss:$24 sps:$4 sm:$0xff]   ;;  %v4273_v2 = vld [vmem:[#allocation11 + $0xc4] ss:$24 sps:$4 sm:$0xff]   ;;  %s5321_s22 = sld [smem:[#allocation98_spill]] }
  0xb3   : > { %753 = vmatpush1.bf16.msra.mxu0 %v3279_v20  ;;  %v4277_v4 = vld [vmem:[#allocation11 + $0xcc] ss:$24 sps:$4 sm:$0xff]   ;;  %v4279_v5 = vld [vmem:[#allocation11 + $0xc0] ss:$24 sps:$4 sm:$0xff]   ;;  %v4289_v8 = vld [vmem:[#allocation11 + $0x9c] ss:$24 sps:$4 sm:$0xff]  }
  0xb4   : > { %3085 = vmatpush3.bf16.msra.mxu1 %v3278_v18  ;;  %754 = vmatprep.subr.bf16.mxu0 %v3280_v21  ;;  %v4281_v6 = vld [vmem:[#allocation11 + $0xc8] ss:$24 sps:$4 sm:$0xff]   ;;  %v4285_v7 = vld [vmem:[#allocation11 + $0x94] ss:$24 sps:$4 sm:$0xff]   ;;  %v4295_v10 = vld [vmem:[#allocation11 + $0x98] ss:$24 sps:$4 sm:$0xff]  }
  0xb5   : > { %3086 = vmatprep.subr.bf16.mxu1 %v3282_v22  ;;  %v4291_v9 = vld [vmem:[#allocation11 + $0x90] ss:$24 sps:$4 sm:$0xff]   ;;  %v4297_v11 = vld [vmem:[#allocation11 + $0x64] ss:$24 sps:$4 sm:$0xff]   ;;  %v4303_v13 = vld [vmem:[#allocation11 + $0x60] ss:$24 sps:$4 sm:$0xff]  }
  0xb6   : > { %5242 = vst [vmem:[#allocation26_spill] sm:$0xff] %v4291_v9  ;;  %v4301_v12 = vld [vmem:[#allocation11 + $0x6c] ss:$24 sps:$4 sm:$0xff]   ;;  %5243 = vst [vmem:[#allocation27_spill] sm:$0xff] %v4303_v13  ;;  %v4307_v14 = vld [vmem:[#allocation11 + $0x68] ss:$24 sps:$4 sm:$0xff]  }
  0xb7   : > { %755 = vmatpush1.bf16.msra.mxu0 %v3283_v23  ;;  %v4309_v15 = vld [vmem:[#allocation2 + $0x8] sm:$0xff]  ;;  %v4313_v16 = vld [vmem:[#allocation11 + $0x34] ss:$24 sps:$4 sm:$0xff]   ;;  %s1933_s12 = sadd.s32 2, %s4416_s16  ;;  %s1932_s28 = sadd.s32 1, %s4409_s15 }
  0xb8   : > { %3087 = vmatpush3.bf16.msra.mxu1 %v3282_v22  ;;  %756 = vmatprep.subr.bf16.mxu0 %v3284_v24  ;;  %5244 = vst [vmem:[#allocation28_spill] sm:$0xff] %v4309_v15  ;;  %v4315_v17 = vld [vmem:[#allocation11 + $0x3c] ss:$24 sps:$4 sm:$0xff]   ;;  %v4319_v18 = vpack.c.bf16 %v4309_v15, %v4309_v15  ;;  %v4327_v20 = vld [vmem:[#allocation11 + $0x38] ss:$24 sps:$4 sm:$0xff]   ;;  %s2117_s20 = sadd.s32 2, %s4409_s15 }
  0xb9   : > { %3088 = vmatprep.subr.bf16.mxu1 %v3286_v25  ;;  %5246 = vst [vmem:[#allocation30_spill] sm:$0xff] %v4327_v20  ;;  %v4331_v21 = vld [vmem:[#allocation11 + $0x4] ss:$24 sps:$4 sm:$0xff]   ;;  %v4337_v23 = vld [vmem:[#allocation11] ss:$24 sps:$4 sm:$0xff]   ;;  %p3008_p8 = scmp.ne.s32.totalorder %s3930_s23, 1 }
  0xba   : > { %v4333_v22 = vld [vmem:[#allocation11 + $0xc] ss:$24 sps:$4 sm:$0xff]   ;;  %5248 = vst [vmem:[#allocation32_spill] sm:$0xff] %v4337_v23  ;;  %v4339_v24 = vld [vmem:[#allocation11 + $0x8] ss:$24 sps:$4 sm:$0xff]   ;;  %s5414_s27 = sld [smem:[#allocation100_spill]] (!%p3008_p8) }
  0xbb   : > { %757 = vmatpush1.bf16.msra.mxu0 %v3287_v26  ;;  %5247 = vst [vmem:[#allocation31_spill] sm:$0xff] %v4333_v22  ;;  %5249 = vst [vmem:[#allocation33_spill] sm:$0xff] %v4339_v24  ;;  %v4345_v26 = vld [vmem:[#allocation11 + $0x2dc] ss:$24 sps:$4 sm:$0xff]  }
  0xbc   : > { %3089 = vmatpush3.bf16.msra.mxu1 %v3286_v25  ;;  %1033 = vmatprep.subr.bf16.mxu0 %v3291_v27  ;;  %v4343_v25 = vld [vmem:[#allocation11 + $0x2d4] ss:$24 sps:$4 sm:$0xff]   ;;  %5250 = vst [vmem:[#allocation34_spill] sm:$0xff] %v4345_v26  ;;  %v4349_v27 = vld [vmem:[#allocation11 + $0x2d0] ss:$24 sps:$4 sm:$0xff]  }
  0xbd   : > { %3094 = vmatprep.subr.bf16.mxu1 %v3292_v28  ;;  %5251 = vst [vmem:[#allocation35_spill] sm:$0xff] %v4349_v27 }
  0xbe   : > { %775 = vmatmul.mubr.bf16.vlgmr.msra.gmra.mxu0 %v3288_v19  ;;  %v4325_v19 = vld [vmem:[#allocation11 + $0x30] ss:$24 sps:$4 sm:$0xff]  }
  0xbf   : > { %3091 = vmatmul.mubr.bf16.vlgmr.msra.gmra.mxu1 %v3293_v29  ;;  %1034 = vmatpush1.bf16.msra.mxu0 %v3289_v30  ;;  %5245 = vst [vmem:[#allocation29_spill] sm:$0xff] %v4325_v19  ;;  %v4357_v30 = vld [vmem:[#allocation11 + $0x2ac] ss:$24 sps:$4 sm:$0xff]  }
  0xc0   : > { %3095 = vmatpush3.bf16.msra.mxu1 %v3292_v28  ;;  %1035 = vmatprep.subr.bf16.mxu0 %v3296_v31  ;;  %v4351_v28 = vld [vmem:[#allocation11 + $0x2d8] ss:$24 sps:$4 sm:$0xff]   ;;  %5253 = vst [vmem:[#allocation37_spill] sm:$0xff] %v4357_v30 }
  0xc1   : > { %3096 = vmatprep.subr.bf16.mxu1 %v3297_v32  ;;  %784 = vmatprep.mubr.bf16.mxu0 %v5130_v3  ;;  %5252 = vst [vmem:[#allocation36_spill] sm:$0xff] %v4351_v28  ;;  %v4361_v31 = vld [vmem:[#allocation11 + $0x2a0] ss:$24 sps:$4 sm:$0xff]  }
  0xc2   : > { %3110 = vmatprep.mubr.bf16.mxu1 %v3322_v38  ;;  %5254 = vst [vmem:[#allocation38_spill] sm:$0xff] %v4361_v31 }
  0xc3   : > { %1036 = vmatpush1.bf16.msra.mxu0 %v3294_v33  ;;  %v4367_v33 = vld [vmem:[#allocation11 + $0x274] ss:$24 sps:$4 sm:$0xff]  }
  0xc4   : > { %3097 = vmatpush3.bf16.msra.mxu1 %v3297_v32  ;;  %1037 = vmatprep.subr.bf16.mxu0 %v3300_v34  ;;  %v4363_v32 = vld [vmem:[#allocation11 + $0x2a8] ss:$24 sps:$4 sm:$0xff]   ;;  %v4369_v34 = vld [vmem:[#allocation11 + $0x27c] ss:$24 sps:$4 sm:$0xff]  }
  0xc5   : > { %3098 = vmatprep.subr.bf16.mxu1 %v3301_v35  ;;  %5255 = vst [vmem:[#allocation39_spill] sm:$0xff] %v4363_v32  ;;  %5256 = vst [vmem:[#allocation40_spill] sm:$0xff] %v4369_v34 }
  0xc6   : > { %785 = vmatmul.mubr.bf16.gmra.mxu0 %v3293_v29  ;;  %v4355_v29 = vld [vmem:[#allocation11 + $0x2a4] ss:$24 sps:$4 sm:$0xff]  }
  0xc7   : > { %1038 = vmatpush1.bf16.msra.mxu0 %v3298_v36  ;;  %1065 = vmatprep.mubr.bf16.mxu0 %v5130_v3  ;;  %v4375_v36 = vld [vmem:[#allocation11 + $0x278] ss:$24 sps:$4 sm:$0xff]  }
  0xc8   : > { %3099 = vmatpush3.bf16.msra.mxu1 %v3301_v35  ;;  %1039 = vmatprep.subr.bf16.mxu0 %v3304_v37  ;;  %v4373_v35 = vld [vmem:[#allocation11 + $0x270] ss:$24 sps:$4 sm:$0xff]   ;;  %5258 = vst [vmem:[#allocation42_spill] sm:$0xff] %v4375_v36  ;;  %v4379_v37 = vld [vmem:[#allocation11 + $0x244] ss:$24 sps:$4 sm:$0xff]  }
  0xc9   : > { %3100 = vmatprep.subr.bf16.mxu1 %v3305_v39  ;;  %5257 = vst [vmem:[#allocation41_spill] sm:$0xff] %v4373_v35 }
  0xcb   : > { %1040 = vmatpush1.bf16.msra.mxu0 %v3302_v40  ;;  %v4387_v40 = vld [vmem:[#allocation11 + $0x248] ss:$24 sps:$4 sm:$0xff]  }
  0xcc   : > { %3101 = vmatpush3.bf16.msra.mxu1 %v3305_v39  ;;  %1041 = vmatprep.subr.bf16.mxu0 %v3308_v41  ;;  %v4385_v39 = vld [vmem:[#allocation11 + $0x240] ss:$24 sps:$4 sm:$0xff]   ;;  %5261 = vst [vmem:[#allocation45_spill] sm:$0xff] %v4387_v40  ;;  %v4391_v41 = vld [vmem:[#allocation11 + $0x214] ss:$24 sps:$4 sm:$0xff]  }
  0xcd   : > { %3102 = vmatprep.subr.bf16.mxu1 %v3309_v42  ;;  %5260 = vst [vmem:[#allocation44_spill] sm:$0xff] %v4385_v39 }
  0xcf   : > { %1042 = vmatpush1.bf16.msra.mxu0 %v3306_v43  ;;  %v4397_v43 = vld [vmem:[#allocation11 + $0x210] ss:$24 sps:$4 sm:$0xff]  }
  0xd0   : > { %3103 = vmatpush3.bf16.msra.mxu1 %v3309_v42  ;;  %1043 = vmatprep.subr.bf16.mxu0 %v3312_v44  ;;  %v4393_v42 = vld [vmem:[#allocation11 + $0x21c] ss:$24 sps:$4 sm:$0xff]   ;;  %v4399_v44 = vld [vmem:[#allocation11 + $0x218] ss:$24 sps:$4 sm:$0xff]  }
  0xd1   : > { %3104 = vmatprep.subr.bf16.mxu1 %v3313_v45  ;;  %5262 = vst [vmem:[#allocation46_spill] sm:$0xff] %v4393_v42  ;;  %5263 = vst [vmem:[#allocation47_spill] sm:$0xff] %v4399_v44 }
  0xd3   : > { %1044 = vmatpush1.bf16.msra.mxu0 %v3310_v46  ;;  %v4405_v46 = vld [vmem:[#allocation11 + $0x1ec] ss:$24 sps:$4 sm:$0xff]  }
  0xd4   : > { %3105 = vmatpush3.bf16.msra.mxu1 %v3313_v45  ;;  %1045 = vmatprep.subr.bf16.mxu0 %v3316_v47  ;;  %v4403_v45 = vld [vmem:[#allocation11 + $0x1e4] ss:$24 sps:$4 sm:$0xff]   ;;  %5264 = vst [vmem:[#allocation48_spill] sm:$0xff] %v4405_v46  ;;  %v4414_v47 = vld [vmem:[%s5094_s0] sm:$0xff] }
  0xd5   : > { %3106 = vmatprep.subr.bf16.mxu1 %v3317_v48 }
  0xd7   : > { %1046 = vmatpush1.bf16.msra.mxu0 %v3314_v49  ;;  %v4422_v49 = vld [vmem:[#allocation11 + $0x1e8] ss:$24 sps:$4 sm:$0xff]  }
  0xd8   : > { %3107 = vmatpush3.bf16.msra.mxu1 %v3317_v48  ;;  %1047 = vmatprep.subr.bf16.mxu0 %v3320_v50  ;;  %v4420_v48 = vld [vmem:[#allocation11 + $0x1e0] ss:$24 sps:$4 sm:$0xff]   ;;  %5265 = vst [vmem:[#allocation49_spill] sm:$0xff] %v4422_v49  ;;  %v4427_v50 = vld [vmem:[#allocation11 + $0x1b4] ss:$24 sps:$4 sm:$0xff]  }
  0xd9   : > { %3108 = vmatprep.subr.bf16.mxu1 %v3321_v51  ;;  %5266 = vst [vmem:[#allocation50_spill] sm:$0xff] %v4427_v50 }
  0xdb   : > { %1048 = vmatpush1.bf16.msra.mxu0 %v3318_v52  ;;  %v1924_v52 = vstv %s1237_s29 }
  0xdc   : > { %3109 = vmatpush3.bf16.msra.mxu1 %v3321_v51  ;;  %1751 = vmatprep.subr.bf16.mxu0 %v4238_v53  ;;  %v4429_v51 = vld [vmem:[#allocation11 + $0x1bc] ss:$24 sps:$4 sm:$0xff]   ;;  %vm1925_vm0 = vcmp.lt.s32.totalorder %v1924_v52, %v4414_v47 }
  0xdd   : > { %1792 = vmatprep.subr.bf16.mxu1 %v4240_v54  ;;  %5267 = vst [vmem:[#allocation51_spill] sm:$0xff] %v4429_v51  ;;  %v1926_v15 = vsel %vm1925_vm0, 1, %v5130_v3 }
  0xde   : > { %1066 = vmatmul.mubr.bf16.vlgmr.msra.gmra.mxu0 %v3322_v38  ;;  %v4381_v38 = vld [vmem:[#allocation11 + $0x24c] ss:$24 sps:$4 sm:$0xff]   ;;  %1928 = vperm.xlu0 %3254, %v1926_v15  }
  0xdf   : > { %3111 = vmatmul.mubr.bf16.vlgmr.msra.gmra.mxu1 %v3327_v55  ;;  %1752 = vmatpush1.bf16.msra.mxu0 %v4244_v56  ;;  %5259 = vst [vmem:[#allocation43_spill] sm:$0xff] %v4381_v38 }
  0xe0   : > { %1793 = vmatpush1.bf16.msra.mxu1 %v4246_v57  ;;  %1753 = vmatprep.subr.bf16.mxu0 %v4248_v58 }
  0xe1   : > { %1794 = vmatprep.subr.bf16.mxu1 %v4252_v59  ;;  %1075 = vmatprep.mubr.bf16.mxu0 %v5130_v3 }
  0xe2   : > { %1824 = vmatprep.mubr.bf16.mxu1 %v4319_v18 }
  0xe3   : > { %1754 = vmatpush1.bf16.msra.mxu0 %v4254_v60 }
  0xe4   : > { %1795 = vmatpush1.bf16.msra.mxu1 %v4256_v61  ;;  %1755 = vmatprep.subr.bf16.mxu0 %v4260_v62 }
  0xe5   : > { %1796 = vmatprep.subr.bf16.mxu1 %v4264_v63 }
  0xe6   : > { %1076 = vmatmul.mubr.bf16.gmra.mxu0 %v3327_v55  ;;  %v1916_v55 = vstv %s4409_s15 }
  0xe7   : > { %1756 = vmatpush1.bf16.msra.mxu0 %v4267_v0  ;;  %1783 = vmatprep.mubr.bf16.mxu0 %v4319_v18  ;;  %vm1917_vm1 = vcmp.lt.s32.totalorder %v1916_v55, %v4414_v47  ;;  %v4454_v55 = vld [vmem:[#allocation2] sm:$0xff] }
  0xe8   : > { %1797 = vmatpush1.bf16.msra.mxu1 %v4271_v1  ;;  %1757 = vmatprep.subr.bf16.mxu0 %v4273_v2  ;;  %v1918_v52 = vsel %vm1917_vm1, 1, %v5130_v3  ;;  %5274 = vst [vmem:[#allocation58_spill] sm:$0xff] %v4454_v55  ;;  %v4462_v15 = vpack.c.bf16 %v4454_v55, %v4454_v55  ;;  %v4466_v3 = vld [vmem:[#allocation11 + $0x160] ss:$24 sps:$4 sm:$0xff]   ;;  %v4479_v55 = vld [vmem:[#allocation11 + $0x104] ss:$24 sps:$4 sm:$0xff]  }
  0xe9   : > { %1798 = vmatprep.subr.bf16.mxu1 %v4277_v4  ;;  %1920 = vperm.xlu0 %3254, %v1918_v52   ;;  %v4475_v52 = vld [vmem:[#allocation11 + $0x130] ss:$24 sps:$4 sm:$0xff]   ;;  %5277 = vst [vmem:[#allocation61_spill] sm:$0xff] %v4479_v55 }
  0xeb   : > { %1758 = vmatpush1.bf16.msra.mxu0 %v4279_v5 }
  0xec   : > { %1799 = vmatpush1.bf16.msra.mxu1 %v4281_v6  ;;  %1759 = vmatprep.subr.bf16.mxu0 %v4285_v7 }
  0xed   : > { %1800 = vmatprep.subr.bf16.mxu1 %v4289_v8 }
  0xef   : > { %1760 = vmatpush1.bf16.msra.mxu0 %v4291_v9 }
  0xf0   : > { %1801 = vmatpush1.bf16.msra.mxu1 %v4295_v10  ;;  %1761 = vmatprep.subr.bf16.mxu0 %v4297_v11 }
  0xf1   : > { %1802 = vmatprep.subr.bf16.mxu1 %v4301_v12 }
  0xf3   : > { %1762 = vmatpush1.bf16.msra.mxu0 %v4303_v13 }
  0xf4   : > { %1803 = vmatpush1.bf16.msra.mxu1 %v4307_v14  ;;  %1763 = vmatprep.subr.bf16.mxu0 %v4313_v16 }
  0xf5   : > { %1804 = vmatprep.subr.bf16.mxu1 %v4315_v17 }
  0xf7   : > { %1764 = vmatpush1.bf16.msra.mxu0 %v4325_v19 }
  0xf8   : > { %1805 = vmatpush1.bf16.msra.mxu1 %v4327_v20  ;;  %1765 = vmatprep.subr.bf16.mxu0 %v4331_v21 }
  0xf9   : > { %1806 = vmatprep.subr.bf16.mxu1 %v4333_v22 }
  0xfb   : > { %1766 = vmatpush1.bf16.msra.mxu0 %v4337_v23 }
  0xfc   : > { %1807 = vmatpush1.bf16.msra.mxu1 %v4339_v24  ;;  %1767 = vmatprep.subr.bf16.mxu0 %v4343_v25 }
  0xfd   : > { %1808 = vmatprep.subr.bf16.mxu1 %v4345_v26 }
  0xff   : > { %1768 = vmatpush2.bf16.msra.mxu0 %v4349_v27 }
 0x100   : > { %1809 = vmatpush2.bf16.msra.mxu1 %v4351_v28  ;;  %1769 = vmatprep.subr.bf16.mxu0 %v4355_v29 }
 0x101   : > { %1810 = vmatprep.subr.bf16.mxu1 %v4357_v30 }
 0x103   : > { %1770 = vmatpush2.bf16.msra.mxu0 %v4361_v31 }
 0x104   : > { %1811 = vmatpush2.bf16.msra.mxu1 %v4363_v32  ;;  %1771 = vmatprep.subr.bf16.mxu0 %v4367_v33 }
 0x105   : > { %1812 = vmatprep.subr.bf16.mxu1 %v4369_v34 }
 0x107   : > { %1772 = vmatpush2.bf16.msra.mxu0 %v4373_v35 }
 0x108   : > { %1813 = vmatpush2.bf16.msra.mxu1 %v4375_v36  ;;  %1773 = vmatprep.subr.bf16.mxu0 %v4379_v37 }
 0x109   : > { %1814 = vmatprep.subr.bf16.mxu1 %v4381_v38  ;;  %v4452_v38 = vld [vmem:[#allocation11 + $0x188] ss:$24 sps:$4 sm:$0xff]  }
 0x10a   : > { %5273 = vst [vmem:[#allocation57_spill] sm:$0xff] %v4452_v38 }
 0x10b   : > { %1774 = vmatpush2.bf16.msra.mxu0 %v4385_v39 }
 0x10c   : > { %1815 = vmatpush2.bf16.msra.mxu1 %v4387_v40  ;;  %1775 = vmatprep.subr.bf16.mxu0 %v4391_v41  ;;  %v4445_v40 = vld [vmem:[#allocation11 + $0x18c] ss:$24 sps:$4 sm:$0xff]  }
 0x10d   : > { %1816 = vmatprep.subr.bf16.mxu1 %v4393_v42  ;;  %v4438_v42 = vld [vmem:[#allocation11 + $0x1b8] ss:$24 sps:$4 sm:$0xff]   ;;  %5271 = vst [vmem:[#allocation55_spill] sm:$0xff] %v4445_v40 }
 0x10e   : > { %5269 = vst [vmem:[#allocation53_spill] sm:$0xff] %v4438_v42 }
 0x10f   : > { %1776 = vmatpush2.bf16.msra.mxu0 %v4397_v43 }
 0x110   : > { %1817 = vmatpush2.bf16.msra.mxu1 %v4399_v44  ;;  %1777 = vmatprep.subr.bf16.mxu0 %v4403_v45  ;;  %v4436_v44 = vld [vmem:[#allocation11 + $0x1b0] ss:$24 sps:$4 sm:$0xff]  }
 0x111   : > { %1818 = vmatprep.subr.bf16.mxu1 %v4405_v46  ;;  %5268 = vst [vmem:[#allocation52_spill] sm:$0xff] %v4436_v44  ;;  %v4443_v46 = vld [vmem:[#allocation11 + $0x184] ss:$24 sps:$4 sm:$0xff]  }
 0x112   : > { %5270 = vst [vmem:[#allocation54_spill] sm:$0xff] %v4443_v46 }
 0x113   : > { %1778 = vmatpush2.bf16.msra.mxu0 %v4420_v48 }
 0x114   : > { %1819 = vmatpush2.bf16.msra.mxu1 %v4422_v49  ;;  %1779 = vmatprep.subr.bf16.mxu0 %v4427_v50  ;;  %v4450_v49 = vld [vmem:[#allocation11 + $0x180] ss:$24 sps:$4 sm:$0xff]  }
 0x115   : > { %1820 = vmatprep.subr.bf16.mxu1 %v4429_v51  ;;  %5272 = vst [vmem:[#allocation56_spill] sm:$0xff] %v4450_v49  ;;  %v4458_v51 = vld [vmem:[#allocation11 + $0x164] ss:$24 sps:$4 sm:$0xff]  }
 0x116   : > { %5275 = vst [vmem:[#allocation59_spill] sm:$0xff] %v4458_v51 }
 0x117   : > { %1780 = vmatpush2.bf16.msra.mxu0 %v4436_v44 }
 0x118   : > { %1821 = vmatpush2.bf16.msra.mxu1 %v4438_v42  ;;  %1781 = vmatprep.subr.bf16.mxu0 %v4443_v46  ;;  %v4469_v42 = vld [vmem:[#allocation11 + $0x134] ss:$24 sps:$4 sm:$0xff]  }
 0x119   : > { %1822 = vmatprep.subr.bf16.mxu1 %v4445_v40  ;;  %5276 = vst [vmem:[#allocation60_spill] sm:$0xff] %v4469_v42 }
 0x11b   : > { %1782 = vmatpush2.bf16.msra.mxu0 %v4450_v49 }
 0x11c   : > { %1823 = vmatpush2.bf16.msra.mxu1 %v4452_v38  ;;  %1833 = vmatprep.subr.bf16.mxu0 %v4458_v51  ;;  %v4487_v38 = vld [vmem:[#allocation11 + $0xd4] ss:$24 sps:$4 sm:$0xff]  }
 0x11d   : > { %1936 = vmatprep.subr.bf16.mxu1 %v4238_v53  ;;  %v4484_v53 = vld [vmem:[#allocation11 + $0x100] ss:$24 sps:$4 sm:$0xff]  }
 0x11e   : > { %1784 = vmatmul.mubr.bf16.vlgmr.msra.gmra.mxu0 %v4462_v15  ;;  %5278 = vst [vmem:[#allocation62_spill] sm:$0xff] %v4484_v53 }
 0x11f   : > { %1825 = vmatmul.mubr.bf16.vlgmr.msra.gmra.mxu1 %v4462_v15  ;;  %1834 = vmatpush1.bf16.msra.mxu0 %v4466_v3 }
 0x120   : > { %1865 = vmatprep.mubr.bf16.mxu0 %v4319_v18  ;;  %1835 = vmatprep.subr.bf16.mxu0 %v4469_v42  ;;  %v2294_v18 = vstv %s2118_s10  ;;  %v2470_v42 = vstv %s2302_s14 }
 0x121   : > { %1937 = vmatpush1.bf16.msra.mxu1 %v4244_v56  ;;  %v4494_v56 = vld [vmem:[#allocation11 + $0xd0] ss:$24 sps:$4 sm:$0xff]   ;;  %vm2295_vm2 = vcmp.lt.s32.totalorder %v2294_v18, %v4414_v47  ;;  %vm2471_vm3 = vcmp.lt.s32.totalorder %v2470_v42, %v4414_v47  ;;  %v4509_v42 = vld [vmem:[#allocation11 + $0x74] ss:$24 sps:$4 sm:$0xff]  }
 0x122   : > { %1938 = vmatprep.subr.bf16.mxu1 %v4248_v58  ;;  %v4499_v58 = vld [vmem:[#allocation11 + $0xa4] ss:$24 sps:$4 sm:$0xff]   ;;  %5281 = vst [vmem:[#allocation64_spill] sm:$0xff] %v4509_v42  ;;  %v4514_v18 = vld [vmem:[#allocation11 + $0x70] ss:$24 sps:$4 sm:$0xff]  }
 0x123   : > { %1836 = vmatpush1.bf16.msra.mxu0 %v4475_v52  ;;  %5279 = vst [vmem:[#allocation63_spill] sm:$0xff] %v4499_v58 }
 0x124   : > { %1837 = vmatprep.subr.bf16.mxu0 %v4479_v55  ;;  %v5280_v55 = vmov 0  }
 0x125   : > { %1939 = vmatpush1.bf16.msra.mxu1 %v4254_v60  ;;  %v2296_v60 = vsel %vm2295_vm2, 1, %v5280_v55 }
 0x126   : > { %1940 = vmatprep.subr.bf16.mxu1 %v4260_v62  ;;  %2298 = vperm.xlu0 %3254, %v2296_v60   ;;  %v2472_v62 = vsel %vm2471_vm3, 1, %v5280_v55  ;;  %v4517_v60 = vld [vmem:[#allocation11 + $0x44] ss:$24 sps:$4 sm:$0xff]  }
 0x127   : > { %1838 = vmatpush1.bf16.msra.mxu0 %v4484_v53  ;;  %v4506_v53 = vld [vmem:[#allocation11 + $0xa0] ss:$24 sps:$4 sm:$0xff]   ;;  %5282 = vst [vmem:[#allocation65_spill] sm:$0xff] %v4517_v60 }
 0x128   : > { %1839 = vmatprep.subr.bf16.mxu0 %v4487_v38 }
 0x129   : > { %1941 = vmatpush1.bf16.msra.mxu1 %v4267_v0 }
 0x12a   : > { %1942 = vmatprep.subr.bf16.mxu1 %v4273_v2  ;;  %2474 = vperm.xlu0 %3254, %v2472_v62   ;;  %v4525_v62 = vld [vmem:[#allocation11 + $0x14] ss:$24 sps:$4 sm:$0xff]  }
 0x12b   : > { %1840 = vmatpush1.bf16.msra.mxu0 %v4494_v56  ;;  %5283 = vst [vmem:[#allocation66_spill] sm:$0xff] %v4525_v62 }
 0x12c   : > { %1841 = vmatprep.subr.bf16.mxu0 %v4499_v58  ;;  %v4522_v58 = vld [vmem:[#allocation11 + $0x40] ss:$24 sps:$4 sm:$0xff]  }
 0x12d   : > { %1943 = vmatpush1.bf16.msra.mxu1 %v4279_v5 }
 0x12e   : > { %1944 = vmatprep.subr.bf16.mxu1 %v4285_v7 }
 0x12f   : > { %1842 = vmatpush1.bf16.msra.mxu0 %v4506_v53 }
 0x130   : > { %1843 = vmatprep.subr.bf16.mxu0 %v4509_v42  ;;  %v4530_v42 = vld [vmem:[#allocation11 + $0x10] ss:$24 sps:$4 sm:$0xff]  }
 0x131   : > { %1945 = vmatpush1.bf16.msra.mxu1 %v4291_v9  ;;  %v4533_v9 = vld [vmem:[#allocation11 + $0x2e4] ss:$24 sps:$4 sm:$0xff]  }
 0x132   : > { %1946 = vmatprep.subr.bf16.mxu1 %v4297_v11  ;;  %5284 = vst [vmem:[#allocation67_spill] sm:$0xff] %v4533_v9 }
 0x133   : > { %1844 = vmatpush1.bf16.msra.mxu0 %v4514_v18 }
 0x134   : > { %1845 = vmatprep.subr.bf16.mxu0 %v4517_v60  ;;  %v4538_v60 = vld [vmem:[#allocation11 + $0x2e0] ss:$24 sps:$4 sm:$0xff]  }
 0x135   : > { %1947 = vmatpush1.bf16.msra.mxu1 %v4303_v13  ;;  %v4541_v13 = vld [vmem:[#allocation11 + $0x2b4] ss:$24 sps:$4 sm:$0xff]  }
 0x136   : > { %1948 = vmatprep.subr.bf16.mxu1 %v4313_v16  ;;  %5285 = vst [vmem:[#allocation68_spill] sm:$0xff] %v4541_v13 }
 0x137   : > { %1846 = vmatpush1.bf16.msra.mxu0 %v4522_v58 }
 0x138   : > { %1847 = vmatprep.subr.bf16.mxu0 %v4525_v62  ;;  %v4546_v62 = vld [vmem:[#allocation11 + $0x2b0] ss:$24 sps:$4 sm:$0xff]  }
 0x139   : > { %1949 = vmatpush1.bf16.msra.mxu1 %v4325_v19  ;;  %v4549_v19 = vld [vmem:[#allocation11 + $0x284] ss:$24 sps:$4 sm:$0xff]  }
 0x13a   : > { %1950 = vmatprep.subr.bf16.mxu1 %v4331_v21  ;;  %5286 = vst [vmem:[#allocation69_spill] sm:$0xff] %v4549_v19 }
 0x13b   : > { %1848 = vmatpush1.bf16.msra.mxu0 %v4530_v42 }
 0x13c   : > { %1849 = vmatprep.subr.bf16.mxu0 %v4533_v9  ;;  %v4554_v9 = vld [vmem:[#allocation11 + $0x280] ss:$24 sps:$4 sm:$0xff]  }
 0x13d   : > { %1951 = vmatpush1.bf16.msra.mxu1 %v4337_v23  ;;  %v4557_v23 = vld [vmem:[#allocation11 + $0x254] ss:$24 sps:$4 sm:$0xff]  }
 0x13e   : > { %1952 = vmatprep.subr.bf16.mxu1 %v4343_v25  ;;  %5287 = vst [vmem:[#allocation70_spill] sm:$0xff] %v4557_v23 }
 0x13f   : > { %1850 = vmatpush2.bf16.msra.mxu0 %v4538_v60 }
 0x140   : > { %1851 = vmatprep.subr.bf16.mxu0 %v4541_v13  ;;  %v4562_v13 = vld [vmem:[#allocation11 + $0x250] ss:$24 sps:$4 sm:$0xff]  }
 0x141   : > { %1953 = vmatpush2.bf16.msra.mxu1 %v4349_v27  ;;  %v4565_v27 = vld [vmem:[#allocation11 + $0x224] ss:$24 sps:$4 sm:$0xff]  }
 0x142   : > { %1954 = vmatprep.subr.bf16.mxu1 %v4355_v29  ;;  %5288 = vst [vmem:[#allocation71_spill] sm:$0xff] %v4565_v27 }
 0x143   : > { %1852 = vmatpush2.bf16.msra.mxu0 %v4546_v62 }
 0x144   : > { %1853 = vmatprep.subr.bf16.mxu0 %v4549_v19  ;;  %v4570_v19 = vld [vmem:[#allocation11 + $0x220] ss:$24 sps:$4 sm:$0xff]  }
 0x145   : > { %1955 = vmatpush2.bf16.msra.mxu1 %v4361_v31  ;;  %v4573_v31 = vld [vmem:[#allocation11 + $0x1f4] ss:$24 sps:$4 sm:$0xff]  }
 0x146   : > { %1956 = vmatprep.subr.bf16.mxu1 %v4367_v33  ;;  %5289 = vst [vmem:[#allocation72_spill] sm:$0xff] %v4573_v31 }
 0x147   : > { %1854 = vmatpush2.bf16.msra.mxu0 %v4554_v9 }
 0x148   : > { %1855 = vmatprep.subr.bf16.mxu0 %v4557_v23  ;;  %v4578_v23 = vld [vmem:[#allocation11 + $0x1f0] ss:$24 sps:$4 sm:$0xff]  }
 0x149   : > { %1957 = vmatpush2.bf16.msra.mxu1 %v4373_v35  ;;  %v4581_v35 = vld [vmem:[#allocation11 + $0x1c4] ss:$24 sps:$4 sm:$0xff]  }
 0x14a   : > { %1958 = vmatprep.subr.bf16.mxu1 %v4379_v37 }
 0x14b   : > { %1856 = vmatpush2.bf16.msra.mxu0 %v4562_v13 }
 0x14c   : > { %1857 = vmatprep.subr.bf16.mxu0 %v4565_v27  ;;  %v4586_v27 = vld [vmem:[#allocation11 + $0x1c0] ss:$24 sps:$4 sm:$0xff]  }
 0x14d   : > { %1959 = vmatpush2.bf16.msra.mxu1 %v4385_v39  ;;  %5290 = vst [vmem:[#allocation73_spill] sm:$0xff] %v4586_v27  ;;  %v4589_v39 = vld [vmem:[#allocation11 + $0x194] ss:$24 sps:$4 sm:$0xff]  }
 0x14e   : > { %1960 = vmatprep.subr.bf16.mxu1 %v4391_v41  ;;  %5291 = vst [vmem:[#allocation74_spill] sm:$0xff] %v4589_v39 }
 0x14f   : > { %1858 = vmatpush2.bf16.msra.mxu0 %v4570_v19 }
 0x150   : > { %1859 = vmatprep.subr.bf16.mxu0 %v4573_v31  ;;  %v4594_v31 = vld [vmem:[#allocation11 + $0x190] ss:$24 sps:$4 sm:$0xff]  }
 0x151   : > { %1961 = vmatpush2.bf16.msra.mxu1 %v4397_v43  ;;  %5292 = vst [vmem:[#allocation75_spill] sm:$0xff] %v4594_v31 }
 0x152   : > { %1962 = vmatprep.subr.bf16.mxu1 %v4403_v45 }
 0x153   : > { %1860 = vmatpush2.bf16.msra.mxu0 %v4578_v23 }
 0x154   : > { %1861 = vmatprep.subr.bf16.mxu0 %v4581_v35 }
 0x155   : > { %1963 = vmatpush2.bf16.msra.mxu1 %v4420_v48 }
 0x156   : > { %1964 = vmatprep.subr.bf16.mxu1 %v4427_v50 }
 0x157   : > { %1862 = vmatpush2.bf16.msra.mxu0 %v4586_v27 }
 0x158   : > { %1863 = vmatprep.subr.bf16.mxu0 %v4589_v39 }
 0x159   : > { %1965 = vmatpush2.bf16.msra.mxu1 %v4436_v44 }
 0x15a   : > { %1966 = vmatprep.subr.bf16.mxu1 %v4443_v46 }
 0x15b   : > { %1864 = vmatpush2.bf16.msra.mxu0 %v4594_v31 }
 0x15c   : > { %1977 = vmatprep.subr.bf16.mxu0 %v4240_v54  ;;  %v587_v54 = vlaneseq }
 0x15d   : > { %1967 = vmatpush2.bf16.msra.mxu1 %v4450_v49 }
 0x15e   : > { %2018 = vmatprep.subr.bf16.mxu1 %v4458_v51  ;;  %1866 = vmatmul.mubr.bf16.vlgmr.msra.gmra.mxu0 %v4462_v15 }
 0x15f   : > { %1978 = vmatpush1.bf16.msra.mxu0 %v4246_v57  ;;  %v4616_v57 = vshrl.u32 %v587_v54, 7 }
 0x160   : > { %1979 = vmatprep.subr.bf16.mxu0 %v4252_v59 }
 0x161   : > { %v4619_v59 = vsub.s32 2, %v4616_v57 }
 0x163   : > { %1980 = vmatpush1.bf16.msra.mxu0 %v4256_v61  ;;  %v585_v61 = vld [vmem:[%s5100_s6] sm:$0x7] }
 0x164   : > { %1981 = vmatprep.subr.bf16.mxu0 %v4264_v63  ;;  %v4627_v63 = vrot.slane %v585_v61, %v4619_v59 }
 0x167   : > { %1982 = vmatpush1.bf16.msra.mxu0 %v4271_v1  ;;  %v4632_v1 = vsub.s32 0, %v4616_v57 }
 0x168   : > { %1983 = vmatprep.subr.bf16.mxu0 %v4277_v4 }
 0x16b   : > { %1984 = vmatpush1.bf16.msra.mxu0 %v4281_v6 }
 0x16c   : > { %1985 = vmatprep.subr.bf16.mxu0 %v4289_v8  ;;  %v4637_v8 = vsub.s32 1, %v4616_v57 }
 0x16f   : > { %1986 = vmatpush1.bf16.msra.mxu0 %v4295_v10 }
 0x170   : > { %1987 = vmatprep.subr.bf16.mxu0 %v4301_v12 }
 0x173   : > { %1988 = vmatpush1.bf16.msra.mxu0 %v4307_v14 }
 0x174   : > { %1989 = vmatprep.subr.bf16.mxu0 %v4315_v17  ;;  %v590_v17 = vrot.slane %v585_v61, %v4632_v1 }
 0x177   : > { %1990 = vmatpush1.bf16.msra.mxu0 %v4327_v20 }
 0x178   : > { %1991 = vmatprep.subr.bf16.mxu0 %v4333_v22 }
 0x17b   : > { %1992 = vmatpush1.bf16.msra.mxu0 %v4339_v24 }
 0x17c   : > { %1993 = vmatprep.subr.bf16.mxu0 %v4345_v26  ;;  %v4650_v26 = vrot.slane %v585_v61, %v4637_v8 }
 0x17e   : > { %v4634_v4 = vpop.f32.mrf.mxu0 }
 0x17f   : > { %v3092_v6 = vpop.f32.mrf.mxu1  ;;  %1994 = vmatpush2.bf16.msra.mxu0 %v4351_v28 }
 0x180   : > { %v4640_v10 = vadd.f32 %v3092_v6, %v4627_v63  ;;  %v4643_v12 = vpop.f32.mrf.mxu0  ;;  %1995 = vmatprep.subr.bf16.mxu0 %v4357_v30 }
 0x181   : > { %v4645_v14 = vpop.f32.mrf.mxu1  ;;  %v779_v50 = vadd.f32 %v4643_v12, %v4650_v26 }
 0x182   : > { %5293 = vst [vmem:[#allocation76_spill] sm:$0xff] %v4640_v10  ;;  %v780_v15 = vpop.f32.mrf.mxu0  ;;  %v830_v12 = vadd.f32 %v4645_v14, %v4627_v63 }
 0x183   : > { %v3093_v54 = vpop.f32.mrf.mxu1  ;;  %v4652_v24 = vadd.f32 %v780_v15, %v590_v17  ;;  %1996 = vmatpush2.bf16.msra.mxu0 %v4363_v32 }
 0x184   : > { %v4655_v6 = vadd.f32 %v3093_v54, %v4627_v63  ;;  %v782_v10 = vpop.f32.mrf.mxu0  ;;  %1997 = vmatprep.subr.bf16.mxu0 %v4369_v34  ;;  %v5299_v54 = vld [vmem:[#allocation43_spill] sm:$0xff]  ;;  %v5302_v34 = vld [vmem:[#allocation45_spill] sm:$0xff] }
 0x185   : > { %5294 = vst [vmem:[#allocation77_spill] sm:$0xff] %v4652_v24  ;;  %v832_v28 = vpop.f32.mrf.mxu1  ;;  %v4660_v30 = vadd.f32 %v782_v10, %v4650_v26 }
 0x186   : > { %5295 = vst [vmem:[#allocation78_spill] sm:$0xff] %v4655_v6  ;;  %v4663_v22 = vadd.f32 %v832_v28, %v4627_v63  ;;  %v786_v20 = vpop.f32.mrf.mxu0 }
 0x187   : > { %5296 = vst [vmem:[#allocation79_spill] sm:$0xff] %v4660_v30  ;;  %v4665_v61 = vadd.f32 %v786_v20, %v590_v17  ;;  %1998 = vmatpush2.bf16.msra.mxu0 %v4375_v36  ;;  %v5303_v30 = vld [vmem:[#allocation46_spill] sm:$0xff]  ;;  %v5305_v20 = vld [vmem:[#allocation47_spill] sm:$0xff] }
 0x188   : > { %5297 = vst [vmem:[#allocation80_spill] sm:$0xff] %v4663_v22  ;;  %v788_v15 = vpop.f32.mrf.mxu0  ;;  %1999 = vmatprep.subr.bf16.mxu0 %v5299_v54  ;;  %v5307_v22 = vld [vmem:[#allocation49_spill] sm:$0xff]  ;;  %v5308_v54 = vld [vmem:[#allocation51_spill] sm:$0xff] }
 0x189   : > { %5298 = vst [vmem:[#allocation81_spill] sm:$0xff] %v4665_v61  ;;  %v4670_v6 = vadd.f32 %v788_v15, %v4650_v26  ;;  %v5306_v61 = vld [vmem:[#allocation48_spill] sm:$0xff]  ;;  %v5309_v15 = vld [vmem:[#allocation53_spill] sm:$0xff] }
 0x18a   : > { %v790_v24 = vpop.f32.mrf.mxu0 }
 0x18b   : > { %5300 = vst [vmem:[#allocation82_spill] sm:$0xff] %v4670_v6  ;;  %v4672_v32 = vadd.f32 %v790_v24, %v590_v17  ;;  %2000 = vmatpush2.bf16.msra.mxu0 %v5302_v34  ;;  %v876_v24 = vld [vmem:[%s5101_s7] sm:$0x7]  ;;  %v5311_v6 = vld [vmem:[#allocation24_spill] sm:$0xff] }
 0x18c   : > { %v792_v10 = vpop.f32.mrf.mxu0  ;;  %2001 = vmatprep.subr.bf16.mxu0 %v5303_v30 }
 0x18d   : > { %5301 = vst [vmem:[#allocation83_spill] sm:$0xff] %v4672_v32  ;;  %v4677_v28 = vadd.f32 %v792_v10, %v4650_v26  ;;  %v881_v32 = vrot.slane %v876_v24, %v4632_v1  ;;  %v4690_v10 = vrot.slane %v876_v24, %v4619_v59 }
 0x18f   : > { %5304 = vst [vmem:[#allocation84_spill] sm:$0xff] %v4677_v28  ;;  %2002 = vmatpush2.bf16.msra.mxu0 %v5305_v20  ;;  %v5310_v28 = vld [vmem:[#allocation57_spill] sm:$0xff] }
 0x190   : > { %2003 = vmatprep.subr.bf16.mxu0 %v5306_v61 }
 0x193   : > { %2004 = vmatpush2.bf16.msra.mxu0 %v5307_v22  ;;  %v4695_v22 = vrot.slane %v876_v24, %v4637_v8 }
 0x194   : > { %2005 = vmatprep.subr.bf16.mxu0 %v5308_v54 }
 0x197   : > { %2006 = vmatpush2.bf16.msra.mxu0 %v5309_v15 }
 0x198   : > { %2007 = vmatprep.subr.bf16.mxu0 %v4445_v40 }
 0x19b   : > { %2008 = vmatpush2.bf16.msra.mxu0 %v5310_v28 }
 0x19c   : > { %2121 = vmatprep.subr.bf16.mxu0 %v5311_v6 }
 0x19e   : > { %v1067_v54 = vpop.f32.mrf.mxu0 }
 0x19f   : > { %v3112_v15 = vpop.f32.mrf.mxu1  ;;  %v4697_v61 = vadd.f32 %v1067_v54, %v881_v32 }
 0x1a0   : > { %v4700_v20 = vadd.f32 %v3112_v15, %v4690_v10  ;;  %v1069_v40 = vpop.f32.mrf.mxu0 }
 0x1a1   : > { %5312 = vst [vmem:[#allocation24_spill] sm:$0xff] %v4697_v61  ;;  %v1120_v30 = vpop.f32.mrf.mxu1  ;;  %v4703_v34 = vadd.f32 %v1069_v40, %v4695_v22 }
 0x1a2   : > { %5313 = vst [vmem:[#allocation85_spill] sm:$0xff] %v4700_v20  ;;  %v4706_v36 = vadd.f32 %v1120_v30, %v4690_v10  ;;  %v1071_v28 = vpop.f32.mrf.mxu0 }
 0x1a3   : > { %5314 = vst [vmem:[#allocation86_spill] sm:$0xff] %v4703_v34  ;;  %v4708_v6 = vpop.f32.mrf.mxu1  ;;  %v4710_v24 = vadd.f32 %v1071_v28, %v881_v32  ;;  %v4726_v28 = vld [vmem:[%s5321_s22] sm:$0x3f] }
 0x1a4   : > { %5315 = vst [vmem:[#allocation87_spill] sm:$0xff] %v4706_v36  ;;  %v1073_v51 = vpop.f32.mrf.mxu0 }
 0x1a5   : > { %5316 = vst [vmem:[#allocation88_spill] sm:$0xff] %v4710_v24  ;;  %v1123_v49 = vpop.f32.mrf.mxu1  ;;  %v4713_v54 = vadd.f32 %v1073_v51, %v4695_v22  ;;  %v4730_v51 = vrot.slane %v4726_v28, %v4632_v1 }
 0x1a6   : > { %v4716_v15 = vadd.f32 %v1123_v49, %v4690_v10  ;;  %v1077_v61 = vpop.f32.mrf.mxu0 }
 0x1a7   : > { %5317 = vst [vmem:[#allocation89_spill] sm:$0xff] %v4713_v54  ;;  %v4718_v20 = vadd.f32 %v1077_v61, %v881_v32  ;;  %5322 = vst [vmem:[#allocation93_spill] sm:$0xff] %v4730_v51  ;;  %v777_v61 = vadd.f32 %v4634_v4, %v590_v17 }
 0x1a8   : > { %5318 = vst [vmem:[#allocation90_spill] sm:$0xff] %v4716_v15  ;;  %v1079_v40 = vpop.f32.mrf.mxu0 }
 0x1a9   : > { %5319 = vst [vmem:[#allocation91_spill] sm:$0xff] %v4718_v20  ;;  %v4721_v30 = vadd.f32 %v1079_v40, %v4695_v22  ;;  %v4738_v40 = vrot.slane %v4726_v28, %v4637_v8 }
 0x1aa   : > { %v1081_v36 = vpop.f32.mrf.mxu0 }
 0x1ab   : > { %5320 = vst [vmem:[#allocation92_spill] sm:$0xff] %v4721_v30 }
 0x1ac   : > { %v4732_v34 = vpop.f32.mrf.mxu0 }
 0x1de   : > { %v1785_v49 = vpop.f32.mrf.mxu0 }
 0x1df   : > { %v1826_v15 = vpop.f32.mrf.mxu1  ;;  %v1786_v54 = vadd.f32 %v1785_v49, %v4730_v51  ;;  %v1255_v51 = vsub.s32 3, %v4616_v57 }
 0x1e0   : > { %v1787_v24 = vpop.f32.mrf.mxu0 }
 0x1e1   : > { %v1828_v30 = vpop.f32.mrf.mxu1  ;;  %v1874_v20 = vadd.f32 %v1786_v54, %v777_v61  ;;  %v1788_v1 = vadd.f32 %v1787_v24, %v4738_v40 }
 0x1e2   : > { %v1789_v31 = vpop.f32.mrf.mxu0 }
 0x1e3   : > { %v1830_v46 = vpop.f32.mrf.mxu1  ;;  %v2992_v44 = vmul.f32 -1.442695, %v1874_v20  ;;  %v1881_v4 = vadd.f32 %v1788_v1, %v779_v50  ;;  %v4746_v31 = vrot.slane %v4726_v28, %v4619_v59  ;;  %v1082_v20 = vadd.f32 %v1081_v36, %v881_v32 }
 0x1e4   : > { %v1790_v39 = vpop.f32.mrf.mxu0  ;;  %v2286_v36 = vstv %s2117_s20 }
 0x1e5   : > { %v1831_v27 = vpop.f32.mrf.mxu1  ;;  %3468 = vpow2.f32 %v2992_v44  ;;  %v2993_v17 = vmul.f32 -1.442695, %v1881_v4  ;;  %v1827_v26 = vadd.f32 %v1826_v15, %v4746_v31  ;;  %v2109_v15 = vstv %s1933_s12 }
 0x1e6   : > { %v4749_v27 = vrot.slane %v4726_v28, %v1255_v51  ;;  %v2101_v51 = vstv %s1932_s28  ;;  %vm2110_vm4 = vcmp.lt.s32.totalorder %v2109_v15, %v4414_v47  ;;  %vm2287_vm6 = vcmp.lt.s32.totalorder %v2286_v36, %v4414_v47 }
 0x1e7   : > { %3470 = vpow2.f32 %v2993_v17  ;;  %vm2102_vm5 = vcmp.lt.s32.totalorder %v2101_v51, %v4414_v47  ;;  %v2111_v32 = vsel %vm2110_vm4, 1, %v5280_v55  ;;  %v2478_v4 = vstv %s4416_s16 }
 0x1e8   : > { %v1829_v44 = vadd.f32 %v1828_v30, %v4749_v27  ;;  %2113 = vperm.xlu1 %3255, %v2111_v32   ;;  %v2103_v63 = vsel %vm2102_vm5, 1, %v5280_v55  ;;  %vm2479_vm7 = vcmp.lt.s32.totalorder %v2478_v4, %v4414_v47 }
 0x1ea   : > { %v1895_v54 = vadd.f32 %v1829_v44, %v1082_v20 }
 0x1ec   : > { %v2994_v61 = vmul.f32 -1.442695, %v1895_v54  ;;  %2105 = vperm.xlu1 %3255, %v2103_v63  }
 0x1f2   : > { %v3469_v49 = vpop.eup %3468 }
 0x1f3   : > { %v1878_v8 = vadd.f32 1.0, %v3469_v49  ;;  %v5323_v49 = vld [vmem:[#allocation58_spill] sm:$0xff] }
 0x1f4   : > { %v3471_v46 = vpop.eup %3470 }
 0x1f5   : > { %3472 = vrcp.f32 %v1878_v8  ;;  %v1885_v39 = vadd.f32 1.0, %v3471_v46  ;;  %v2288_v46 = vsel %vm2287_vm6, 1, %v5280_v55 }
 0x1f6   : > { %2290 = vperm.xlu1 %3255, %v2288_v46  }
 0x1f7   : > { %3474 = vrcp.f32 %v1885_v39  ;;  %v1259_v39 = vsub.s32 4, %v4616_v57 }
 0x202   : > { %v3473_v50 = vpop.eup %3472 }
 0x203   : > { %v1888_v24 = vmul.f32 %v3473_v50, %v1827_v26  ;;  %v2480_v50 = vsel %vm2479_vm7, 1, %v5280_v55 }
 0x204   : > { %v3475_v30 = vpop.eup %3474  ;;  %2482 = vperm.xlu1 %3255, %v2480_v50  }
 0x205   : > { %v1889_v59 = vadd.f32 %v1888_v24, %v830_v12  ;;  %v1891_v14 = vsub.f32 1.0, %v3475_v30  ;;  %v1893_v8 = vmul.f32 %v3475_v30, %v5323_v49  ;;  %v4770_v12 = vrot.slane %v4726_v28, %v1259_v39 }
 0x206   : > { %v1263_v30 = vsub.s32 5, %v4616_v57 }
 0x207   : > { %3476 = vtanh.f32 %v1889_v59  ;;  %v1084_v59 = vadd.f32 %v4732_v34, %v4695_v22  ;;  %v1132_v22 = vadd.f32 %v4708_v6, %v4690_v10 }
 0x208   : > { %3478 = vpow2.f32 %v2994_v61  ;;  %v4777_v55 = vrot.slane %v4726_v28, %v1263_v30  ;;  %v5329_v30 = vld [vmem:[#allocation63_spill] sm:$0xff] }
 0x214   : > { %v3477_v1 = vpop.eup %3476 }
 0x215   : > { %v1892_v17 = vmul.f32 %v3477_v1, %v1891_v14  ;;  %v3479_v44 = vpop.eup %3478 }
 0x216   : > { %v1899_v20 = vadd.f32 1.0, %v3479_v44  ;;  %v5324_v44 = vld [vmem:[#allocation28_spill] sm:$0xff] }
 0x217   : > { %v1894_v26 = vadd.f32 %v1893_v8, %v1892_v17  ;;  %v1929_v17 = vpop.permute.xlu0 %1928 }
 0x218   : > { %3480 = vrcp.f32 %v1899_v20  ;;  %vm1930_vm9 = vcmp.eq.s32.totalorder %v1929_v17, 1  ;;  %v5349_v17 = vld [vmem:[#allocation74_spill] sm:$0xff] }
 0x21b   : > { %v1921_v57 = vpop.permute.xlu0 %1920 }
 0x21c   : > { %vm1922_vm8 = vcmp.eq.s32.totalorder %v1921_v57, 1  ;;  %v5352_v57 = vld [vmem:[#allocation75_spill] sm:$0xff] }
 0x21e   : > { %v1867_v24 = vpop.f32.mrf.mxu0 }
 0x21f   : > { %v1868_v54 = vadd.f32 %v1867_v24, %v4770_v12  ;;  %v4784_v24 = vsel %vm1922_vm8, %v1894_v26, %v5323_v49  ;;  %v5325_v49 = vld [vmem:[#allocation60_spill] sm:$0xff] }
 0x220   : > { %v1869_v61 = vpop.f32.mrf.mxu0  ;;  %v4799_v26 = vld [vmem:[#allocation11 + $0x150] ss:$24 sps:$4 sm:$0xff]  }
 0x221   : > { %v1902_v15 = vadd.f32 %v1868_v54, %v1084_v59  ;;  %v1870_v36 = vadd.f32 %v1869_v61, %v4777_v55  ;;  %v4793_v59 = vpack.c.bf16 %v4784_v24, %v4784_v24  ;;  %v4802_v54 = vld [vmem:[#allocation11 + $0x124] ss:$24 sps:$4 sm:$0xff]   ;;  %v5326_v61 = vld [vmem:[#allocation61_spill] sm:$0xff] }
 0x222   : > { %v1871_v51 = vpop.f32.mrf.mxu0 }
 0x223   : > { %v2995_v47 = vmul.f32 -1.442695, %v1902_v15  ;;  %v4807_v15 = vld [vmem:[#allocation11 + $0x120] ss:$24 sps:$4 sm:$0xff]   ;;  %v5327_v51 = vld [vmem:[#allocation25_spill] sm:$0xff] }
 0x224   : > { %v1872_v32 = vpop.f32.mrf.mxu0 }
 0x225   : > { %3482 = vpow2.f32 %v2995_v47  ;;  %v3481_v63 = vpop.eup %3480  ;;  %v5328_v47 = vld [vmem:[#allocation62_spill] sm:$0xff]  ;;  %v5330_v32 = vld [vmem:[#allocation64_spill] sm:$0xff] }
 0x226   : > { %v1909_v14 = vmul.f32 %v3481_v63, %v1870_v36  ;;  %v5331_v36 = vld [vmem:[#allocation26_spill] sm:$0xff]  ;;  %v5336_v63 = vld [vmem:[#allocation67_spill] sm:$0xff] }
 0x228   : > { %v1910_v4 = vadd.f32 %v1909_v14, %v1132_v22  ;;  %v5338_v14 = vld [vmem:[#allocation68_spill] sm:$0xff]  ;;  %v5340_v22 = vld [vmem:[#allocation69_spill] sm:$0xff] }
 0x232   : > { %v3483_v34 = vpop.eup %3482 }
 0x233   : > { %v1906_v1 = vadd.f32 1.0, %v3483_v34  ;;  %v5342_v34 = vld [vmem:[#allocation70_spill] sm:$0xff] }
 0x235   : > { %3484 = vrcp.f32 %v1906_v1  ;;  %v5344_v1 = vld [vmem:[#allocation71_spill] sm:$0xff] }
 0x236   : > { %3486 = vtanh.f32 %v1910_v4  ;;  %v5346_v4 = vld [vmem:[#allocation72_spill] sm:$0xff] }
 0x242   : > { %v3485_v8 = vpop.eup %3484 }
 0x243   : > { %v1912_v46 = vsub.f32 1.0, %v3485_v8  ;;  %v3487_v39 = vpop.eup %3486  ;;  %v1914_v50 = vmul.f32 %v3485_v8, %v5324_v44  ;;  %v5351_v8 = vld [vmem:[#allocation54_spill] sm:$0xff] }
 0x245   : > { %v1913_v28 = vmul.f32 %v3487_v39, %v1912_v46  ;;  %v5354_v46 = vld [vmem:[#allocation59_spill] sm:$0xff] }
 0x246   : > { %v4873_v39 = vld [vmem:[#allocation11 + $0x12c] ss:$24 sps:$4 sm:$0xff]  }
 0x247   : > { %v1915_v20 = vadd.f32 %v1914_v50, %v1913_v28  ;;  %v4876_v28 = vld [vmem:[#allocation11 + $0x128] ss:$24 sps:$4 sm:$0xff]   ;;  %v4882_v50 = vld [vmem:[#allocation11 + $0xf8] ss:$24 sps:$4 sm:$0xff]  }
 0x248   : > { %5355 = vst [vmem:[#allocation58_spill] sm:$0xff] %v4876_v28  ;;  %5357 = vst [vmem:[#allocation60_spill] sm:$0xff] %v4882_v50 }
 0x249   : > { %v4787_v10 = vsel %vm1930_vm9, %v1915_v20, %v5324_v44  ;;  %v4879_v44 = vld [vmem:[#allocation11 + $0xfc] ss:$24 sps:$4 sm:$0xff]   ;;  %v4885_v20 = vld [vmem:[#allocation11 + $0xcc] ss:$24 sps:$4 sm:$0xff]  }
 0x24a   : > { %v1935_v6 = vpack.c.bf16 %v4787_v10, %v4787_v10  ;;  %5356 = vst [vmem:[#allocation28_spill] sm:$0xff] %v4879_v44  ;;  %5358 = vst [vmem:[#allocation61_spill] sm:$0xff] %v4885_v20 }
 0x24c   : > { %1968 = vmatprep.mubr.bf16.mxu1 %v1935_v6  ;;  %2009 = vmatprep.mubr.bf16.mxu0 %v1935_v6 }
 0x24d   : > { %1969 = vmatmul.mubr.bf16.vlgmr.msra.gmra.mxu1 %v4793_v59  ;;  %2010 = vmatmul.mubr.bf16.vlgmr.msra.gmra.mxu0 %v4793_v59 }
 0x24e   : > { %2019 = vmatpush1.bf16.msra.mxu1 %v4466_v3  ;;  %2050 = vmatprep.mubr.bf16.mxu1 %v1935_v6  ;;  %v4888_v6 = vld [vmem:[#allocation11 + $0xc8] ss:$24 sps:$4 sm:$0xff]  }
 0x24f   : > { %2020 = vmatprep.subr.bf16.mxu1 %v5325_v49  ;;  %2122 = vmatpush1.bf16.msra.mxu0 %v4799_v26  ;;  %5359 = vst [vmem:[#allocation25_spill] sm:$0xff] %v4888_v6 }
 0x250   : > { %2123 = vmatprep.subr.bf16.mxu0 %v4802_v54 }
 0x252   : > { %2021 = vmatpush1.bf16.msra.mxu1 %v4475_v52 }
 0x253   : > { %2022 = vmatprep.subr.bf16.mxu1 %v5326_v61  ;;  %2124 = vmatpush1.bf16.msra.mxu0 %v4807_v15 }
 0x254   : > { %2125 = vmatprep.subr.bf16.mxu0 %v5327_v51  ;;  %v4894_v51 = vld [vmem:[#allocation11 + $0x98] ss:$24 sps:$4 sm:$0xff]  }
 0x255   : > { %5361 = vst [vmem:[#allocation63_spill] sm:$0xff] %v4894_v51 }
 0x256   : > { %2023 = vmatpush1.bf16.msra.mxu1 %v5328_v47 }
 0x257   : > { %2024 = vmatprep.subr.bf16.mxu1 %v4487_v38  ;;  %2126 = vmatpush1.bf16.msra.mxu0 %v4267_v0  ;;  %v5332_v0 = vld [vmem:[#allocation65_spill] sm:$0xff] }
 0x258   : > { %2127 = vmatprep.subr.bf16.mxu0 %v4273_v2  ;;  %v5333_v2 = vld [vmem:[#allocation27_spill] sm:$0xff] }
 0x25a   : > { %2025 = vmatpush1.bf16.msra.mxu1 %v4494_v56 }
 0x25b   : > { %2026 = vmatprep.subr.bf16.mxu1 %v5329_v30  ;;  %2128 = vmatpush1.bf16.msra.mxu0 %v4279_v5  ;;  %v5334_v5 = vld [vmem:[#allocation66_spill] sm:$0xff] }
 0x25c   : > { %2129 = vmatprep.subr.bf16.mxu0 %v4285_v7  ;;  %v5335_v7 = vld [vmem:[#allocation29_spill] sm:$0xff] }
 0x25e   : > { %2027 = vmatpush1.bf16.msra.mxu1 %v4506_v53 }
 0x25f   : > { %2028 = vmatprep.subr.bf16.mxu1 %v5330_v32  ;;  %2130 = vmatpush1.bf16.msra.mxu0 %v5331_v36  ;;  %v4897_v36 = vld [vmem:[#allocation11 + $0x6c] ss:$24 sps:$4 sm:$0xff]  }
 0x260   : > { %2131 = vmatprep.subr.bf16.mxu0 %v4297_v11  ;;  %v5337_v11 = vld [vmem:[#allocation32_spill] sm:$0xff]  ;;  %5362 = vst [vmem:[#allocation64_spill] sm:$0xff] %v4897_v36 }
 0x262   : > { %2029 = vmatpush1.bf16.msra.mxu1 %v4514_v18 }
 0x263   : > { %2030 = vmatprep.subr.bf16.mxu1 %v5332_v0  ;;  %2132 = vmatpush1.bf16.msra.mxu0 %v5333_v2  ;;  %v4900_v2 = vld [vmem:[#allocation11 + $0x68] ss:$24 sps:$4 sm:$0xff]  }
 0x264   : > { %2133 = vmatprep.subr.bf16.mxu0 %v4313_v16  ;;  %v5339_v16 = vld [vmem:[#allocation35_spill] sm:$0xff]  ;;  %5363 = vst [vmem:[#allocation26_spill] sm:$0xff] %v4900_v2 }
 0x266   : > { %2031 = vmatpush1.bf16.msra.mxu1 %v4522_v58 }
 0x267   : > { %2032 = vmatprep.subr.bf16.mxu1 %v5334_v5  ;;  %2134 = vmatpush1.bf16.msra.mxu0 %v5335_v7  ;;  %v4903_v7 = vld [vmem:[#allocation11 + $0x3c] ss:$24 sps:$4 sm:$0xff]  }
 0x268   : > { %2135 = vmatprep.subr.bf16.mxu0 %v4331_v21  ;;  %v5341_v21 = vld [vmem:[#allocation38_spill] sm:$0xff]  ;;  %5364 = vst [vmem:[#allocation65_spill] sm:$0xff] %v4903_v7 }
 0x26a   : > { %2033 = vmatpush1.bf16.msra.mxu1 %v4530_v42 }
 0x26b   : > { %2034 = vmatprep.subr.bf16.mxu1 %v5336_v63  ;;  %2136 = vmatpush1.bf16.msra.mxu0 %v5337_v11  ;;  %v5365_v11 = vld [vmem:[#allocation30_spill] sm:$0xff] }
 0x26c   : > { %2137 = vmatprep.subr.bf16.mxu0 %v4343_v25  ;;  %v5343_v25 = vld [vmem:[#allocation41_spill] sm:$0xff] }
 0x26e   : > { %2035 = vmatpush2.bf16.msra.mxu1 %v4538_v60 }
 0x26f   : > { %2036 = vmatprep.subr.bf16.mxu1 %v5338_v14  ;;  %2138 = vmatpush2.bf16.msra.mxu0 %v5339_v16  ;;  %v5366_v16 = vld [vmem:[#allocation31_spill] sm:$0xff] }
 0x270   : > { %2139 = vmatprep.subr.bf16.mxu0 %v4355_v29  ;;  %v5345_v29 = vld [vmem:[#allocation44_spill] sm:$0xff] }
 0x272   : > { %2037 = vmatpush2.bf16.msra.mxu1 %v4546_v62 }
 0x273   : > { %2038 = vmatprep.subr.bf16.mxu1 %v5340_v22  ;;  %2140 = vmatpush2.bf16.msra.mxu0 %v5341_v21  ;;  %v5367_v21 = vld [vmem:[#allocation33_spill] sm:$0xff] }
 0x274   : > { %2141 = vmatprep.subr.bf16.mxu0 %v4367_v33  ;;  %v5347_v33 = vld [vmem:[#allocation50_spill] sm:$0xff] }
 0x276   : > { %2039 = vmatpush2.bf16.msra.mxu1 %v4554_v9 }
 0x277   : > { %2040 = vmatprep.subr.bf16.mxu1 %v5342_v34  ;;  %2142 = vmatpush2.bf16.msra.mxu0 %v5343_v25  ;;  %v5368_v25 = vld [vmem:[#allocation34_spill] sm:$0xff] }
 0x278   : > { %2143 = vmatprep.subr.bf16.mxu0 %v4379_v37  ;;  %v5348_v37 = vld [vmem:[#allocation73_spill] sm:$0xff] }
 0x27a   : > { %2041 = vmatpush2.bf16.msra.mxu1 %v4562_v13 }
 0x27b   : > { %2042 = vmatprep.subr.bf16.mxu1 %v5344_v1  ;;  %2144 = vmatpush2.bf16.msra.mxu0 %v5345_v29  ;;  %v5369_v29 = vld [vmem:[#allocation36_spill] sm:$0xff] }
 0x27c   : > { %2145 = vmatprep.subr.bf16.mxu0 %v4391_v41  ;;  %v5350_v41 = vld [vmem:[#allocation52_spill] sm:$0xff] }
 0x27e   : > { %2043 = vmatpush2.bf16.msra.mxu1 %v4570_v19 }
 0x27f   : > { %2044 = vmatprep.subr.bf16.mxu1 %v5346_v4  ;;  %2146 = vmatpush2.bf16.msra.mxu0 %v4397_v43  ;;  %v4864_v43 = vld [vmem:[#allocation11 + $0x15c] ss:$24 sps:$4 sm:$0xff]  }
 0x280   : > { %2147 = vmatprep.subr.bf16.mxu0 %v4403_v45  ;;  %v5353_v45 = vld [vmem:[#allocation56_spill] sm:$0xff] }
 0x282   : > { %2045 = vmatpush2.bf16.msra.mxu1 %v4578_v23 }
 0x283   : > { %2046 = vmatprep.subr.bf16.mxu1 %v4581_v35  ;;  %2148 = vmatpush2.bf16.msra.mxu0 %v4420_v48  ;;  %v4870_v48 = vld [vmem:[#allocation11 + $0x158] ss:$24 sps:$4 sm:$0xff]  }
 0x284   : > { %2149 = vmatprep.subr.bf16.mxu0 %v5347_v33  ;;  %v5370_v33 = vld [vmem:[#allocation37_spill] sm:$0xff] }
 0x286   : > { %2047 = vmatpush2.bf16.msra.mxu1 %v5348_v37 }
 0x287   : > { %2048 = vmatprep.subr.bf16.mxu1 %v5349_v17  ;;  %2150 = vmatpush2.bf16.msra.mxu0 %v5350_v41  ;;  %v5371_v41 = vld [vmem:[#allocation39_spill] sm:$0xff] }
 0x288   : > { %2151 = vmatprep.subr.bf16.mxu0 %v5351_v8  ;;  %v5372_v8 = vld [vmem:[#allocation40_spill] sm:$0xff] }
 0x28a   : > { %2049 = vmatpush2.bf16.msra.mxu1 %v5352_v57 }
 0x28b   : > { %2162 = vmatprep.subr.bf16.mxu1 %v4864_v43  ;;  %2152 = vmatpush2.bf16.msra.mxu0 %v5353_v45  ;;  %v5373_v45 = vld [vmem:[#allocation42_spill] sm:$0xff] }
 0x28c   : > { %2203 = vmatprep.subr.bf16.mxu0 %v5354_v46  ;;  %v5374_v46 = vld [vmem:[#allocation43_spill] sm:$0xff] }
 0x28d   : > { %2051 = vmatmul.mubr.bf16.vlgmr.msra.gmra.mxu1 %v4793_v59  ;;  %v4891_v59 = vld [vmem:[#allocation11 + $0x9c] ss:$24 sps:$4 sm:$0xff]  }
 0x28e   : > { %2163 = vmatpush1.bf16.msra.mxu1 %v4870_v48  ;;  %5360 = vst [vmem:[#allocation62_spill] sm:$0xff] %v4891_v59 }
 0x28f   : > { %2164 = vmatprep.subr.bf16.mxu1 %v4873_v39 }
 0x292   : > { %2165 = vmatpush1.bf16.msra.mxu1 %v4876_v28 }
 0x293   : > { %2166 = vmatprep.subr.bf16.mxu1 %v4879_v44 }
 0x296   : > { %2167 = vmatpush1.bf16.msra.mxu1 %v4882_v50 }
 0x297   : > { %2168 = vmatprep.subr.bf16.mxu1 %v4885_v20 }
 0x29a   : > { %2169 = vmatpush1.bf16.msra.mxu1 %v4888_v6 }
 0x29b   : > { %2170 = vmatprep.subr.bf16.mxu1 %v4891_v59 }
 0x29e   : > { %2171 = vmatpush1.bf16.msra.mxu1 %v4894_v51  ;;  %v5385_v51 = vld [vmem:[#allocation77_spill] sm:$0xff] }
 0x29f   : > { %2172 = vmatprep.subr.bf16.mxu1 %v4897_v36 }
 0x2a2   : > { %2173 = vmatpush1.bf16.msra.mxu1 %v4900_v2  ;;  %v5384_v2 = vld [vmem:[#allocation93_spill] sm:$0xff] }
 0x2a3   : > { %2174 = vmatprep.subr.bf16.mxu1 %v4903_v7  ;;  %v5375_v7 = vld [vmem:[#allocation45_spill] sm:$0xff] }
 0x2a6   : > { %2175 = vmatpush1.bf16.msra.mxu1 %v5365_v11  ;;  %v5376_v11 = vld [vmem:[#allocation46_spill] sm:$0xff] }
 0x2a7   : > { %2176 = vmatprep.subr.bf16.mxu1 %v5366_v16  ;;  %v5377_v16 = vld [vmem:[#allocation47_spill] sm:$0xff] }
 0x2aa   : > { %2177 = vmatpush1.bf16.msra.mxu1 %v5367_v21  ;;  %v5378_v21 = vld [vmem:[#allocation48_spill] sm:$0xff] }
 0x2ab   : > { %2178 = vmatprep.subr.bf16.mxu1 %v5368_v25  ;;  %v5379_v25 = vld [vmem:[#allocation49_spill] sm:$0xff] }
 0x2ae   : > { %2179 = vmatpush2.bf16.msra.mxu1 %v5369_v29  ;;  %v5380_v29 = vld [vmem:[#allocation51_spill] sm:$0xff] }
 0x2af   : > { %2180 = vmatprep.subr.bf16.mxu1 %v5370_v33  ;;  %v5381_v33 = vld [vmem:[#allocation53_spill] sm:$0xff] }
 0x2b2   : > { %2181 = vmatpush2.bf16.msra.mxu1 %v5371_v41  ;;  %v5382_v41 = vld [vmem:[#allocation55_spill] sm:$0xff] }
 0x2b3   : > { %2182 = vmatprep.subr.bf16.mxu1 %v5372_v8  ;;  %v5383_v8 = vld [vmem:[#allocation57_spill] sm:$0xff] }
 0x2b6   : > { %2183 = vmatpush2.bf16.msra.mxu1 %v5373_v45  ;;  %v3564_v45 = vld [vmem:[#allocation11 + $0x154] ss:$24 sps:$4 sm:$0xff]  }
 0x2b7   : > { %2184 = vmatprep.subr.bf16.mxu1 %v5374_v46 }
 0x2ba   : > { %2185 = vmatpush2.bf16.msra.mxu1 %v5375_v7 }
 0x2bb   : > { %2186 = vmatprep.subr.bf16.mxu1 %v5376_v11 }
 0x2be   : > { %2187 = vmatpush2.bf16.msra.mxu1 %v5377_v16 }
 0x2bf   : > { %2188 = vmatprep.subr.bf16.mxu1 %v5378_v21 }
 0x2c2   : > { %2189 = vmatpush2.bf16.msra.mxu1 %v5379_v25 }
 0x2c3   : > { %2190 = vmatprep.subr.bf16.mxu1 %v5380_v29 }
 0x2c6   : > { %2191 = vmatpush2.bf16.msra.mxu1 %v5381_v33 }
 0x2c7   : > { %2192 = vmatprep.subr.bf16.mxu1 %v5382_v41  ;;  %v5386_v41 = vld [vmem:[#allocation79_spill] sm:$0xff] }
 0x2ca   : > { %2193 = vmatpush2.bf16.msra.mxu1 %v5383_v8 }
 0x2cb   : > { %2305 = vmatprep.subr.bf16.mxu1 %v3564_v45 }
 0x30d   : > { %v1970_v46 = vpop.f32.mrf.mxu1  ;;  %v2011_v7 = vpop.f32.mrf.mxu0 }
 0x30e   : > { %v1971_v11 = vadd.f32 %v1970_v46, %v5384_v2  ;;  %v5387_v2 = vld [vmem:[#allocation91_spill] sm:$0xff] }
 0x30f   : > { %v1972_v36 = vpop.f32.mrf.mxu1  ;;  %v2013_v16 = vpop.f32.mrf.mxu0 }
 0x310   : > { %v2059_v21 = vadd.f32 %v1971_v11, %v5385_v51  ;;  %v1973_v29 = vadd.f32 %v1972_v36, %v4738_v40  ;;  %v2014_v46 = vadd.f32 %v2013_v16, %v4749_v27 }
 0x311   : > { %v1974_v59 = vpop.f32.mrf.mxu1  ;;  %v2015_v25 = vpop.f32.mrf.mxu0 }
 0x312   : > { %v2996_v6 = vmul.f32 -1.442695, %v2059_v21  ;;  %v2066_v8 = vadd.f32 %v1973_v29, %v5386_v41  ;;  %v2080_v28 = vadd.f32 %v2014_v46, %v5387_v2  ;;  %v2012_v21 = vadd.f32 %v2011_v7, %v4746_v31  ;;  %v5389_v46 = vld [vmem:[#allocation92_spill] sm:$0xff] }
 0x313   : > { %v1975_v33 = vpop.f32.mrf.mxu1  ;;  %v2016_v20 = vpop.f32.mrf.mxu0 }
 0x314   : > { %3488 = vpow2.f32 %v2996_v6  ;;  %v2997_v50 = vmul.f32 -1.442695, %v2066_v8  ;;  %v2998_v59 = vmul.f32 -1.442695, %v2080_v28  ;;  %v5388_v6 = vld [vmem:[#allocation80_spill] sm:$0xff] }
 0x316   : > { %3490 = vpow2.f32 %v2997_v50 }
 0x321   : > { %v3489_v45 = vpop.eup %3488 }
 0x322   : > { %v2063_v44 = vadd.f32 1.0, %v3489_v45 }
 0x323   : > { %v3491_v51 = vpop.eup %3490 }
 0x324   : > { %3492 = vrcp.f32 %v2063_v44  ;;  %v2070_v11 = vadd.f32 1.0, %v3491_v51 }
 0x325   : > { %3494 = vpow2.f32 %v2998_v59 }
 0x326   : > { %3496 = vrcp.f32 %v2070_v11 }
 0x331   : > { %v3493_v36 = vpop.eup %3492 }
 0x332   : > { %v2073_v20 = vmul.f32 %v3493_v36, %v2012_v21  ;;  %v3495_v50 = vpop.eup %3494 }
 0x333   : > { %v3497_v29 = vpop.eup %3496  ;;  %v2084_v33 = vadd.f32 1.0, %v3495_v50 }
 0x334   : > { %v2074_v25 = vadd.f32 %v2073_v20, %v5388_v6  ;;  %v2076_v44 = vsub.f32 1.0, %v3497_v29  ;;  %v2078_v2 = vmul.f32 %v3497_v29, %v4784_v24  ;;  %v2114_v29 = vpop.permute.xlu1 %2113 }
 0x335   : > { %vm2115_vm11 = vcmp.eq.s32.totalorder %v2114_v29, 1  ;;  %v3602_v29 = vld [vmem:[#allocation11 + $0x278] ss:$24 sps:$4 sm:$0xff]  }
 0x336   : > { %3498 = vtanh.f32 %v2074_v25  ;;  %v5390_v25 = vld [vmem:[#allocation85_spill] sm:$0xff] }
 0x337   : > { %3500 = vrcp.f32 %v2084_v33 }
 0x343   : > { %v3499_v41 = vpop.eup %3498 }
 0x344   : > { %v2077_v16 = vmul.f32 %v3499_v41, %v2076_v44  ;;  %v3501_v11 = vpop.eup %3500 }
 0x346   : > { %v2079_v28 = vadd.f32 %v2078_v2, %v2077_v16  ;;  %v2106_v16 = vpop.permute.xlu1 %2105 }
 0x347   : > { %vm2107_vm10 = vcmp.eq.s32.totalorder %v2106_v16, 1  ;;  %v3604_v16 = vld [vmem:[#allocation11 + $0x248] ss:$24 sps:$4 sm:$0xff]  }
 0x34d   : > { %v2052_v8 = vpop.f32.mrf.mxu1 }
 0x34e   : > { %v2053_v7 = vadd.f32 %v2052_v8, %v4770_v12 }
 0x34f   : > { %v2054_v45 = vpop.f32.mrf.mxu1 }
 0x350   : > { %v2087_v51 = vadd.f32 %v2053_v7, %v5389_v46  ;;  %v2055_v59 = vadd.f32 %v2054_v45, %v4777_v55 }
 0x351   : > { %v2056_v21 = vpop.f32.mrf.mxu1 }
 0x352   : > { %v2999_v36 = vmul.f32 -1.442695, %v2087_v51  ;;  %v2094_v20 = vmul.f32 %v3501_v11, %v2055_v59  ;;  %v4940_v51 = vsel %vm2107_vm10, %v2079_v28, %v4784_v24  ;;  %v3565_v24 = vld [vmem:[#allocation11 + $0xf4] ss:$24 sps:$4 sm:$0xff]   ;;  %v5399_v28 = vld [vmem:[#allocation26_spill] sm:$0xff] }
 0x353   : > { %v2057_v6 = vpop.f32.mrf.mxu1  ;;  %v4949_v21 = vpack.c.bf16 %v4940_v51, %v4940_v51 }
 0x354   : > { %3502 = vpow2.f32 %v2999_v36  ;;  %v2095_v50 = vadd.f32 %v2094_v20, %v5390_v25  ;;  %v3595_v36 = vld [vmem:[#allocation11 + $0xc] ss:$24 sps:$4 sm:$0xff]   ;;  %v3596_v20 = vld [vmem:[#allocation11 + $0x8] ss:$24 sps:$4 sm:$0xff]   ;;  %v3597_v6 = vld [vmem:[#allocation11 + $0x2dc] ss:$24 sps:$4 sm:$0xff]  }
 0x355   : > { %v3598_v25 = vld [vmem:[#allocation11 + $0x2d8] ss:$24 sps:$4 sm:$0xff]  }
 0x361   : > { %v3503_v33 = vpop.eup %3502 }
 0x362   : > { %v2091_v44 = vadd.f32 1.0, %v3503_v33  ;;  %v3600_v33 = vld [vmem:[#allocation11 + $0x2a8] ss:$24 sps:$4 sm:$0xff]  }
 0x364   : > { %3504 = vrcp.f32 %v2091_v44  ;;  %v3601_v44 = vld [vmem:[#allocation11 + $0x27c] ss:$24 sps:$4 sm:$0xff]  }
 0x365   : > { %3506 = vtanh.f32 %v2095_v50  ;;  %v3599_v50 = vld [vmem:[#allocation11 + $0x2ac] ss:$24 sps:$4 sm:$0xff]  }
 0x371   : > { %v3505_v41 = vpop.eup %3504 }
 0x372   : > { %v2097_v2 = vsub.f32 1.0, %v3505_v41  ;;  %v3507_v8 = vpop.eup %3506  ;;  %v2099_v45 = vmul.f32 %v3505_v41, %v4787_v10  ;;  %v3603_v41 = vld [vmem:[#allocation11 + $0x24c] ss:$24 sps:$4 sm:$0xff]  }
 0x374   : > { %v2098_v7 = vmul.f32 %v3507_v8, %v2097_v2  ;;  %v3605_v2 = vld [vmem:[#allocation11 + $0x21c] ss:$24 sps:$4 sm:$0xff]   ;;  %v3606_v8 = vld [vmem:[#allocation11 + $0x218] ss:$24 sps:$4 sm:$0xff]  }
 0x376   : > { %v2100_v46 = vadd.f32 %v2099_v45, %v2098_v7  ;;  %v3607_v7 = vld [vmem:[#allocation11 + $0x1ec] ss:$24 sps:$4 sm:$0xff]   ;;  %v3608_v45 = vld [vmem:[#allocation11 + $0x1e8] ss:$24 sps:$4 sm:$0xff]  }
 0x378   : > { %v4943_v59 = vsel %vm2115_vm11, %v2100_v46, %v4787_v10  ;;  %v3567_v10 = vld [vmem:[#allocation11 + $0xc4] ss:$24 sps:$4 sm:$0xff]  }
 0x379   : > { %v2120_v11 = vpack.c.bf16 %v4943_v59, %v4943_v59  ;;  %v3609_v46 = vld [vmem:[#allocation11 + $0x1bc] ss:$24 sps:$4 sm:$0xff]  }
 0x37b   : > { %2153 = vmatprep.mubr.bf16.mxu0 %v2120_v11  ;;  %2194 = vmatprep.mubr.bf16.mxu1 %v2120_v11 }
 0x37c   : > { %2154 = vmatmul.mubr.bf16.vlgmr.msra.gmra.mxu0 %v4949_v21  ;;  %2195 = vmatmul.mubr.bf16.vlgmr.msra.gmra.mxu1 %v4949_v21 }
 0x37d   : > { %2204 = vmatpush1.bf16.msra.mxu0 %v4466_v3  ;;  %2235 = vmatprep.mubr.bf16.mxu0 %v2120_v11  ;;  %v3566_v3 = vld [vmem:[#allocation11 + $0xf0] ss:$24 sps:$4 sm:$0xff]  }
 0x37e   : > { %2205 = vmatprep.subr.bf16.mxu0 %v5325_v49  ;;  %2306 = vmatpush1.bf16.msra.mxu1 %v4799_v26  ;;  %v3568_v49 = vld [vmem:[#allocation11 + $0xc0] ss:$24 sps:$4 sm:$0xff]   ;;  %v3570_v26 = vld [vmem:[#allocation11 + $0x90] ss:$24 sps:$4 sm:$0xff]  }
 0x37f   : > { %2307 = vmatprep.subr.bf16.mxu1 %v4802_v54  ;;  %v3571_v54 = vld [vmem:[#allocation11 + $0x64] ss:$24 sps:$4 sm:$0xff]   ;;  %v3610_v11 = vld [vmem:[#allocation11 + $0x1b8] ss:$24 sps:$4 sm:$0xff]  }
 0x381   : > { %2206 = vmatpush1.bf16.msra.mxu0 %v4475_v52  ;;  %v3569_v52 = vld [vmem:[#allocation11 + $0x94] ss:$24 sps:$4 sm:$0xff]  }
 0x382   : > { %2207 = vmatprep.subr.bf16.mxu0 %v5326_v61  ;;  %2308 = vmatpush1.bf16.msra.mxu1 %v4807_v15  ;;  %v3574_v61 = vld [vmem:[#allocation11 + $0x30] ss:$24 sps:$4 sm:$0xff]   ;;  %v3576_v15 = vld [vmem:[#allocation11] ss:$24 sps:$4 sm:$0xff]  }
 0x383   : > { %2309 = vmatprep.subr.bf16.mxu1 %v3565_v24  ;;  %v3612_v24 = vld [vmem:[#allocation11 + $0x188] ss:$24 sps:$4 sm:$0xff]  }
 0x385   : > { %2208 = vmatpush1.bf16.msra.mxu0 %v5328_v47  ;;  %v3578_v47 = vld [vmem:[#allocation11 + $0x2d0] ss:$24 sps:$4 sm:$0xff]  }
 0x386   : > { %2209 = vmatprep.subr.bf16.mxu0 %v4487_v38  ;;  %2310 = vmatpush1.bf16.msra.mxu1 %v3566_v3  ;;  %v3572_v38 = vld [vmem:[#allocation11 + $0x60] ss:$24 sps:$4 sm:$0xff]  }
 0x387   : > { %2311 = vmatprep.subr.bf16.mxu1 %v3567_v10 }
 0x389   : > { %2210 = vmatpush1.bf16.msra.mxu0 %v4494_v56  ;;  %v3573_v56 = vld [vmem:[#allocation11 + $0x34] ss:$24 sps:$4 sm:$0xff]  }
 0x38a   : > { %2211 = vmatprep.subr.bf16.mxu0 %v5329_v30  ;;  %2312 = vmatpush1.bf16.msra.mxu1 %v3568_v49  ;;  %v3580_v30 = vld [vmem:[#allocation11 + $0x2a0] ss:$24 sps:$4 sm:$0xff]   ;;  %v5401_v49 = vld [vmem:[#allocation93_spill] sm:$0xff] }
 0x38b   : > { %2313 = vmatprep.subr.bf16.mxu1 %v3569_v52 }
 0x38d   : > { %2212 = vmatpush1.bf16.msra.mxu0 %v4506_v53  ;;  %v3575_v53 = vld [vmem:[#allocation11 + $0x4] ss:$24 sps:$4 sm:$0xff]  }
 0x38e   : > { %2213 = vmatprep.subr.bf16.mxu0 %v5330_v32  ;;  %2314 = vmatpush1.bf16.msra.mxu1 %v3570_v26  ;;  %v3582_v32 = vld [vmem:[#allocation11 + $0x270] ss:$24 sps:$4 sm:$0xff]  }
 0x38f   : > { %2315 = vmatprep.subr.bf16.mxu1 %v3571_v54 }
 0x391   : > { %2214 = vmatpush1.bf16.msra.mxu0 %v4514_v18  ;;  %v3577_v18 = vld [vmem:[#allocation11 + $0x2d4] ss:$24 sps:$4 sm:$0xff]  }
 0x392   : > { %2215 = vmatprep.subr.bf16.mxu0 %v5332_v0  ;;  %2316 = vmatpush1.bf16.msra.mxu1 %v3572_v38  ;;  %v3584_v0 = vld [vmem:[#allocation11 + $0x240] ss:$24 sps:$4 sm:$0xff]   ;;  %v5402_v38 = vld [vmem:[#allocation81_spill] sm:$0xff] }
 0x393   : > { %2317 = vmatprep.subr.bf16.mxu1 %v3573_v56 }
 0x395   : > { %2216 = vmatpush1.bf16.msra.mxu0 %v4522_v58  ;;  %v3579_v58 = vld [vmem:[#allocation11 + $0x2a4] ss:$24 sps:$4 sm:$0xff]  }
 0x396   : > { %2217 = vmatprep.subr.bf16.mxu0 %v5334_v5  ;;  %2318 = vmatpush1.bf16.msra.mxu1 %v3574_v61  ;;  %v3586_v5 = vld [vmem:[#allocation11 + $0x210] ss:$24 sps:$4 sm:$0xff]  }
 0x397   : > { %2319 = vmatprep.subr.bf16.mxu1 %v3575_v53 }
 0x399   : > { %2218 = vmatpush1.bf16.msra.mxu0 %v4530_v42  ;;  %v3581_v42 = vld [vmem:[#allocation11 + $0x274] ss:$24 sps:$4 sm:$0xff]  }
 0x39a   : > { %2219 = vmatprep.subr.bf16.mxu0 %v5336_v63  ;;  %2320 = vmatpush1.bf16.msra.mxu1 %v3576_v15  ;;  %v3588_v63 = vld [vmem:[#allocation11 + $0x1e0] ss:$24 sps:$4 sm:$0xff]  }
 0x39b   : > { %2321 = vmatprep.subr.bf16.mxu1 %v3577_v18 }
 0x39d   : > { %2220 = vmatpush2.bf16.msra.mxu0 %v4538_v60  ;;  %v3583_v60 = vld [vmem:[#allocation11 + $0x244] ss:$24 sps:$4 sm:$0xff]  }
 0x39e   : > { %2221 = vmatprep.subr.bf16.mxu0 %v5338_v14  ;;  %2322 = vmatpush2.bf16.msra.mxu1 %v3578_v47  ;;  %v3590_v14 = vld [vmem:[#allocation11 + $0x1b0] ss:$24 sps:$4 sm:$0xff]  }
 0x39f   : > { %2323 = vmatprep.subr.bf16.mxu1 %v3579_v58 }
 0x3a1   : > { %2222 = vmatpush2.bf16.msra.mxu0 %v4546_v62  ;;  %v3585_v62 = vld [vmem:[#allocation11 + $0x214] ss:$24 sps:$4 sm:$0xff]  }
 0x3a2   : > { %2223 = vmatprep.subr.bf16.mxu0 %v5340_v22  ;;  %2324 = vmatpush2.bf16.msra.mxu1 %v3580_v30  ;;  %v3592_v22 = vld [vmem:[#allocation11 + $0x180] ss:$24 sps:$4 sm:$0xff]  }
 0x3a3   : > { %2325 = vmatprep.subr.bf16.mxu1 %v3581_v42  ;;  %v5403_v30 = vld [vmem:[#allocation82_spill] sm:$0xff] }
 0x3a5   : > { %2224 = vmatpush2.bf16.msra.mxu0 %v4554_v9  ;;  %v3587_v9 = vld [vmem:[#allocation11 + $0x1e4] ss:$24 sps:$4 sm:$0xff]  }
 0x3a6   : > { %2225 = vmatprep.subr.bf16.mxu0 %v5342_v34  ;;  %2326 = vmatpush2.bf16.msra.mxu1 %v3582_v32  ;;  %v5392_v34 = vld [vmem:[#allocation28_spill] sm:$0xff] }
 0x3a7   : > { %2327 = vmatprep.subr.bf16.mxu1 %v3583_v60 }
 0x3a9   : > { %2226 = vmatpush2.bf16.msra.mxu0 %v4562_v13  ;;  %v3589_v13 = vld [vmem:[#allocation11 + $0x1b4] ss:$24 sps:$4 sm:$0xff]  }
 0x3aa   : > { %2227 = vmatprep.subr.bf16.mxu0 %v5344_v1  ;;  %2328 = vmatpush2.bf16.msra.mxu1 %v3584_v0  ;;  %v5393_v1 = vld [vmem:[#allocation60_spill] sm:$0xff] }
 0x3ab   : > { %2329 = vmatprep.subr.bf16.mxu1 %v3585_v62 }
 0x3ad   : > { %2228 = vmatpush2.bf16.msra.mxu0 %v4570_v19  ;;  %v3591_v19 = vld [vmem:[#allocation11 + $0x184] ss:$24 sps:$4 sm:$0xff]  }
 0x3ae   : > { %2229 = vmatprep.subr.bf16.mxu0 %v5346_v4  ;;  %2330 = vmatpush2.bf16.msra.mxu1 %v3586_v5  ;;  %v5394_v4 = vld [vmem:[#allocation61_spill] sm:$0xff]  ;;  %v5404_v5 = vld [vmem:[#allocation88_spill] sm:$0xff] }
 0x3af   : > { %2331 = vmatprep.subr.bf16.mxu1 %v3587_v9 }
 0x3b1   : > { %2230 = vmatpush2.bf16.msra.mxu0 %v4578_v23  ;;  %v3593_v23 = vld [vmem:[#allocation11 + $0x164] ss:$24 sps:$4 sm:$0xff]  }
 0x3b2   : > { %2231 = vmatprep.subr.bf16.mxu0 %v4581_v35  ;;  %2332 = vmatpush2.bf16.msra.mxu1 %v3588_v63  ;;  %v5391_v35 = vld [vmem:[#allocation58_spill] sm:$0xff] }
 0x3b3   : > { %2333 = vmatprep.subr.bf16.mxu1 %v3589_v13 }
 0x3b5   : > { %2232 = vmatpush2.bf16.msra.mxu0 %v5348_v37  ;;  %v5395_v37 = vld [vmem:[#allocation25_spill] sm:$0xff] }
 0x3b6   : > { %2233 = vmatprep.subr.bf16.mxu0 %v5349_v17  ;;  %2334 = vmatpush2.bf16.msra.mxu1 %v3590_v14  ;;  %v5396_v17 = vld [vmem:[#allocation62_spill] sm:$0xff] }
 0x3b7   : > { %2335 = vmatprep.subr.bf16.mxu1 %v3591_v19 }
 0x3b9   : > { %2234 = vmatpush2.bf16.msra.mxu0 %v5352_v57  ;;  %v5397_v57 = vld [vmem:[#allocation63_spill] sm:$0xff] }
 0x3ba   : > { %2346 = vmatprep.subr.bf16.mxu0 %v4864_v43  ;;  %2336 = vmatpush2.bf16.msra.mxu1 %v3592_v22  ;;  %v5398_v43 = vld [vmem:[#allocation64_spill] sm:$0xff] }
 0x3bb   : > { %2387 = vmatprep.subr.bf16.mxu1 %v3593_v23 }
 0x3bc   : > { %2236 = vmatmul.mubr.bf16.vlgmr.msra.gmra.mxu0 %v4949_v21  ;;  %v3611_v21 = vld [vmem:[#allocation11 + $0x18c] ss:$24 sps:$4 sm:$0xff]  }
 0x3bd   : > { %2347 = vmatpush1.bf16.msra.mxu0 %v4870_v48  ;;  %v5400_v48 = vld [vmem:[#allocation65_spill] sm:$0xff] }
 0x3be   : > { %2348 = vmatprep.subr.bf16.mxu0 %v4873_v39  ;;  %v3594_v39 = vld [vmem:[#allocation11 + $0x38] ss:$24 sps:$4 sm:$0xff]  }
 0x3c1   : > { %2349 = vmatpush1.bf16.msra.mxu0 %v5391_v35  ;;  %v5405_v35 = vld [vmem:[#allocation76_spill] sm:$0xff] }
 0x3c2   : > { %2350 = vmatprep.subr.bf16.mxu0 %v5392_v34 }
 0x3c5   : > { %2351 = vmatpush1.bf16.msra.mxu0 %v5393_v1 }
 0x3c6   : > { %2352 = vmatprep.subr.bf16.mxu0 %v5394_v4 }
 0x3c9   : > { %2353 = vmatpush1.bf16.msra.mxu0 %v5395_v37 }
 0x3ca   : > { %2354 = vmatprep.subr.bf16.mxu0 %v5396_v17 }
 0x3cd   : > { %2355 = vmatpush1.bf16.msra.mxu0 %v5397_v57 }
 0x3ce   : > { %2356 = vmatprep.subr.bf16.mxu0 %v5398_v43 }
 0x3d1   : > { %2357 = vmatpush1.bf16.msra.mxu0 %v5399_v28 }
 0x3d2   : > { %2358 = vmatprep.subr.bf16.mxu0 %v5400_v48 }
 0x3d5   : > { %2359 = vmatpush1.bf16.msra.mxu0 %v3594_v39 }
 0x3d6   : > { %2360 = vmatprep.subr.bf16.mxu0 %v3595_v36 }
 0x3d9   : > { %2361 = vmatpush1.bf16.msra.mxu0 %v3596_v20 }
 0x3da   : > { %2362 = vmatprep.subr.bf16.mxu0 %v3597_v6  ;;  %v5406_v6 = vld [vmem:[#allocation89_spill] sm:$0xff] }
 0x3dd   : > { %2363 = vmatpush2.bf16.msra.mxu0 %v3598_v25 }
 0x3de   : > { %2364 = vmatprep.subr.bf16.mxu0 %v3599_v50 }
 0x3e1   : > { %2365 = vmatpush2.bf16.msra.mxu0 %v3600_v33 }
 0x3e2   : > { %2366 = vmatprep.subr.bf16.mxu0 %v3601_v44 }
 0x3e5   : > { %2367 = vmatpush2.bf16.msra.mxu0 %v3602_v29 }
 0x3e6   : > { %2368 = vmatprep.subr.bf16.mxu0 %v3603_v41 }
 0x3e9   : > { %2369 = vmatpush2.bf16.msra.mxu0 %v3604_v16 }
 0x3ea   : > { %2370 = vmatprep.subr.bf16.mxu0 %v3605_v2  ;;  %v5407_v2 = vld [vmem:[#allocation90_spill] sm:$0xff] }
 0x3ed   : > { %2371 = vmatpush2.bf16.msra.mxu0 %v3606_v8 }
 0x3ee   : > { %2372 = vmatprep.subr.bf16.mxu0 %v3607_v7 }
 0x3f1   : > { %2373 = vmatpush2.bf16.msra.mxu0 %v3608_v45 }
 0x3f2   : > { %2374 = vmatprep.subr.bf16.mxu0 %v3609_v46 }
 0x3f5   : > { %2375 = vmatpush2.bf16.msra.mxu0 %v3610_v11 }
 0x3f6   : > { %2376 = vmatprep.subr.bf16.mxu0 %v3611_v21 }
 0x3f9   : > { %2377 = vmatpush2.bf16.msra.mxu0 %v3612_v24 }
 0x43c   : > { %v2155_v3 = vpop.f32.mrf.mxu0  ;;  %v2196_v10 = vpop.f32.mrf.mxu1 }
 0x43d   : > { %v2156_v52 = vadd.f32 %v2155_v3, %v5401_v49  ;;  %v2197_v19 = vadd.f32 %v2196_v10, %v4746_v31  ;;  %v2291_v10 = vpop.permute.xlu1 %2290 }
 0x43e   : > { %v2157_v26 = vpop.f32.mrf.mxu0  ;;  %v2198_v54 = vpop.f32.mrf.mxu1  ;;  %vm2292_vm12 = vcmp.eq.s32.totalorder %v2291_v10, 1 }
 0x43f   : > { %v2244_v56 = vadd.f32 %v2156_v52, %v5402_v38  ;;  %v2158_v18 = vadd.f32 %v2157_v26, %v4738_v40  ;;  %v2199_v62 = vadd.f32 %v2198_v54, %v4749_v27  ;;  %v2299_v52 = vpop.permute.xlu0 %2298 }
 0x440   : > { %v2159_v61 = vpop.f32.mrf.mxu0  ;;  %v2200_v53 = vpop.f32.mrf.mxu1  ;;  %vm2300_vm13 = vcmp.eq.s32.totalorder %v2299_v52, 1 }
 0x441   : > { %v3000_v15 = vmul.f32 -1.442695, %v2244_v56  ;;  %v2251_v42 = vadd.f32 %v2158_v18, %v5403_v30  ;;  %v2265_v9 = vadd.f32 %v2199_v62, %v5404_v5  ;;  %v3613_v53 = vld [vmem:[#allocation11 + $0x160] ss:$24 sps:$4 sm:$0xff]   ;;  %v3620_v30 = vld [vmem:[#allocation11 + $0xa4] ss:$24 sps:$4 sm:$0xff]  }
 0x442   : > { %v2160_v47 = vpop.f32.mrf.mxu0  ;;  %v2201_v58 = vpop.f32.mrf.mxu1  ;;  %v3617_v18 = vld [vmem:[#allocation11 + $0x100] ss:$24 sps:$4 sm:$0xff]   ;;  %v3626_v5 = vld [vmem:[#allocation11 + $0x14] ss:$24 sps:$4 sm:$0xff]  }
 0x443   : > { %3508 = vpow2.f32 %v3000_v15  ;;  %v3001_v32 = vmul.f32 -1.442695, %v2251_v42  ;;  %v3002_v13 = vmul.f32 -1.442695, %v2265_v9  ;;  %v3616_v15 = vld [vmem:[#allocation11 + $0x104] ss:$24 sps:$4 sm:$0xff]  }
 0x444   : > { %v3618_v47 = vld [vmem:[#allocation11 + $0xd4] ss:$24 sps:$4 sm:$0xff]   ;;  %v3619_v58 = vld [vmem:[#allocation11 + $0xd0] ss:$24 sps:$4 sm:$0xff]   ;;  %v3621_v42 = vld [vmem:[#allocation11 + $0xa0] ss:$24 sps:$4 sm:$0xff]  }
 0x445   : > { %3510 = vpow2.f32 %v3001_v32  ;;  %v3622_v32 = vld [vmem:[#allocation11 + $0x74] ss:$24 sps:$4 sm:$0xff]   ;;  %v3625_v62 = vld [vmem:[#allocation11 + $0x40] ss:$24 sps:$4 sm:$0xff]   ;;  %v3627_v9 = vld [vmem:[#allocation11 + $0x10] ss:$24 sps:$4 sm:$0xff]  }
 0x450   : > { %v3509_v60 = vpop.eup %3508 }
 0x451   : > { %v2248_v0 = vadd.f32 1.0, %v3509_v60  ;;  %v3623_v60 = vld [vmem:[#allocation11 + $0x70] ss:$24 sps:$4 sm:$0xff]  }
 0x452   : > { %v3511_v63 = vpop.eup %3510 }
 0x453   : > { %3512 = vrcp.f32 %v2248_v0  ;;  %v2255_v14 = vadd.f32 1.0, %v3511_v63  ;;  %v3624_v0 = vld [vmem:[#allocation11 + $0x44] ss:$24 sps:$4 sm:$0xff]  }
 0x454   : > { %3514 = vpow2.f32 %v3002_v13  ;;  %v3628_v63 = vld [vmem:[#allocation11 + $0x2e4] ss:$24 sps:$4 sm:$0xff]   ;;  %v3629_v13 = vld [vmem:[#allocation11 + $0x2e0] ss:$24 sps:$4 sm:$0xff]  }
 0x455   : > { %3516 = vrcp.f32 %v2255_v14  ;;  %v3630_v14 = vld [vmem:[#allocation11 + $0x2b4] ss:$24 sps:$4 sm:$0xff]  }
 0x460   : > { %v3513_v22 = vpop.eup %3512 }
 0x461   : > { %v2258_v23 = vmul.f32 %v3513_v22, %v2197_v19  ;;  %v3515_v1 = vpop.eup %3514  ;;  %v3631_v19 = vld [vmem:[#allocation11 + $0x2b0] ss:$24 sps:$4 sm:$0xff]   ;;  %v3632_v22 = vld [vmem:[#allocation11 + $0x284] ss:$24 sps:$4 sm:$0xff]  }
 0x462   : > { %v3517_v4 = vpop.eup %3516  ;;  %v2269_v37 = vadd.f32 1.0, %v3515_v1  ;;  %v3636_v1 = vld [vmem:[#allocation11 + $0x224] ss:$24 sps:$4 sm:$0xff]  }
 0x463   : > { %v2259_v34 = vadd.f32 %v2258_v23, %v5405_v35  ;;  %v2261_v17 = vsub.f32 1.0, %v3517_v4  ;;  %v2263_v28 = vmul.f32 %v3517_v4, %v4940_v51  ;;  %v3633_v23 = vld [vmem:[#allocation11 + $0x280] ss:$24 sps:$4 sm:$0xff]   ;;  %v3634_v35 = vld [vmem:[#allocation11 + $0x254] ss:$24 sps:$4 sm:$0xff]  }
 0x464   : > { %v3637_v4 = vld [vmem:[#allocation11 + $0x220] ss:$24 sps:$4 sm:$0xff]  }
 0x465   : > { %3518 = vtanh.f32 %v2259_v34  ;;  %v3635_v34 = vld [vmem:[#allocation11 + $0x250] ss:$24 sps:$4 sm:$0xff]  }
 0x466   : > { %3520 = vrcp.f32 %v2269_v37  ;;  %v3638_v37 = vld [vmem:[#allocation11 + $0x1f4] ss:$24 sps:$4 sm:$0xff]  }
 0x472   : > { %v3519_v57 = vpop.eup %3518 }
 0x473   : > { %v2262_v43 = vmul.f32 %v3519_v57, %v2261_v17  ;;  %v3521_v33 = vpop.eup %3520  ;;  %v3639_v17 = vld [vmem:[#allocation11 + $0x1f0] ss:$24 sps:$4 sm:$0xff]   ;;  %v3640_v57 = vld [vmem:[#allocation11 + $0x1c4] ss:$24 sps:$4 sm:$0xff]  }
 0x475   : > { %v2264_v48 = vadd.f32 %v2263_v28, %v2262_v43  ;;  %v3641_v43 = vld [vmem:[#allocation11 + $0x1c0] ss:$24 sps:$4 sm:$0xff]   ;;  %v3642_v28 = vld [vmem:[#allocation11 + $0x194] ss:$24 sps:$4 sm:$0xff]  }
 0x477   : > { %v5016_v54 = vsel %vm2292_vm12, %v2264_v48, %v4940_v51  ;;  %v3614_v51 = vld [vmem:[#allocation11 + $0x134] ss:$24 sps:$4 sm:$0xff]   ;;  %v3643_v48 = vld [vmem:[#allocation11 + $0x190] ss:$24 sps:$4 sm:$0xff]  }
 0x478   : > { %v5025_v61 = vpack.c.bf16 %v5016_v54, %v5016_v54 }
 0x47c   : > { %v2237_v39 = vpop.f32.mrf.mxu0 }
 0x47d   : > { %v2238_v36 = vadd.f32 %v2237_v39, %v4770_v12 }
 0x47e   : > { %v2239_v20 = vpop.f32.mrf.mxu0 }
 0x47f   : > { %v2272_v25 = vadd.f32 %v2238_v36, %v5406_v6  ;;  %v2240_v50 = vadd.f32 %v2239_v20, %v4777_v55 }
 0x480   : > { %v2241_v44 = vpop.f32.mrf.mxu0 }
 0x481   : > { %v3003_v29 = vmul.f32 -1.442695, %v2272_v25  ;;  %v2279_v41 = vmul.f32 %v3521_v33, %v2240_v50  ;;  %v5408_v50 = vld [vmem:[#allocation83_spill] sm:$0xff] }
 0x482   : > { %v2242_v16 = vpop.f32.mrf.mxu0 }
 0x483   : > { %3522 = vpow2.f32 %v3003_v29  ;;  %v2280_v8 = vadd.f32 %v2279_v41, %v5407_v2 }
 0x490   : > { %v3523_v7 = vpop.eup %3522 }
 0x491   : > { %v2276_v45 = vadd.f32 1.0, %v3523_v7  ;;  %v5409_v7 = vld [vmem:[#allocation84_spill] sm:$0xff] }
 0x493   : > { %3524 = vrcp.f32 %v2276_v45 }
 0x494   : > { %3526 = vtanh.f32 %v2280_v8 }
 0x4a0   : > { %v3525_v46 = vpop.eup %3524 }
 0x4a1   : > { %v2282_v11 = vsub.f32 1.0, %v3525_v46  ;;  %v3527_v21 = vpop.eup %3526  ;;  %v2284_v3 = vmul.f32 %v3525_v46, %v4943_v59 }
 0x4a3   : > { %v2283_v24 = vmul.f32 %v3527_v21, %v2282_v11 }
 0x4a5   : > { %v2285_v26 = vadd.f32 %v2284_v3, %v2283_v24  ;;  %v5410_v24 = vld [vmem:[#allocation24_spill] sm:$0xff] }
 0x4a7   : > { %v5019_v38 = vsel %vm2300_vm13, %v2285_v26, %v4943_v59  ;;  %v3615_v59 = vld [vmem:[#allocation11 + $0x130] ss:$24 sps:$4 sm:$0xff]  }
 0x4a8   : > { %v2304_v56 = vpack.c.bf16 %v5019_v38, %v5019_v38 }
 0x4aa   : > { %2337 = vmatprep.mubr.bf16.mxu1 %v2304_v56  ;;  %2378 = vmatprep.mubr.bf16.mxu0 %v2304_v56 }
 0x4ab   : > { %2338 = vmatmul.mubr.bf16.vlgmr.msra.gmra.mxu1 %v5025_v61  ;;  %2379 = vmatmul.mubr.bf16.vlgmr.msra.gmra.mxu0 %v5025_v61 }
 0x4ac   : > { %2388 = vmatpush1.bf16.msra.mxu1 %v3613_v53  ;;  %2419 = vmatprep.mubr.bf16.mxu1 %v2304_v56  ;;  %v5411_v53 = vld [vmem:[#allocation78_spill] sm:$0xff] }
 0x4ad   : > { %2389 = vmatprep.subr.bf16.mxu1 %v3614_v51 }
 0x4b0   : > { %2390 = vmatpush1.bf16.msra.mxu1 %v3615_v59 }
 0x4b1   : > { %2391 = vmatprep.subr.bf16.mxu1 %v3616_v15 }
 0x4b4   : > { %2392 = vmatpush1.bf16.msra.mxu1 %v3617_v18 }
 0x4b5   : > { %2393 = vmatprep.subr.bf16.mxu1 %v3618_v47 }
 0x4b8   : > { %2394 = vmatpush1.bf16.msra.mxu1 %v3619_v58 }
 0x4b9   : > { %2395 = vmatprep.subr.bf16.mxu1 %v3620_v30 }
 0x4bc   : > { %2396 = vmatpush1.bf16.msra.mxu1 %v3621_v42 }
 0x4bd   : > { %2397 = vmatprep.subr.bf16.mxu1 %v3622_v32 }
 0x4c0   : > { %2398 = vmatpush1.bf16.msra.mxu1 %v3623_v60 }
 0x4c1   : > { %2399 = vmatprep.subr.bf16.mxu1 %v3624_v0 }
 0x4c4   : > { %2400 = vmatpush1.bf16.msra.mxu1 %v3625_v62 }
 0x4c5   : > { %2401 = vmatprep.subr.bf16.mxu1 %v3626_v5  ;;  %v5412_v5 = vld [vmem:[#allocation86_spill] sm:$0xff] }
 0x4c8   : > { %2402 = vmatpush1.bf16.msra.mxu1 %v3627_v9 }
 0x4c9   : > { %2403 = vmatprep.subr.bf16.mxu1 %v3628_v63 }
 0x4cc   : > { %2404 = vmatpush2.bf16.msra.mxu1 %v3629_v13 }
 0x4cd   : > { %2405 = vmatprep.subr.bf16.mxu1 %v3630_v14 }
 0x4d0   : > { %2406 = vmatpush2.bf16.msra.mxu1 %v3631_v19 }
 0x4d1   : > { %2407 = vmatprep.subr.bf16.mxu1 %v3632_v22 }
 0x4d4   : > { %2408 = vmatpush2.bf16.msra.mxu1 %v3633_v23 }
 0x4d5   : > { %2409 = vmatprep.subr.bf16.mxu1 %v3634_v35  ;;  %v5413_v35 = vld [vmem:[#allocation87_spill] sm:$0xff] }
 0x4d8   : > { %2410 = vmatpush2.bf16.msra.mxu1 %v3635_v34 }
 0x4d9   : > { %2411 = vmatprep.subr.bf16.mxu1 %v3636_v1 }
 0x4dc   : > { %2412 = vmatpush2.bf16.msra.mxu1 %v3637_v4 }
 0x4dd   : > { %2413 = vmatprep.subr.bf16.mxu1 %v3638_v37 }
 0x4e0   : > { %2414 = vmatpush2.bf16.msra.mxu1 %v3639_v17  ;;  %v2483_v17 = vpop.permute.xlu1 %2482 }
 0x4e1   : > { %2415 = vmatprep.subr.bf16.mxu1 %v3640_v57  ;;  %vm2484_vm15 = vcmp.eq.s32.totalorder %v2483_v17, 1 }
 0x4e4   : > { %2416 = vmatpush2.bf16.msra.mxu1 %v3641_v43 }
 0x4e5   : > { %2417 = vmatprep.subr.bf16.mxu1 %v3642_v28 }
 0x4e8   : > { %2418 = vmatpush2.bf16.msra.mxu1 %v3643_v48 }
 0x4eb   : > { %2420 = vmatmul.mubr.bf16.vlgmr.msra.gmra.mxu1 %v5025_v61 }
 0x56b   : > { %v2339_v39 = vpop.f32.mrf.mxu1  ;;  %v2380_v36 = vpop.f32.mrf.mxu0 }
 0x56c   : > { %v2340_v20 = vadd.f32 %v2339_v39, %v5401_v49  ;;  %v2381_v56 = vadd.f32 %v2380_v36, %v4746_v31 }
 0x56d   : > { %v2341_v6 = vpop.f32.mrf.mxu1  ;;  %v2382_v25 = vpop.f32.mrf.mxu0 }
 0x56e   : > { %v2428_v33 = vadd.f32 %v2340_v20, %v5408_v50  ;;  %v2342_v16 = vadd.f32 %v2341_v6, %v4738_v40  ;;  %v2383_v49 = vadd.f32 %v2382_v25, %v4749_v27  ;;  %v2475_v27 = vpop.permute.xlu0 %2474 }
 0x56f   : > { %v2343_v44 = vpop.f32.mrf.mxu1  ;;  %v2384_v29 = vpop.f32.mrf.mxu0  ;;  %vm2476_vm14 = vcmp.eq.s32.totalorder %v2475_v27, 1 }
 0x570   : > { %v3004_v41 = vmul.f32 -1.442695, %v2428_v33  ;;  %v2435_v45 = vadd.f32 %v2342_v16, %v5409_v7  ;;  %v2449_v3 = vadd.f32 %v2383_v49, %v5410_v24 }
 0x571   : > { %v2344_v2 = vpop.f32.mrf.mxu1  ;;  %v2385_v8 = vpop.f32.mrf.mxu0 }
 0x572   : > { %3528 = vpow2.f32 %v3004_v41  ;;  %v3005_v46 = vmul.f32 -1.442695, %v2435_v45  ;;  %v3006_v52 = vmul.f32 -1.442695, %v2449_v3 }
 0x574   : > { %3530 = vpow2.f32 %v3005_v46 }
 0x57f   : > { %v3529_v11 = vpop.eup %3528 }
 0x580   : > { %v2432_v21 = vadd.f32 1.0, %v3529_v11 }
 0x581   : > { %v3531_v10 = vpop.eup %3530 }
 0x582   : > { %3532 = vrcp.f32 %v2432_v21  ;;  %v2439_v26 = vadd.f32 1.0, %v3531_v10 }
 0x583   : > { %3534 = vpow2.f32 %v3006_v52 }
 0x584   : > { %3536 = vrcp.f32 %v2439_v26 }
 0x58f   : > { %v3533_v40 = vpop.eup %3532 }
 0x590   : > { %v2442_v61 = vmul.f32 %v3533_v40, %v2381_v56  ;;  %v3535_v59 = vpop.eup %3534 }
 0x591   : > { %v3537_v15 = vpop.eup %3536  ;;  %v2453_v18 = vadd.f32 1.0, %v3535_v59 }
 0x592   : > { %v2443_v51 = vadd.f32 %v2442_v61, %v5411_v53  ;;  %v2445_v47 = vsub.f32 1.0, %v3537_v15  ;;  %v2447_v42 = vmul.f32 %v3537_v15, %v5016_v54 }
 0x594   : > { %3538 = vtanh.f32 %v2443_v51 }
 0x595   : > { %3540 = vrcp.f32 %v2453_v18 }
 0x5a1   : > { %v3539_v58 = vpop.eup %3538 }
 0x5a2   : > { %v2446_v30 = vmul.f32 %v3539_v58, %v2445_v47  ;;  %v3541_v13 = vpop.eup %3540 }
 0x5a4   : > { %v2448_v32 = vadd.f32 %v2447_v42, %v2446_v30 }
 0x5a6   : > { %v5040_v31 = vsel %vm2476_vm14, %v2448_v32, %v5016_v54 }
 0x5a7   : > { %2486 = vst [vmem:[#allocation2] sm:$0xff] %v5040_v31 }
 0x5ab   : > { %v2421_v60 = vpop.f32.mrf.mxu1 }
 0x5ac   : > { %v2422_v0 = vadd.f32 %v2421_v60, %v4770_v12 }
 0x5ad   : > { %v2423_v62 = vpop.f32.mrf.mxu1 }
 0x5ae   : > { %v2456_v9 = vadd.f32 %v2422_v0, %v5412_v5  ;;  %v2424_v63 = vadd.f32 %v2423_v62, %v4777_v55 }
 0x5af   : > { %v2425_v14 = vpop.f32.mrf.mxu1 }
 0x5b0   : > { %v3007_v19 = vmul.f32 -1.442695, %v2456_v9  ;;  %v2463_v22 = vmul.f32 %v3541_v13, %v2424_v63 }
 0x5b1   : > { %v2426_v23 = vpop.f32.mrf.mxu1 }
 0x5b2   : > { %3542 = vpow2.f32 %v3007_v19  ;;  %v2464_v34 = vadd.f32 %v2463_v22, %v5413_v35 }
 0x5bf   : > { %v3543_v54 = vpop.eup %3542 }
 0x5c0   : > { %v2460_v1 = vadd.f32 1.0, %v3543_v54 }
 0x5c2   : > { %3544 = vrcp.f32 %v2460_v1 }
 0x5c3   : > { %3546 = vtanh.f32 %v2464_v34 }
 0x5cf   : > { %v3545_v4 = vpop.eup %3544 }
 0x5d0   : > { %v2466_v37 = vsub.f32 1.0, %v3545_v4  ;;  %v3547_v12 = vpop.eup %3546  ;;  %v2468_v57 = vmul.f32 %v3545_v4, %v5019_v38 }
 0x5d2   : > { %v2467_v43 = vmul.f32 %v3547_v12, %v2466_v37 }
 0x5d3   : > { %2491 = sbr.rel (%p3008_p8) target bundleno = 1729 (0x6c1), region = 96 }
 0x5d4   : > { %v2469_v55 = vadd.f32 %v2468_v57, %v2467_v43 }
 0x5d6   : > { %v2485_v28 = vsel %vm2484_vm15, %v2469_v55, %v5019_v38 }
 0x5d7   : > { %2487 = vst [vmem:[#allocation2 + $0x8] sm:$0xff] %v2485_v28 }
 0x5d8   : > { %v3644_v48 = vld [vmem:[#allocation12 + $0x78] sm:$0xff]   ;;  %v2493_v39 = vpack.c.bf16 %v2485_v28, %v2485_v28  ;;  %v3646_v20 = vld [vmem:[#allocation12 + $0x70] sm:$0xff]   ;;  %v3648_v25 = vld [vmem:[#allocation12 + $0x68] sm:$0xff]   ;;  %v2492_v46 = vpack.c.bf16 %v5040_v31, %v5040_v31 }
 0x5d9   : > { %v3645_v36 = vld [vmem:[#allocation12 + $0x38] sm:$0xff]   ;;  %3052 = vmatprep.subr.bf16.mxu0 %v3644_v48  ;;  %v3647_v6 = vld [vmem:[#allocation12 + $0x30] sm:$0xff]   ;;  %v3649_v50 = vld [vmem:[#allocation12 + $0x28] sm:$0xff]  }
 0x5da   : > { %2661 = vmatprep.mubr.bf16.mxu0 %v2493_v39  ;;  %3053 = vmatpush3.bf16.msra.mxu0 %v3645_v36  ;;  %v3650_v33 = vld [vmem:[#allocation12 + $0x60] sm:$0xff]   ;;  %v3652_v44 = vld [vmem:[#allocation12 + $0x58] sm:$0xff]   ;;  %v3654_v41 = vld [vmem:[#allocation12 + $0x50] sm:$0xff]  }
 0x5db   : > { %3054 = vmatprep.subr.bf16.mxu0 %v3646_v20  ;;  %v3651_v38 = vld [vmem:[#allocation12 + $0x20] sm:$0xff]   ;;  %v3653_v29 = vld [vmem:[#allocation12 + $0x18] sm:$0xff]   ;;  %v3655_v16 = vld [vmem:[#allocation12 + $0x10] sm:$0xff]  }
 0x5dc   : > { %v3656_v2 = vld [vmem:[#allocation12 + $0x48] sm:$0xff]   ;;  %v3658_v7 = vld [vmem:[#allocation12 + $0x40] sm:$0xff]   ;;  %v3009_v21 = vld [vmem:[%s5414_s27] ss:$0 sm:$0xff] }
 0x5dd   : > { %v3657_v8 = vld [vmem:[#allocation12 + $0x8] sm:$0xff]   ;;  %v3659_v45 = vld [vmem:[#allocation12] sm:$0xff]  }
 0x5de   : > { %3055 = vmatpush3.bf16.msra.mxu0 %v3647_v6 }
 0x5df   : > { %3056 = vmatprep.subr.bf16.mxu0 %v3648_v25 }
 0x5e2   : > { %3057 = vmatpush3.bf16.msra.mxu0 %v3649_v50 }
 0x5e3   : > { %3058 = vmatprep.subr.bf16.mxu0 %v3650_v33 }
 0x5e6   : > { %3059 = vmatpush3.bf16.msra.mxu0 %v3651_v38 }
 0x5e7   : > { %3060 = vmatprep.subr.bf16.mxu0 %v3652_v44 }
 0x5ea   : > { %3061 = vmatpush3.bf16.msra.mxu0 %v3653_v29 }
 0x5eb   : > { %3062 = vmatprep.subr.bf16.mxu0 %v3654_v41 }
 0x5ee   : > { %3063 = vmatpush3.bf16.msra.mxu0 %v3655_v16 }
 0x5ef   : > { %3064 = vmatprep.subr.bf16.mxu0 %v3656_v2 }
 0x5f2   : > { %3065 = vmatpush3.bf16.msra.mxu0 %v3657_v8 }
 0x5f3   : > { %3066 = vmatprep.subr.bf16.mxu0 %v3658_v7 }
 0x5f6   : > { %3067 = vmatpush3.bf16.msra.mxu0 %v3659_v45 }
 0x5f9   : > { %2662 = vmatmul.mubr.bf16.vlgmr.msra.gmra.mxu0 %v2492_v46 }
 0x6b9   : > { %v3068_v11 = vpop.f32.mrf.mxu0 }
 0x6bb   : > { %v3069_v49 = vpop.f32.mrf.mxu0 }
 0x6bc   : > { %v3070_v24 = vadd.f32 %v3069_v49, %v3068_v11 }
 0x6bd   : > { %v3071_v3 = vpop.f32.mrf.mxu0 }
 0x6be   : > { %v2664_v10 = vadd.f32 %v3070_v24, %v3009_v21 }
 0x6bf   : > { %v3072_v52 = vpop.f32.mrf.mxu0 }
 0x6c0   : > { %2669 = vst [vmem:[#allocation14] sm:$0xff] %v2664_v10 }
 0x6c1 PF: > { %p3167_p2 = scmp.eq.s32.totalorder %s4059_s26, 1  ;;  %s3954_s15 = smov [#allocation14]  }
 0x6c2   : > { %s2679_s4 = sshll.u32 %s3954_s15, 4  ;;  %s2680_s4 = int_to_ptr.vmem [resolvable:$true] %s2679_s4 }
 0x6c3   : > { %s3820_s9 = scalar_lea.vmem %s2680_s4, 128  ;;  %p3827_p1 = scmp.lt.s32.totalorder %s2680_s4, %s2680_s4 }
 0x6c4   : > { %p3821_p6 = scmp.ne.s32.totalorder %s2680_s4, %s3820_s9  ;;  %p3828_p5 = scmp.lt.s32.totalorder %s3820_s9, %s3820_s9 }
 0x6c6   : > { %p3822_p10 = pnand %p3821_p6, %p3167_p2  ;;  %p3829_p12 = por %p3828_p5, %p3827_p1 }
 0x6c8   : > { %p3823_p9 = pneg %p3822_p10 }
 0x6ca   : > { %p3830_p7 = pnand %p3829_p12, %p3823_p9 }
 0x6cc   : > { %3833 = shalt.err (!%p3830_p7)
}
 0x6cd   : > { %s5415_s10 = sld [smem:[#allocation101_spill]] }
 0x6d3   : > { %3135 = dma.vmem_to_hbm [thread:$0]  (%p3167_p2), %s2680_s4, 128, %s5415_s10, [#allocation5]  }
 0x6d4   : > { %3901 = dma.done.wait (%p3167_p2), [#allocation5], 128  }
 0x6d5   : > { %3903 = vsyncadd (%p3167_p2), [#allocation5], 4294967168 }
 0x6d6 PF: > { %s30_s25 = sadd.s32 1, %s3938_s25   ;;  %s5416_s14 = sld [smem:[#allocation21_spill]] }
 0x6d7   : > { %p27_p11 = scmp.ge.s32.totalorder %s30_s25, 4   ;;  %s5417_s22 = sld [smem:[#allocation23_spill]] }
 0x6d8   : > { %s5418_s23 = sld [smem:[#allocation22_spill]]  ;;  %s5419_s17 = smov %s3910_s18 }
 0x6d9   : > { %s5420_s18 = smov %s3914_s19  ;;  %s5421_s19 = smov %s4176_s5 }
 0x6da   : > { %s5422_s20 = smov %s3922_s21  ;;  %s5424_s24 = smov %s5426_s30 }
 0x6db   :  { %29 = sbr.rel (!%p27_p11) target bundleno = 20 (0x14), region = 142 }
 0x6dc   : > { %s5423_s21 = smov %s5416_s14 }
 0x6e0   :  { %2692 = vsyncpa [#allocation4], 1 }
 0x6e1   :  { %2694 = vsyncpa [#allocation4 + $0x1], 1 }
 0x6e2   :  { %2695 = vsyncpa [#allocation7], 1 }
 0x6e3   :  { %2697 = vsyncpa [#allocation7 + $0x1], 1 }
 0x6e4   :  { %2698 = vsyncpa [#allocation10], 1 }
 0x6e5   :  { %2699 = vsyncpa [#allocation13], 1 }
 0x6e6   :  { %2700 = vsyncpa [#allocation5], 1 }
 0x6e7   :  { %2702 = vsyncpa [#allocation5 + $0x1], 1 }

</bundles_post_ra>
